<compile_context>
chip_gen: v7x
topology: tpu7x:2x2x1
jax: 0.10.0
libtpu: 0.0.40
codegen_flags: <defaults>
</compile_context>

<pallas_src>
import numpy as np
import jax
import jax.numpy as jnp
from jax.experimental import pallas as pl
from jax.experimental.pallas import tpu as pltpu


_N_DW_REFS = 5   # w1t, vecM(6,M,1), wdw(9,M,1), wpt, vecC(2,C,1)
_N_SE_REFS = 8   # ... + wf_pair(2,C,Cr), se_row(2,1,Cr), se_col(2,C,1)


def _prelu(v, a):
    return jnp.maximum(v, 0.0) + a * jnp.minimum(v, 0.0)


# ----------------------------------------------------------------------------
# Fused kernel (all blocks, all batch elements, one invocation)
# ----------------------------------------------------------------------------
def make_residual_se_kernel(has_se_flags, B, H, W):
    HW = H * W
    L = B * HW
    inv_hw = 1.0 / float(HW)                                  # compile-time constant
    taps = [(a, b) for a in (-1, 0, 1) for b in (-1, 0, 1)]   # k = (a+1)*3 + (b+1)

    def kernel(*refs):
        x_ref, mask_ref = refs[0], refs[1]
        o_ref = refs[-1]
        param_refs = refs[2:-1]

        y = x_ref[...]                    # (C, B*HW): channels on sublanes, B*HW on lanes
        tap_masks = mask_ref[...]         # (9, B*HW) float 0/1 edge-validity masks

        pi = 0
        for has_se in has_se_flags:
            n = _N_SE_REFS if has_se else _N_DW_REFS
            prm = param_refs[pi:pi + n]
            pi += n
            w1t = prm[0][...]             # (M, C)
            vecM = prm[1]                 # (6, M, 1) ref: s1,b1,a1,s2,b2,a2
            wdw = prm[2]                  # (9, M, 1) ref: per-tap depthwise weights
            wpt = prm[3][...]             # (C, M)
            vecC = prm[4]                 # (2, C, 1) ref: s3,b3
            s1, b1, a1 = vecM[0], vecM[1], vecM[2]
            s2, b2, a2 = vecM[3], vecM[4], vecM[5]
            s3, b3 = vecC[0], vecC[1]

            # --- 1x1 conv + BN + PReLU (lane-dense (M, B*HW) output) ----------
            h = jnp.dot(w1t, y, preferred_element_type=jnp.float32)       # (M, L)
            h = _prelu(h * s1 + b1, a1)

            # --- depthwise 3x3: roll (XLU) + mask + per-channel FMA -----------
            acc = None
            for k, (a, b) in enumerate(taps):
                d = a * W + b                                 # flat offset of tap
                t = h if d == 0 else pltpu.roll(h, shift=(-d) % L, axis=1)
                if a != 0 or b != 0:
                    t = t * tap_masks[k:k + 1, :]             # zero wrapped positions
                contrib = wdw[k] * t                          # (M,1) lane-0 broadcast
                acc = contrib if acc is None else acc + contrib
            acc = _prelu(acc * s2 + b2, a2)

            # --- 1x1 projection + BN (no activation) --------------------------
            p = jnp.dot(wpt, acc, preferred_element_type=jnp.float32)     # (C, L)
            p = p * s3 + b3

            # --- SEModule: per-batch pool -> fc1+BN+ReLU -> fc2+BN+sigmoid ----
            # (VPU/XLU only: multiply + reduce; no MXU for the tiny FCs)
            if has_se:
                wf_pair, se_row, se_col = prm[5], prm[6], prm[7]
                wf1 = wf_pair[0]                              # (C, Cr)
                wf2t = wf_pair[1]                             # (C, Cr)
                ss1, sb1 = se_row[0], se_row[1]               # (1, Cr)
                ss2, sb2 = se_col[0], se_col[1]               # (C, 1)
                segs = []
                for bi in range(B):                           # 128-aligned lane slices
                    seg = p[:, bi * HW:(bi + 1) * HW]                     # (C, HW)
                    pooled = jnp.sum(seg, axis=1, keepdims=True) * inv_hw  # (C, 1)
                    g = jnp.sum(wf1 * pooled, axis=0, keepdims=True)       # (1, Cr)
                    g = jnp.maximum(g * ss1 + sb1, 0.0)
                    g = jnp.sum(wf2t * g, axis=1, keepdims=True)           # (C, 1)
                    g = jax.nn.sigmoid(g * ss2 + sb2)
                    segs.append(seg * g)
                p = jnp.concatenate(segs, axis=1)             # back to (C, L)

            y = y + p                                         # residual add

        o_ref[...] = y.astype(o_ref.dtype)                    # single lane-dense store

    return kernel


# ----------------------------------------------------------------------------
# Wrapper: layout plumbing, param packing, pallas_call
# ----------------------------------------------------------------------------
def _make_tap_masks(H, W, B):
    """(9, B*H*W) float 0/1 masks: validity of tap (a,b) at each flattened position."""
    row = np.repeat(np.arange(H), W)
    col = np.tile(np.arange(W), H)
    masks = []
    for a in (-1, 0, 1):
        for b in (-1, 0, 1):
            ok = np.ones(H * W, dtype=bool)
            if a == -1:
                ok &= row >= 1
            if a == 1:
                ok &= row <= H - 2
            if b == -1:
                ok &= col >= 1
            if b == 1:
                ok &= col <= W - 2
            masks.append(ok)
    m = np.stack(masks).astype(np.float32)            # (9, HW)
    return jnp.asarray(np.tile(m, (1, B)))            # tiled over batch -> (9, B*HW)


def prep_block_params(p, se):
    """Pack natural-layout params into a few channel-on-sublane slabs per block."""
    C, M = p['w1'].shape
    out = [
        p['w1'].T,                                                        # (M, C)
        jnp.stack([p['s1'].reshape(M, 1), p['b1'].reshape(M, 1), p['a1'].reshape(M, 1),
                   p['s2'].reshape(M, 1), p['b2'].reshape(M, 1), p['a2'].reshape(M, 1)]),
        p['wdw'].reshape(9, M)[:, :, None],                               # (9, M, 1)
        p['wp'].T,                                                        # (C, M)
        jnp.stack([p['s3'].reshape(C, 1), p['b3'].reshape(C, 1)]),        # (2, C, 1)
    ]
    if se:
        Cr = p['wf1'].shape[1]
        out += [
            jnp.stack([p['wf1'], p['wf2'].T]),                            # (2, C, Cr)
            jnp.stack([p['ss1'].reshape(1, Cr), p['sb1'].reshape(1, Cr)]),  # (2, 1, Cr)
            jnp.stack([p['ss2'].reshape(C, 1), p['sb2'].reshape(C, 1)]),  # (2, C, 1)
        ]
    return out


def residual_se_forward(x_nchw, blocks):
    """x_nchw: (B, C, H, W) float32. blocks: list of (params_dict, has_se)."""
    B, C, H, W = x_nchw.shape
    HW = H * W
    L = B * HW
    # Lane-dense (C, B*HW) slab: one XLA transpose outside the kernel (layout plumbing).
    x2 = jnp.transpose(x_nchw, (1, 0, 2, 3)).reshape(C, L)
    tap_masks = _make_tap_masks(H, W, B)

    has_se_flags = [se for _, se in blocks]
    args = []
    for params, se in blocks:
        args.extend(prep_block_params(params, se))

    kernel = make_residual_se_kernel(has_se_flags, B, H, W)

    def _full(a):                           # whole array resident in VMEM, one DMA
        nd = a.ndim
        return pl.BlockSpec(a.shape, lambda i, _nd=nd: (0,) * _nd)

    in_specs = [_full(x2), _full(tap_masks)] + [_full(a) for a in args]

    # Advisory cost estimate: two 1x1 convs + depthwise MACs + elementwise per block.
    flops = 0
    for params, _ in blocks:
        Ci, Mi = params['w1'].shape
        flops += 2 * L * (2 * Ci * Mi + 9 * Mi) + 12 * L * Mi
    transcendentals = sum(C * B for _, se in blocks if se)        # sigmoid lane count
    bytes_accessed = int(x2.size * 4 * 2 + tap_masks.size * 4
                         + sum(int(a.size) * 4 for a in args))

    out = pl.pallas_call(
        kernel,
        out_shape=jax.ShapeDtypeStruct((C, L), x_nchw.dtype),
        grid=(1,),                          # whole problem in one step: no per-step
        in_specs=in_specs,                  # overhead, params DMA'd exactly once
        out_specs=pl.BlockSpec((C, L), lambda i: (0, 0)),
        compiler_params=pltpu.CompilerParams(
            dimension_semantics=("arbitrary",),
            vmem_limit_bytes=32 * 1024 * 1024),   # explicit (v5e default is 16 MiB)
        cost_estimate=pl.CostEstimate(flops=int(flops),
                                      transcendentals=int(transcendentals),
                                      bytes_accessed=bytes_accessed),
    )(x2, tap_masks, *args)
    return jnp.transpose(out.reshape(C, B, H, W), (1, 0, 2, 3))


# ----------------------------------------------------------------------------
# Deterministic parameter init (BN folded to scale/bias, PReLU per-channel)
# ----------------------------------------------------------------------------
def init_block_params(key, C, M, se=False, se_reduct=4):
    ks = jax.random.split(key, 17)

    def rnd(i, shape, scale=0.1):
        return scale * jax.random.normal(ks[i], shape, jnp.float32)

    p = dict(
        w1=rnd(0, (C, M)),                           # 1x1 conv weight (Cin, Cout)
        s1=1.0 + rnd(1, (1, M)), b1=rnd(2, (1, M)),  # folded BN
        a1=0.25 + rnd(3, (1, M), 0.01),              # PReLU alpha
        wdw=rnd(4, (3, 3, M)),                       # depthwise weight (kh, kw, C)
        s2=1.0 + rnd(5, (1, M)), b2=rnd(6, (1, M)),
        a2=0.25 + rnd(7, (1, M), 0.01),
        wp=rnd(8, (M, C)),                           # project 1x1 conv
        s3=1.0 + rnd(9, (1, C)), b3=rnd(10, (1, C)),
    )
    if se:
        Cr = C // se_reduct
        p.update(
            wf1=rnd(11, (C, Cr)),
            ss1=1.0 + rnd(12, (1, Cr)), sb1=rnd(13, (1, Cr)),
            wf2=rnd(14, (Cr, C)),
            ss2=1.0 + rnd(15, (1, C)), sb2=rnd(16, (1, C)),
        )
    return p


# ----------------------------------------------------------------------------
# Pure-JAX reference (independent: NHWC + lax.conv for the depthwise conv)
# ----------------------------------------------------------------------------
def ref_block(x, p, se=False):
    def aff(v, s, b):
        return v * s.reshape(1, 1, 1, -1) + b.reshape(1, 1, 1, -1)

    def prelu(v, a):
        a = a.reshape(1, 1, 1, -1)
        return jnp.maximum(v, 0.0) + a * jnp.minimum(v, 0.0)

    h = jnp.einsum('bhwc,cm->bhwm', x, p['w1'])
    h = prelu(aff(h, p['s1'], p['b1']), p['a1'])
    k = p['wdw'][:, :, None, :]                      # HWIO, I=1 (depthwise)
    h = jax.lax.conv_general_dilated(
        h, k, window_strides=(1, 1), padding=((1, 1), (1, 1)),
        dimension_numbers=('NHWC', 'HWIO', 'NHWC'),
        feature_group_count=h.shape[-1])
    h = prelu(aff(h, p['s2'], p['b2']), p['a2'])
    z = jnp.einsum('bhwm,mc->bhwc', h, p['wp'])
    z = aff(z, p['s3'], p['b3'])
    if se:
        g = jnp.mean(z, axis=(1, 2), keepdims=True)
        g = jnp.einsum('bhwc,cd->bhwd', g, p['wf1'])
        g = jnp.maximum(aff(g, p['ss1'], p['sb1']), 0.0)
        g = jnp.einsum('bhwd,dc->bhwc', g, p['wf2'])
        g = jax.nn.sigmoid(aff(g, p['ss2'], p['sb2']))
        z = z * g
    return x + z


# ----------------------------------------------------------------------------
if __name__ == "__main__":
    # ResidualSE(c1=[(C,M)]*2, c2=[(M,M)]*2, c3=[(M,C)]*2, num_block=2,
    #            groups=M, kernel=(3,3), stride=(1,1), padding=(1,1), se_reduct=4)
    B, C, H, W = 2, 8, 16, 16
    M = 16
    num_block = 2
    se_reduct = 4

    key = jax.random.PRNGKey(0)
    kx, kp = jax.random.split(key)
    x_nchw = jax.random.normal(kx, (B, C, H, W), jnp.float32)   # PyTorch layout

    pkeys = jax.random.split(kp, num_block)
    blocks = []
    for i in range(num_block):
        has_se = (i == num_block - 1)                           # last block is Depth_Wise_SE
        blocks.append((init_block_params(pkeys[i], C, M, se=has_se, se_reduct=se_reduct),
                       has_se))

    out = jax.block_until_ready(residual_se_forward(x_nchw, blocks))

    # Cross-check against an independent pure-JAX reference of the same forward pass.
    y_ref = jnp.transpose(x_nchw, (0, 2, 3, 1))                 # NHWC for the reference
    for params, has_se in blocks:
        y_ref = ref_block(y_ref, params, se=has_se)
    y_ref = jnp.transpose(y_ref, (0, 3, 1, 2))                  # back to NCHW

    err = float(jnp.max(jnp.abs(out - y_ref)))
    assert jnp.allclose(out, y_ref, atol=1e-4, rtol=1e-4), f"max abs err {err}"

    print("KERNEL_OK")
</pallas_src>

<mosaic_0001>
module attributes {stable_mosaic.version = 11 : i64} {
  func.func @kernel(%arg0: i32, %arg1: memref<8x512xf32, #tpu.memory_space<vmem>>, %arg2: memref<9x512xf32, #tpu.memory_space<vmem>>, %arg3: memref<16x8xf32, #tpu.memory_space<vmem>>, %arg4: memref<6x16x1xf32, #tpu.memory_space<vmem>>, %arg5: memref<9x16x1xf32, #tpu.memory_space<vmem>>, %arg6: memref<8x16xf32, #tpu.memory_space<vmem>>, %arg7: memref<2x8x1xf32, #tpu.memory_space<vmem>>, %arg8: memref<16x8xf32, #tpu.memory_space<vmem>>, %arg9: memref<6x16x1xf32, #tpu.memory_space<vmem>>, %arg10: memref<9x16x1xf32, #tpu.memory_space<vmem>>, %arg11: memref<8x16xf32, #tpu.memory_space<vmem>>, %arg12: memref<2x8x1xf32, #tpu.memory_space<vmem>>, %arg13: memref<2x8x2xf32, #tpu.memory_space<vmem>>, %arg14: memref<2x1x2xf32, #tpu.memory_space<vmem>>, %arg15: memref<2x8x1xf32, #tpu.memory_space<vmem>>, %arg16: memref<8x512xf32, #tpu.memory_space<vmem>>) attributes {dimension_semantics = [#tpu.dimension_semantics<arbitrary>], iteration_bounds = array<i64: 1>, scalar_prefetch = 0 : i64, scratch_operands = 0 : i64, tpu.core_type = #tpu.core_type<tc>, window_params = [{pipeline_mode = #tpu.pipeline_mode<synchronous>, transform_indices = @transform_0, window_bounds = array<i64: 8, 512>}, {pipeline_mode = #tpu.pipeline_mode<synchronous>, transform_indices = @transform_1, window_bounds = array<i64: 9, 512>}, {pipeline_mode = #tpu.pipeline_mode<synchronous>, transform_indices = @transform_2, window_bounds = array<i64: 16, 8>}, {pipeline_mode = #tpu.pipeline_mode<synchronous>, transform_indices = @transform_3, window_bounds = array<i64: 6, 16, 1>}, {pipeline_mode = #tpu.pipeline_mode<synchronous>, transform_indices = @transform_4, window_bounds = array<i64: 9, 16, 1>}, {pipeline_mode = #tpu.pipeline_mode<synchronous>, transform_indices = @transform_5, window_bounds = array<i64: 8, 16>}, {pipeline_mode = #tpu.pipeline_mode<synchronous>, transform_indices = @transform_6, window_bounds = array<i64: 2, 8, 1>}, {pipeline_mode = #tpu.pipeline_mode<synchronous>, transform_indices = @transform_7, window_bounds = array<i64: 16, 8>}, {pipeline_mode = #tpu.pipeline_mode<synchronous>, transform_indices = @transform_8, window_bounds = array<i64: 6, 16, 1>}, {pipeline_mode = #tpu.pipeline_mode<synchronous>, transform_indices = @transform_9, window_bounds = array<i64: 9, 16, 1>}, {pipeline_mode = #tpu.pipeline_mode<synchronous>, transform_indices = @transform_10, window_bounds = array<i64: 8, 16>}, {pipeline_mode = #tpu.pipeline_mode<synchronous>, transform_indices = @transform_11, window_bounds = array<i64: 2, 8, 1>}, {pipeline_mode = #tpu.pipeline_mode<synchronous>, transform_indices = @transform_12, window_bounds = array<i64: 2, 8, 2>}, {pipeline_mode = #tpu.pipeline_mode<synchronous>, transform_indices = @transform_13, window_bounds = array<i64: 2, 1, 2>}, {pipeline_mode = #tpu.pipeline_mode<synchronous>, transform_indices = @transform_14, window_bounds = array<i64: 2, 8, 1>}, {pipeline_mode = #tpu.pipeline_mode<synchronous>, transform_indices = @transform_15, window_bounds = array<i64: 8, 512>}]} {
    %c0 = arith.constant 0 : index
    %c0_0 = arith.constant 0 : index
    %0 = vector.load %arg1[%c0, %c0_0] : memref<8x512xf32, #tpu.memory_space<vmem>>, vector<8x512xf32>
    %c0_1 = arith.constant 0 : index
    %c0_2 = arith.constant 0 : index
    %1 = vector.load %arg2[%c0_1, %c0_2] : memref<9x512xf32, #tpu.memory_space<vmem>>, vector<9x512xf32>
    %c0_3 = arith.constant 0 : index
    %c0_4 = arith.constant 0 : index
    %2 = vector.load %arg3[%c0_3, %c0_4] : memref<16x8xf32, #tpu.memory_space<vmem>>, vector<16x8xf32>
    %c0_5 = arith.constant 0 : index
    %c0_6 = arith.constant 0 : index
    %3 = vector.load %arg6[%c0_5, %c0_6] : memref<8x16xf32, #tpu.memory_space<vmem>>, vector<8x16xf32>
    %c0_7 = arith.constant 0 : index
    %c0_8 = arith.constant 0 : index
    %c0_9 = arith.constant 0 : index
    %4 = vector.load %arg4[%c0_7, %c0_8, %c0_9] : memref<6x16x1xf32, #tpu.memory_space<vmem>>, vector<1x16x1xf32>
    %5 = vector.shape_cast %4 : vector<1x16x1xf32> to vector<16x1xf32>
    %c1 = arith.constant 1 : index
    %c0_10 = arith.constant 0 : index
    %c0_11 = arith.constant 0 : index
    %6 = vector.load %arg4[%c1, %c0_10, %c0_11] : memref<6x16x1xf32, #tpu.memory_space<vmem>>, vector<1x16x1xf32>
    %7 = vector.shape_cast %6 : vector<1x16x1xf32> to vector<16x1xf32>
    %c2 = arith.constant 2 : index
    %c0_12 = arith.constant 0 : index
    %c0_13 = arith.constant 0 : index
    %8 = vector.load %arg4[%c2, %c0_12, %c0_13] : memref<6x16x1xf32, #tpu.memory_space<vmem>>, vector<1x16x1xf32>
    %9 = vector.shape_cast %8 : vector<1x16x1xf32> to vector<16x1xf32>
    %c3 = arith.constant 3 : index
    %c0_14 = arith.constant 0 : index
    %c0_15 = arith.constant 0 : index
    %10 = vector.load %arg4[%c3, %c0_14, %c0_15] : memref<6x16x1xf32, #tpu.memory_space<vmem>>, vector<1x16x1xf32>
    %11 = vector.shape_cast %10 : vector<1x16x1xf32> to vector<16x1xf32>
    %c4 = arith.constant 4 : index
    %c0_16 = arith.constant 0 : index
    %c0_17 = arith.constant 0 : index
    %12 = vector.load %arg4[%c4, %c0_16, %c0_17] : memref<6x16x1xf32, #tpu.memory_space<vmem>>, vector<1x16x1xf32>
    %13 = vector.shape_cast %12 : vector<1x16x1xf32> to vector<16x1xf32>
    %c5 = arith.constant 5 : index
    %c0_18 = arith.constant 0 : index
    %c0_19 = arith.constant 0 : index
    %14 = vector.load %arg4[%c5, %c0_18, %c0_19] : memref<6x16x1xf32, #tpu.memory_space<vmem>>, vector<1x16x1xf32>
    %15 = vector.shape_cast %14 : vector<1x16x1xf32> to vector<16x1xf32>
    %c0_20 = arith.constant 0 : index
    %c0_21 = arith.constant 0 : index
    %c0_22 = arith.constant 0 : index
    %16 = vector.load %arg7[%c0_20, %c0_21, %c0_22] : memref<2x8x1xf32, #tpu.memory_space<vmem>>, vector<1x8x1xf32>
    %17 = vector.shape_cast %16 : vector<1x8x1xf32> to vector<8x1xf32>
    %c1_23 = arith.constant 1 : index
    %c0_24 = arith.constant 0 : index
    %c0_25 = arith.constant 0 : index
    %18 = vector.load %arg7[%c1_23, %c0_24, %c0_25] : memref<2x8x1xf32, #tpu.memory_space<vmem>>, vector<1x8x1xf32>
    %19 = vector.shape_cast %18 : vector<1x8x1xf32> to vector<8x1xf32>
    %cst = arith.constant dense<0.000000e+00> : vector<16x512xf32>
    %20 = tpu.matmul %2, %0, %cst {dimension_numbers = #tpu.dot_dimension_numbers<[1], [0], [0], [1], [0, 0, 1, 1], [], []>} : vector<16x8xf32>, vector<8x512xf32>, vector<16x512xf32> -> vector<16x512xf32>
    %21 = vector.broadcast %5 : vector<16x1xf32> to vector<16x512xf32>
    %22 = arith.mulf %20, %21 : vector<16x512xf32>
    %23 = vector.broadcast %7 : vector<16x1xf32> to vector<16x512xf32>
    %24 = arith.addf %22, %23 : vector<16x512xf32>
    %cst_26 = arith.constant 0.000000e+00 : f32
    %25 = vector.broadcast %cst_26 : f32 to vector<16x512xf32>
    %26 = arith.maximumf %24, %25 : vector<16x512xf32>
    %cst_27 = arith.constant 0.000000e+00 : f32
    %27 = vector.broadcast %cst_27 : f32 to vector<16x512xf32>
    %28 = arith.minimumf %24, %27 : vector<16x512xf32>
    %29 = vector.broadcast %9 : vector<16x1xf32> to vector<16x512xf32>
    %30 = arith.mulf %29, %28 : vector<16x512xf32>
    %31 = arith.addf %26, %30 : vector<16x512xf32>
    %c17_i32 = arith.constant 17 : i32
    %32 = tpu.dynamic_rotate %31 by %c17_i32 dim 1 : vector<16x512xf32>, i32 -> vector<16x512xf32>
    %33 = vector.extract_strided_slice %1 {offsets = [0, 0], sizes = [1, 512], strides = [1, 1]} : vector<9x512xf32> to vector<1x512xf32>
    %34 = vector.broadcast %33 : vector<1x512xf32> to vector<16x512xf32>
    %35 = arith.mulf %32, %34 : vector<16x512xf32>
    %c0_28 = arith.constant 0 : index
    %c0_29 = arith.constant 0 : index
    %c0_30 = arith.constant 0 : index
    %36 = vector.load %arg5[%c0_28, %c0_29, %c0_30] : memref<9x16x1xf32, #tpu.memory_space<vmem>>, vector<1x16x1xf32>
    %37 = vector.shape_cast %36 : vector<1x16x1xf32> to vector<16x1xf32>
    %38 = vector.broadcast %37 : vector<16x1xf32> to vector<16x512xf32>
    %39 = arith.mulf %38, %35 : vector<16x512xf32>
    %c16_i32 = arith.constant 16 : i32
    %40 = tpu.dynamic_rotate %31 by %c16_i32 dim 1 : vector<16x512xf32>, i32 -> vector<16x512xf32>
    %41 = vector.extract_strided_slice %1 {offsets = [1, 0], sizes = [1, 512], strides = [1, 1]} : vector<9x512xf32> to vector<1x512xf32>
    %42 = vector.broadcast %41 : vector<1x512xf32> to vector<16x512xf32>
    %43 = arith.mulf %40, %42 : vector<16x512xf32>
    %c1_31 = arith.constant 1 : index
    %c0_32 = arith.constant 0 : index
    %c0_33 = arith.constant 0 : index
    %44 = vector.load %arg5[%c1_31, %c0_32, %c0_33] : memref<9x16x1xf32, #tpu.memory_space<vmem>>, vector<1x16x1xf32>
    %45 = vector.shape_cast %44 : vector<1x16x1xf32> to vector<16x1xf32>
    %46 = vector.broadcast %45 : vector<16x1xf32> to vector<16x512xf32>
    %47 = arith.mulf %46, %43 : vector<16x512xf32>
    %48 = arith.addf %39, %47 : vector<16x512xf32>
    %c15_i32 = arith.constant 15 : i32
    %49 = tpu.dynamic_rotate %31 by %c15_i32 dim 1 : vector<16x512xf32>, i32 -> vector<16x512xf32>
    %50 = vector.extract_strided_slice %1 {offsets = [2, 0], sizes = [1, 512], strides = [1, 1]} : vector<9x512xf32> to vector<1x512xf32>
    %51 = vector.broadcast %50 : vector<1x512xf32> to vector<16x512xf32>
    %52 = arith.mulf %49, %51 : vector<16x512xf32>
    %c2_34 = arith.constant 2 : index
    %c0_35 = arith.constant 0 : index
    %c0_36 = arith.constant 0 : index
    %53 = vector.load %arg5[%c2_34, %c0_35, %c0_36] : memref<9x16x1xf32, #tpu.memory_space<vmem>>, vector<1x16x1xf32>
    %54 = vector.shape_cast %53 : vector<1x16x1xf32> to vector<16x1xf32>
    %55 = vector.broadcast %54 : vector<16x1xf32> to vector<16x512xf32>
    %56 = arith.mulf %55, %52 : vector<16x512xf32>
    %57 = arith.addf %48, %56 : vector<16x512xf32>
    %c1_i32 = arith.constant 1 : i32
    %58 = tpu.dynamic_rotate %31 by %c1_i32 dim 1 : vector<16x512xf32>, i32 -> vector<16x512xf32>
    %59 = vector.extract_strided_slice %1 {offsets = [3, 0], sizes = [1, 512], strides = [1, 1]} : vector<9x512xf32> to vector<1x512xf32>
    %60 = vector.broadcast %59 : vector<1x512xf32> to vector<16x512xf32>
    %61 = arith.mulf %58, %60 : vector<16x512xf32>
    %c3_37 = arith.constant 3 : index
    %c0_38 = arith.constant 0 : index
    %c0_39 = arith.constant 0 : index
    %62 = vector.load %arg5[%c3_37, %c0_38, %c0_39] : memref<9x16x1xf32, #tpu.memory_space<vmem>>, vector<1x16x1xf32>
    %63 = vector.shape_cast %62 : vector<1x16x1xf32> to vector<16x1xf32>
    %64 = vector.broadcast %63 : vector<16x1xf32> to vector<16x512xf32>
    %65 = arith.mulf %64, %61 : vector<16x512xf32>
    %66 = arith.addf %57, %65 : vector<16x512xf32>
    %c4_40 = arith.constant 4 : index
    %c0_41 = arith.constant 0 : index
    %c0_42 = arith.constant 0 : index
    %67 = vector.load %arg5[%c4_40, %c0_41, %c0_42] : memref<9x16x1xf32, #tpu.memory_space<vmem>>, vector<1x16x1xf32>
    %68 = vector.shape_cast %67 : vector<1x16x1xf32> to vector<16x1xf32>
    %69 = vector.broadcast %68 : vector<16x1xf32> to vector<16x512xf32>
    %70 = arith.mulf %69, %31 : vector<16x512xf32>
    %71 = arith.addf %66, %70 : vector<16x512xf32>
    %c511_i32 = arith.constant 511 : i32
    %72 = tpu.dynamic_rotate %31 by %c511_i32 dim 1 : vector<16x512xf32>, i32 -> vector<16x512xf32>
    %73 = vector.extract_strided_slice %1 {offsets = [5, 0], sizes = [1, 512], strides = [1, 1]} : vector<9x512xf32> to vector<1x512xf32>
    %74 = vector.broadcast %73 : vector<1x512xf32> to vector<16x512xf32>
    %75 = arith.mulf %72, %74 : vector<16x512xf32>
    %c5_43 = arith.constant 5 : index
    %c0_44 = arith.constant 0 : index
    %c0_45 = arith.constant 0 : index
    %76 = vector.load %arg5[%c5_43, %c0_44, %c0_45] : memref<9x16x1xf32, #tpu.memory_space<vmem>>, vector<1x16x1xf32>
    %77 = vector.shape_cast %76 : vector<1x16x1xf32> to vector<16x1xf32>
    %78 = vector.broadcast %77 : vector<16x1xf32> to vector<16x512xf32>
    %79 = arith.mulf %78, %75 : vector<16x512xf32>
    %80 = arith.addf %71, %79 : vector<16x512xf32>
    %c497_i32 = arith.constant 497 : i32
    %81 = tpu.dynamic_rotate %31 by %c497_i32 dim 1 : vector<16x512xf32>, i32 -> vector<16x512xf32>
    %82 = vector.extract_strided_slice %1 {offsets = [6, 0], sizes = [1, 512], strides = [1, 1]} : vector<9x512xf32> to vector<1x512xf32>
    %83 = vector.broadcast %82 : vector<1x512xf32> to vector<16x512xf32>
    %84 = arith.mulf %81, %83 : vector<16x512xf32>
    %c6 = arith.constant 6 : index
    %c0_46 = arith.constant 0 : index
    %c0_47 = arith.constant 0 : index
    %85 = vector.load %arg5[%c6, %c0_46, %c0_47] : memref<9x16x1xf32, #tpu.memory_space<vmem>>, vector<1x16x1xf32>
    %86 = vector.shape_cast %85 : vector<1x16x1xf32> to vector<16x1xf32>
    %87 = vector.broadcast %86 : vector<16x1xf32> to vector<16x512xf32>
    %88 = arith.mulf %87, %84 : vector<16x512xf32>
    %89 = arith.addf %80, %88 : vector<16x512xf32>
    %c496_i32 = arith.constant 496 : i32
    %90 = tpu.dynamic_rotate %31 by %c496_i32 dim 1 : vector<16x512xf32>, i32 -> vector<16x512xf32>
    %91 = vector.extract_strided_slice %1 {offsets = [7, 0], sizes = [1, 512], strides = [1, 1]} : vector<9x512xf32> to vector<1x512xf32>
    %92 = vector.broadcast %91 : vector<1x512xf32> to vector<16x512xf32>
    %93 = arith.mulf %90, %92 : vector<16x512xf32>
    %c7 = arith.constant 7 : index
    %c0_48 = arith.constant 0 : index
    %c0_49 = arith.constant 0 : index
    %94 = vector.load %arg5[%c7, %c0_48, %c0_49] : memref<9x16x1xf32, #tpu.memory_space<vmem>>, vector<1x16x1xf32>
    %95 = vector.shape_cast %94 : vector<1x16x1xf32> to vector<16x1xf32>
    %96 = vector.broadcast %95 : vector<16x1xf32> to vector<16x512xf32>
    %97 = arith.mulf %96, %93 : vector<16x512xf32>
    %98 = arith.addf %89, %97 : vector<16x512xf32>
    %c495_i32 = arith.constant 495 : i32
    %99 = tpu.dynamic_rotate %31 by %c495_i32 dim 1 : vector<16x512xf32>, i32 -> vector<16x512xf32>
    %100 = vector.extract_strided_slice %1 {offsets = [8, 0], sizes = [1, 512], strides = [1, 1]} : vector<9x512xf32> to vector<1x512xf32>
    %101 = vector.broadcast %100 : vector<1x512xf32> to vector<16x512xf32>
    %102 = arith.mulf %99, %101 : vector<16x512xf32>
    %c8 = arith.constant 8 : index
    %c0_50 = arith.constant 0 : index
    %c0_51 = arith.constant 0 : index
    %103 = vector.load %arg5[%c8, %c0_50, %c0_51] : memref<9x16x1xf32, #tpu.memory_space<vmem>>, vector<1x16x1xf32>
    %104 = vector.shape_cast %103 : vector<1x16x1xf32> to vector<16x1xf32>
    %105 = vector.broadcast %104 : vector<16x1xf32> to vector<16x512xf32>
    %106 = arith.mulf %105, %102 : vector<16x512xf32>
    %107 = arith.addf %98, %106 : vector<16x512xf32>
    %108 = vector.broadcast %11 : vector<16x1xf32> to vector<16x512xf32>
    %109 = arith.mulf %107, %108 : vector<16x512xf32>
    %110 = vector.broadcast %13 : vector<16x1xf32> to vector<16x512xf32>
    %111 = arith.addf %109, %110 : vector<16x512xf32>
    %cst_52 = arith.constant 0.000000e+00 : f32
    %112 = vector.broadcast %cst_52 : f32 to vector<16x512xf32>
    %113 = arith.maximumf %111, %112 : vector<16x512xf32>
    %cst_53 = arith.constant 0.000000e+00 : f32
    %114 = vector.broadcast %cst_53 : f32 to vector<16x512xf32>
    %115 = arith.minimumf %111, %114 : vector<16x512xf32>
    %116 = vector.broadcast %15 : vector<16x1xf32> to vector<16x512xf32>
    %117 = arith.mulf %116, %115 : vector<16x512xf32>
    %118 = arith.addf %113, %117 : vector<16x512xf32>
    %cst_54 = arith.constant dense<0.000000e+00> : vector<8x512xf32>
    %119 = tpu.matmul %3, %118, %cst_54 {dimension_numbers = #tpu.dot_dimension_numbers<[1], [0], [0], [1], [0, 0, 1, 1], [], []>} : vector<8x16xf32>, vector<16x512xf32>, vector<8x512xf32> -> vector<8x512xf32>
    %120 = vector.broadcast %17 : vector<8x1xf32> to vector<8x512xf32>
    %121 = arith.mulf %119, %120 : vector<8x512xf32>
    %122 = vector.broadcast %19 : vector<8x1xf32> to vector<8x512xf32>
    %123 = arith.addf %121, %122 : vector<8x512xf32>
    %124 = arith.addf %0, %123 : vector<8x512xf32>
    %c0_55 = arith.constant 0 : index
    %c0_56 = arith.constant 0 : index
    %125 = vector.load %arg8[%c0_55, %c0_56] : memref<16x8xf32, #tpu.memory_space<vmem>>, vector<16x8xf32>
    %c0_57 = arith.constant 0 : index
    %c0_58 = arith.constant 0 : index
    %126 = vector.load %arg11[%c0_57, %c0_58] : memref<8x16xf32, #tpu.memory_space<vmem>>, vector<8x16xf32>
    %c0_59 = arith.constant 0 : index
    %c0_60 = arith.constant 0 : index
    %c0_61 = arith.constant 0 : index
    %127 = vector.load %arg9[%c0_59, %c0_60, %c0_61] : memref<6x16x1xf32, #tpu.memory_space<vmem>>, vector<1x16x1xf32>
    %128 = vector.shape_cast %127 : vector<1x16x1xf32> to vector<16x1xf32>
    %c1_62 = arith.constant 1 : index
    %c0_63 = arith.constant 0 : index
    %c0_64 = arith.constant 0 : index
    %129 = vector.load %arg9[%c1_62, %c0_63, %c0_64] : memref<6x16x1xf32, #tpu.memory_space<vmem>>, vector<1x16x1xf32>
    %130 = vector.shape_cast %129 : vector<1x16x1xf32> to vector<16x1xf32>
    %c2_65 = arith.constant 2 : index
    %c0_66 = arith.constant 0 : index
    %c0_67 = arith.constant 0 : index
    %131 = vector.load %arg9[%c2_65, %c0_66, %c0_67] : memref<6x16x1xf32, #tpu.memory_space<vmem>>, vector<1x16x1xf32>
    %132 = vector.shape_cast %131 : vector<1x16x1xf32> to vector<16x1xf32>
    %c3_68 = arith.constant 3 : index
    %c0_69 = arith.constant 0 : index
    %c0_70 = arith.constant 0 : index
    %133 = vector.load %arg9[%c3_68, %c0_69, %c0_70] : memref<6x16x1xf32, #tpu.memory_space<vmem>>, vector<1x16x1xf32>
    %134 = vector.shape_cast %133 : vector<1x16x1xf32> to vector<16x1xf32>
    %c4_71 = arith.constant 4 : index
    %c0_72 = arith.constant 0 : index
    %c0_73 = arith.constant 0 : index
    %135 = vector.load %arg9[%c4_71, %c0_72, %c0_73] : memref<6x16x1xf32, #tpu.memory_space<vmem>>, vector<1x16x1xf32>
    %136 = vector.shape_cast %135 : vector<1x16x1xf32> to vector<16x1xf32>
    %c5_74 = arith.constant 5 : index
    %c0_75 = arith.constant 0 : index
    %c0_76 = arith.constant 0 : index
    %137 = vector.load %arg9[%c5_74, %c0_75, %c0_76] : memref<6x16x1xf32, #tpu.memory_space<vmem>>, vector<1x16x1xf32>
    %138 = vector.shape_cast %137 : vector<1x16x1xf32> to vector<16x1xf32>
    %c0_77 = arith.constant 0 : index
    %c0_78 = arith.constant 0 : index
    %c0_79 = arith.constant 0 : index
    %139 = vector.load %arg12[%c0_77, %c0_78, %c0_79] : memref<2x8x1xf32, #tpu.memory_space<vmem>>, vector<1x8x1xf32>
    %140 = vector.shape_cast %139 : vector<1x8x1xf32> to vector<8x1xf32>
    %c1_80 = arith.constant 1 : index
    %c0_81 = arith.constant 0 : index
    %c0_82 = arith.constant 0 : index
    %141 = vector.load %arg12[%c1_80, %c0_81, %c0_82] : memref<2x8x1xf32, #tpu.memory_space<vmem>>, vector<1x8x1xf32>
    %142 = vector.shape_cast %141 : vector<1x8x1xf32> to vector<8x1xf32>
    %cst_83 = arith.constant dense<0.000000e+00> : vector<16x512xf32>
    %143 = tpu.matmul %125, %124, %cst_83 {dimension_numbers = #tpu.dot_dimension_numbers<[1], [0], [0], [1], [0, 0, 1, 1], [], []>} : vector<16x8xf32>, vector<8x512xf32>, vector<16x512xf32> -> vector<16x512xf32>
    %144 = vector.broadcast %128 : vector<16x1xf32> to vector<16x512xf32>
    %145 = arith.mulf %143, %144 : vector<16x512xf32>
    %146 = vector.broadcast %130 : vector<16x1xf32> to vector<16x512xf32>
    %147 = arith.addf %145, %146 : vector<16x512xf32>
    %cst_84 = arith.constant 0.000000e+00 : f32
    %148 = vector.broadcast %cst_84 : f32 to vector<16x512xf32>
    %149 = arith.maximumf %147, %148 : vector<16x512xf32>
    %cst_85 = arith.constant 0.000000e+00 : f32
    %150 = vector.broadcast %cst_85 : f32 to vector<16x512xf32>
    %151 = arith.minimumf %147, %150 : vector<16x512xf32>
    %152 = vector.broadcast %132 : vector<16x1xf32> to vector<16x512xf32>
    %153 = arith.mulf %152, %151 : vector<16x512xf32>
    %154 = arith.addf %149, %153 : vector<16x512xf32>
    %c17_i32_86 = arith.constant 17 : i32
    %155 = tpu.dynamic_rotate %154 by %c17_i32_86 dim 1 : vector<16x512xf32>, i32 -> vector<16x512xf32>
    %156 = vector.extract_strided_slice %1 {offsets = [0, 0], sizes = [1, 512], strides = [1, 1]} : vector<9x512xf32> to vector<1x512xf32>
    %157 = vector.broadcast %156 : vector<1x512xf32> to vector<16x512xf32>
    %158 = arith.mulf %155, %157 : vector<16x512xf32>
    %c0_87 = arith.constant 0 : index
    %c0_88 = arith.constant 0 : index
    %c0_89 = arith.constant 0 : index
    %159 = vector.load %arg10[%c0_87, %c0_88, %c0_89] : memref<9x16x1xf32, #tpu.memory_space<vmem>>, vector<1x16x1xf32>
    %160 = vector.shape_cast %159 : vector<1x16x1xf32> to vector<16x1xf32>
    %161 = vector.broadcast %160 : vector<16x1xf32> to vector<16x512xf32>
    %162 = arith.mulf %161, %158 : vector<16x512xf32>
    %c16_i32_90 = arith.constant 16 : i32
    %163 = tpu.dynamic_rotate %154 by %c16_i32_90 dim 1 : vector<16x512xf32>, i32 -> vector<16x512xf32>
    %164 = vector.extract_strided_slice %1 {offsets = [1, 0], sizes = [1, 512], strides = [1, 1]} : vector<9x512xf32> to vector<1x512xf32>
    %165 = vector.broadcast %164 : vector<1x512xf32> to vector<16x512xf32>
    %166 = arith.mulf %163, %165 : vector<16x512xf32>
    %c1_91 = arith.constant 1 : index
    %c0_92 = arith.constant 0 : index
    %c0_93 = arith.constant 0 : index
    %167 = vector.load %arg10[%c1_91, %c0_92, %c0_93] : memref<9x16x1xf32, #tpu.memory_space<vmem>>, vector<1x16x1xf32>
    %168 = vector.shape_cast %167 : vector<1x16x1xf32> to vector<16x1xf32>
    %169 = vector.broadcast %168 : vector<16x1xf32> to vector<16x512xf32>
    %170 = arith.mulf %169, %166 : vector<16x512xf32>
    %171 = arith.addf %162, %170 : vector<16x512xf32>
    %c15_i32_94 = arith.constant 15 : i32
    %172 = tpu.dynamic_rotate %154 by %c15_i32_94 dim 1 : vector<16x512xf32>, i32 -> vector<16x512xf32>
    %173 = vector.extract_strided_slice %1 {offsets = [2, 0], sizes = [1, 512], strides = [1, 1]} : vector<9x512xf32> to vector<1x512xf32>
    %174 = vector.broadcast %173 : vector<1x512xf32> to vector<16x512xf32>
    %175 = arith.mulf %172, %174 : vector<16x512xf32>
    %c2_95 = arith.constant 2 : index
    %c0_96 = arith.constant 0 : index
    %c0_97 = arith.constant 0 : index
    %176 = vector.load %arg10[%c2_95, %c0_96, %c0_97] : memref<9x16x1xf32, #tpu.memory_space<vmem>>, vector<1x16x1xf32>
    %177 = vector.shape_cast %176 : vector<1x16x1xf32> to vector<16x1xf32>
    %178 = vector.broadcast %177 : vector<16x1xf32> to vector<16x512xf32>
    %179 = arith.mulf %178, %175 : vector<16x512xf32>
    %180 = arith.addf %171, %179 : vector<16x512xf32>
    %c1_i32_98 = arith.constant 1 : i32
    %181 = tpu.dynamic_rotate %154 by %c1_i32_98 dim 1 : vector<16x512xf32>, i32 -> vector<16x512xf32>
    %182 = vector.extract_strided_slice %1 {offsets = [3, 0], sizes = [1, 512], strides = [1, 1]} : vector<9x512xf32> to vector<1x512xf32>
    %183 = vector.broadcast %182 : vector<1x512xf32> to vector<16x512xf32>
    %184 = arith.mulf %181, %183 : vector<16x512xf32>
    %c3_99 = arith.constant 3 : index
    %c0_100 = arith.constant 0 : index
    %c0_101 = arith.constant 0 : index
    %185 = vector.load %arg10[%c3_99, %c0_100, %c0_101] : memref<9x16x1xf32, #tpu.memory_space<vmem>>, vector<1x16x1xf32>
    %186 = vector.shape_cast %185 : vector<1x16x1xf32> to vector<16x1xf32>
    %187 = vector.broadcast %186 : vector<16x1xf32> to vector<16x512xf32>
    %188 = arith.mulf %187, %184 : vector<16x512xf32>
    %189 = arith.addf %180, %188 : vector<16x512xf32>
    %c4_102 = arith.constant 4 : index
    %c0_103 = arith.constant 0 : index
    %c0_104 = arith.constant 0 : index
    %190 = vector.load %arg10[%c4_102, %c0_103, %c0_104] : memref<9x16x1xf32, #tpu.memory_space<vmem>>, vector<1x16x1xf32>
    %191 = vector.shape_cast %190 : vector<1x16x1xf32> to vector<16x1xf32>
    %192 = vector.broadcast %191 : vector<16x1xf32> to vector<16x512xf32>
    %193 = arith.mulf %192, %154 : vector<16x512xf32>
    %194 = arith.addf %189, %193 : vector<16x512xf32>
    %c511_i32_105 = arith.constant 511 : i32
    %195 = tpu.dynamic_rotate %154 by %c511_i32_105 dim 1 : vector<16x512xf32>, i32 -> vector<16x512xf32>
    %196 = vector.extract_strided_slice %1 {offsets = [5, 0], sizes = [1, 512], strides = [1, 1]} : vector<9x512xf32> to vector<1x512xf32>
    %197 = vector.broadcast %196 : vector<1x512xf32> to vector<16x512xf32>
    %198 = arith.mulf %195, %197 : vector<16x512xf32>
    %c5_106 = arith.constant 5 : index
    %c0_107 = arith.constant 0 : index
    %c0_108 = arith.constant 0 : index
    %199 = vector.load %arg10[%c5_106, %c0_107, %c0_108] : memref<9x16x1xf32, #tpu.memory_space<vmem>>, vector<1x16x1xf32>
    %200 = vector.shape_cast %199 : vector<1x16x1xf32> to vector<16x1xf32>
    %201 = vector.broadcast %200 : vector<16x1xf32> to vector<16x512xf32>
    %202 = arith.mulf %201, %198 : vector<16x512xf32>
    %203 = arith.addf %194, %202 : vector<16x512xf32>
    %c497_i32_109 = arith.constant 497 : i32
    %204 = tpu.dynamic_rotate %154 by %c497_i32_109 dim 1 : vector<16x512xf32>, i32 -> vector<16x512xf32>
    %205 = vector.extract_strided_slice %1 {offsets = [6, 0], sizes = [1, 512], strides = [1, 1]} : vector<9x512xf32> to vector<1x512xf32>
    %206 = vector.broadcast %205 : vector<1x512xf32> to vector<16x512xf32>
    %207 = arith.mulf %204, %206 : vector<16x512xf32>
    %c6_110 = arith.constant 6 : index
    %c0_111 = arith.constant 0 : index
    %c0_112 = arith.constant 0 : index
    %208 = vector.load %arg10[%c6_110, %c0_111, %c0_112] : memref<9x16x1xf32, #tpu.memory_space<vmem>>, vector<1x16x1xf32>
    %209 = vector.shape_cast %208 : vector<1x16x1xf32> to vector<16x1xf32>
    %210 = vector.broadcast %209 : vector<16x1xf32> to vector<16x512xf32>
    %211 = arith.mulf %210, %207 : vector<16x512xf32>
    %212 = arith.addf %203, %211 : vector<16x512xf32>
    %c496_i32_113 = arith.constant 496 : i32
    %213 = tpu.dynamic_rotate %154 by %c496_i32_113 dim 1 : vector<16x512xf32>, i32 -> vector<16x512xf32>
    %214 = vector.extract_strided_slice %1 {offsets = [7, 0], sizes = [1, 512], strides = [1, 1]} : vector<9x512xf32> to vector<1x512xf32>
    %215 = vector.broadcast %214 : vector<1x512xf32> to vector<16x512xf32>
    %216 = arith.mulf %213, %215 : vector<16x512xf32>
    %c7_114 = arith.constant 7 : index
    %c0_115 = arith.constant 0 : index
    %c0_116 = arith.constant 0 : index
    %217 = vector.load %arg10[%c7_114, %c0_115, %c0_116] : memref<9x16x1xf32, #tpu.memory_space<vmem>>, vector<1x16x1xf32>
    %218 = vector.shape_cast %217 : vector<1x16x1xf32> to vector<16x1xf32>
    %219 = vector.broadcast %218 : vector<16x1xf32> to vector<16x512xf32>
    %220 = arith.mulf %219, %216 : vector<16x512xf32>
    %221 = arith.addf %212, %220 : vector<16x512xf32>
    %c495_i32_117 = arith.constant 495 : i32
    %222 = tpu.dynamic_rotate %154 by %c495_i32_117 dim 1 : vector<16x512xf32>, i32 -> vector<16x512xf32>
    %223 = vector.extract_strided_slice %1 {offsets = [8, 0], sizes = [1, 512], strides = [1, 1]} : vector<9x512xf32> to vector<1x512xf32>
    %224 = vector.broadcast %223 : vector<1x512xf32> to vector<16x512xf32>
    %225 = arith.mulf %222, %224 : vector<16x512xf32>
    %c8_118 = arith.constant 8 : index
    %c0_119 = arith.constant 0 : index
    %c0_120 = arith.constant 0 : index
    %226 = vector.load %arg10[%c8_118, %c0_119, %c0_120] : memref<9x16x1xf32, #tpu.memory_space<vmem>>, vector<1x16x1xf32>
    %227 = vector.shape_cast %226 : vector<1x16x1xf32> to vector<16x1xf32>
    %228 = vector.broadcast %227 : vector<16x1xf32> to vector<16x512xf32>
    %229 = arith.mulf %228, %225 : vector<16x512xf32>
    %230 = arith.addf %221, %229 : vector<16x512xf32>
    %231 = vector.broadcast %134 : vector<16x1xf32> to vector<16x512xf32>
    %232 = arith.mulf %230, %231 : vector<16x512xf32>
    %233 = vector.broadcast %136 : vector<16x1xf32> to vector<16x512xf32>
    %234 = arith.addf %232, %233 : vector<16x512xf32>
    %cst_121 = arith.constant 0.000000e+00 : f32
    %235 = vector.broadcast %cst_121 : f32 to vector<16x512xf32>
    %236 = arith.maximumf %234, %235 : vector<16x512xf32>
    %cst_122 = arith.constant 0.000000e+00 : f32
    %237 = vector.broadcast %cst_122 : f32 to vector<16x512xf32>
    %238 = arith.minimumf %234, %237 : vector<16x512xf32>
    %239 = vector.broadcast %138 : vector<16x1xf32> to vector<16x512xf32>
    %240 = arith.mulf %239, %238 : vector<16x512xf32>
    %241 = arith.addf %236, %240 : vector<16x512xf32>
    %cst_123 = arith.constant dense<0.000000e+00> : vector<8x512xf32>
    %242 = tpu.matmul %126, %241, %cst_123 {dimension_numbers = #tpu.dot_dimension_numbers<[1], [0], [0], [1], [0, 0, 1, 1], [], []>} : vector<8x16xf32>, vector<16x512xf32>, vector<8x512xf32> -> vector<8x512xf32>
    %243 = vector.broadcast %140 : vector<8x1xf32> to vector<8x512xf32>
    %244 = arith.mulf %242, %243 : vector<8x512xf32>
    %245 = vector.broadcast %142 : vector<8x1xf32> to vector<8x512xf32>
    %246 = arith.addf %244, %245 : vector<8x512xf32>
    %c0_124 = arith.constant 0 : index
    %c0_125 = arith.constant 0 : index
    %c0_126 = arith.constant 0 : index
    %247 = vector.load %arg13[%c0_124, %c0_125, %c0_126] : memref<2x8x2xf32, #tpu.memory_space<vmem>>, vector<1x8x2xf32>
    %248 = vector.shape_cast %247 : vector<1x8x2xf32> to vector<8x2xf32>
    %c1_127 = arith.constant 1 : index
    %c0_128 = arith.constant 0 : index
    %c0_129 = arith.constant 0 : index
    %249 = vector.load %arg13[%c1_127, %c0_128, %c0_129] : memref<2x8x2xf32, #tpu.memory_space<vmem>>, vector<1x8x2xf32>
    %250 = vector.shape_cast %249 : vector<1x8x2xf32> to vector<8x2xf32>
    %c0_130 = arith.constant 0 : index
    %c0_131 = arith.constant 0 : index
    %c0_132 = arith.constant 0 : index
    %251 = vector.load %arg14[%c0_130, %c0_131, %c0_132] : memref<2x1x2xf32, #tpu.memory_space<vmem>>, vector<1x1x2xf32>
    %252 = vector.shape_cast %251 : vector<1x1x2xf32> to vector<1x2xf32>
    %c1_133 = arith.constant 1 : index
    %c0_134 = arith.constant 0 : index
    %c0_135 = arith.constant 0 : index
    %253 = vector.load %arg14[%c1_133, %c0_134, %c0_135] : memref<2x1x2xf32, #tpu.memory_space<vmem>>, vector<1x1x2xf32>
    %254 = vector.shape_cast %253 : vector<1x1x2xf32> to vector<1x2xf32>
    %c0_136 = arith.constant 0 : index
    %c0_137 = arith.constant 0 : index
    %c0_138 = arith.constant 0 : index
    %255 = vector.load %arg15[%c0_136, %c0_137, %c0_138] : memref<2x8x1xf32, #tpu.memory_space<vmem>>, vector<1x8x1xf32>
    %256 = vector.shape_cast %255 : vector<1x8x1xf32> to vector<8x1xf32>
    %c1_139 = arith.constant 1 : index
    %c0_140 = arith.constant 0 : index
    %c0_141 = arith.constant 0 : index
    %257 = vector.load %arg15[%c1_139, %c0_140, %c0_141] : memref<2x8x1xf32, #tpu.memory_space<vmem>>, vector<1x8x1xf32>
    %258 = vector.shape_cast %257 : vector<1x8x1xf32> to vector<8x1xf32>
    %259 = vector.extract_strided_slice %246 {offsets = [0, 0], sizes = [8, 256], strides = [1, 1]} : vector<8x512xf32> to vector<8x256xf32>
    %cst_142 = arith.constant dense<0.000000e+00> : vector<8xf32>
    %260 = vector.multi_reduction <add>, %259, %cst_142 [1] : vector<8x256xf32> to vector<8xf32>
    %261 = vector.shape_cast %260 : vector<8xf32> to vector<8x1xf32>
    %cst_143 = arith.constant 3.906250e-03 : f32
    %262 = vector.broadcast %cst_143 : f32 to vector<8x1xf32>
    %263 = arith.mulf %261, %262 : vector<8x1xf32>
    %264 = vector.broadcast %263 : vector<8x1xf32> to vector<8x2xf32>
    %265 = arith.mulf %248, %264 : vector<8x2xf32>
    %cst_144 = arith.constant dense<0.000000e+00> : vector<2xf32>
    %266 = vector.multi_reduction <add>, %265, %cst_144 [0] : vector<8x2xf32> to vector<2xf32>
    %267 = vector.shape_cast %266 : vector<2xf32> to vector<1x2xf32>
    %268 = arith.mulf %267, %252 : vector<1x2xf32>
    %269 = arith.addf %268, %254 : vector<1x2xf32>
    %cst_145 = arith.constant 0.000000e+00 : f32
    %270 = vector.broadcast %cst_145 : f32 to vector<1x2xf32>
    %271 = arith.maximumf %269, %270 : vector<1x2xf32>
    %272 = vector.broadcast %271 : vector<1x2xf32> to vector<8x2xf32>
    %273 = arith.mulf %250, %272 : vector<8x2xf32>
    %cst_146 = arith.constant dense<0.000000e+00> : vector<8xf32>
    %274 = vector.multi_reduction <add>, %273, %cst_146 [1] : vector<8x2xf32> to vector<8xf32>
    %275 = vector.shape_cast %274 : vector<8xf32> to vector<8x1xf32>
    %276 = arith.mulf %275, %256 : vector<8x1xf32>
    %277 = arith.addf %276, %258 : vector<8x1xf32>
    %278 = arith.negf %277 : vector<8x1xf32>
    %279 = math.exp %278 : vector<8x1xf32>
    %cst_147 = arith.constant 1.000000e+00 : f32
    %280 = vector.broadcast %cst_147 : f32 to vector<8x1xf32>
    %281 = arith.addf %280, %279 : vector<8x1xf32>
    %282 = arith.divf %280, %281 : vector<8x1xf32>
    %283 = vector.broadcast %282 : vector<8x1xf32> to vector<8x256xf32>
    %284 = arith.mulf %259, %283 : vector<8x256xf32>
    %285 = vector.extract_strided_slice %246 {offsets = [0, 256], sizes = [8, 256], strides = [1, 1]} : vector<8x512xf32> to vector<8x256xf32>
    %cst_148 = arith.constant dense<0.000000e+00> : vector<8xf32>
    %286 = vector.multi_reduction <add>, %285, %cst_148 [1] : vector<8x256xf32> to vector<8xf32>
    %287 = vector.shape_cast %286 : vector<8xf32> to vector<8x1xf32>
    %cst_149 = arith.constant 3.906250e-03 : f32
    %288 = vector.broadcast %cst_149 : f32 to vector<8x1xf32>
    %289 = arith.mulf %287, %288 : vector<8x1xf32>
    %290 = vector.broadcast %289 : vector<8x1xf32> to vector<8x2xf32>
    %291 = arith.mulf %248, %290 : vector<8x2xf32>
    %cst_150 = arith.constant dense<0.000000e+00> : vector<2xf32>
    %292 = vector.multi_reduction <add>, %291, %cst_150 [0] : vector<8x2xf32> to vector<2xf32>
    %293 = vector.shape_cast %292 : vector<2xf32> to vector<1x2xf32>
    %294 = arith.mulf %293, %252 : vector<1x2xf32>
    %295 = arith.addf %294, %254 : vector<1x2xf32>
    %cst_151 = arith.constant 0.000000e+00 : f32
    %296 = vector.broadcast %cst_151 : f32 to vector<1x2xf32>
    %297 = arith.maximumf %295, %296 : vector<1x2xf32>
    %298 = vector.broadcast %297 : vector<1x2xf32> to vector<8x2xf32>
    %299 = arith.mulf %250, %298 : vector<8x2xf32>
    %cst_152 = arith.constant dense<0.000000e+00> : vector<8xf32>
    %300 = vector.multi_reduction <add>, %299, %cst_152 [1] : vector<8x2xf32> to vector<8xf32>
    %301 = vector.shape_cast %300 : vector<8xf32> to vector<8x1xf32>
    %302 = arith.mulf %301, %256 : vector<8x1xf32>
    %303 = arith.addf %302, %258 : vector<8x1xf32>
    %304 = arith.negf %303 : vector<8x1xf32>
    %305 = math.exp %304 : vector<8x1xf32>
    %cst_153 = arith.constant 1.000000e+00 : f32
    %306 = vector.broadcast %cst_153 : f32 to vector<8x1xf32>
    %307 = arith.addf %306, %305 : vector<8x1xf32>
    %308 = arith.divf %306, %307 : vector<8x1xf32>
    %309 = vector.broadcast %308 : vector<8x1xf32> to vector<8x256xf32>
    %310 = arith.mulf %285, %309 : vector<8x256xf32>
    %311 = tpu.concatenate %284, %310 in 1 : vector<8x256xf32>, vector<8x256xf32> -> vector<8x512xf32>
    %312 = arith.addf %124, %311 : vector<8x512xf32>
    %c0_154 = arith.constant 0 : index
    %c0_155 = arith.constant 0 : index
    %313 = vector.load %arg16[%c0_154, %c0_155] : memref<8x512xf32, #tpu.memory_space<vmem>>, vector<8x512xf32>
    tpu.vector_store %arg16[%c0_154, %c0_155], %312 {strides = array<i32>} : memref<8x512xf32, #tpu.memory_space<vmem>>, vector<8x512xf32>,
    return
  }
  func.func @transform_0(%arg0: i32) -> (i32, i32) {
    %c0_i32 = arith.constant 0 : i32
    %c0_i32_0 = arith.constant 0 : i32
    %c0_i32_1 = arith.constant 0 : i32
    return %c0_i32, %c0_i32_0 : i32, i32
  }
  func.func @transform_1(%arg0: i32) -> (i32, i32) {
    %c0_i32 = arith.constant 0 : i32
    %c0_i32_0 = arith.constant 0 : i32
    %c0_i32_1 = arith.constant 0 : i32
    return %c0_i32, %c0_i32_0 : i32, i32
  }
  func.func @transform_2(%arg0: i32) -> (i32, i32) {
    %c0_i32 = arith.constant 0 : i32
    %c0_i32_0 = arith.constant 0 : i32
    %c0_i32_1 = arith.constant 0 : i32
    return %c0_i32, %c0_i32_0 : i32, i32
  }
  func.func @transform_3(%arg0: i32) -> (i32, i32, i32) {
    %c0_i32 = arith.constant 0 : i32
    %c0_i32_0 = arith.constant 0 : i32
    %c0_i32_1 = arith.constant 0 : i32
    %c0_i32_2 = arith.constant 0 : i32
    return %c0_i32, %c0_i32_0, %c0_i32_1 : i32, i32, i32
  }
  func.func @transform_4(%arg0: i32) -> (i32, i32, i32) {
    %c0_i32 = arith.constant 0 : i32
    %c0_i32_0 = arith.constant 0 : i32
    %c0_i32_1 = arith.constant 0 : i32
    %c0_i32_2 = arith.constant 0 : i32
    return %c0_i32, %c0_i32_0, %c0_i32_1 : i32, i32, i32
  }
  func.func @transform_5(%arg0: i32) -> (i32, i32) {
    %c0_i32 = arith.constant 0 : i32
    %c0_i32_0 = arith.constant 0 : i32
    %c0_i32_1 = arith.constant 0 : i32
    return %c0_i32, %c0_i32_0 : i32, i32
  }
  func.func @transform_6(%arg0: i32) -> (i32, i32, i32) {
    %c0_i32 = arith.constant 0 : i32
    %c0_i32_0 = arith.constant 0 : i32
    %c0_i32_1 = arith.constant 0 : i32
    %c0_i32_2 = arith.constant 0 : i32
    return %c0_i32, %c0_i32_0, %c0_i32_1 : i32, i32, i32
  }
  func.func @transform_7(%arg0: i32) -> (i32, i32) {
    %c0_i32 = arith.constant 0 : i32
    %c0_i32_0 = arith.constant 0 : i32
    %c0_i32_1 = arith.constant 0 : i32
    return %c0_i32, %c0_i32_0 : i32, i32
  }
  func.func @transform_8(%arg0: i32) -> (i32, i32, i32) {
    %c0_i32 = arith.constant 0 : i32
    %c0_i32_0 = arith.constant 0 : i32
    %c0_i32_1 = arith.constant 0 : i32
    %c0_i32_2 = arith.constant 0 : i32
    return %c0_i32, %c0_i32_0, %c0_i32_1 : i32, i32, i32
  }
  func.func @transform_9(%arg0: i32) -> (i32, i32, i32) {
    %c0_i32 = arith.constant 0 : i32
    %c0_i32_0 = arith.constant 0 : i32
    %c0_i32_1 = arith.constant 0 : i32
    %c0_i32_2 = arith.constant 0 : i32
    return %c0_i32, %c0_i32_0, %c0_i32_1 : i32, i32, i32
  }
  func.func @transform_10(%arg0: i32) -> (i32, i32) {
    %c0_i32 = arith.constant 0 : i32
    %c0_i32_0 = arith.constant 0 : i32
    %c0_i32_1 = arith.constant 0 : i32
    return %c0_i32, %c0_i32_0 : i32, i32
  }
  func.func @transform_11(%arg0: i32) -> (i32, i32, i32) {
    %c0_i32 = arith.constant 0 : i32
    %c0_i32_0 = arith.constant 0 : i32
    %c0_i32_1 = arith.constant 0 : i32
    %c0_i32_2 = arith.constant 0 : i32
    return %c0_i32, %c0_i32_0, %c0_i32_1 : i32, i32, i32
  }
  func.func @transform_12(%arg0: i32) -> (i32, i32, i32) {
    %c0_i32 = arith.constant 0 : i32
    %c0_i32_0 = arith.constant 0 : i32
    %c0_i32_1 = arith.constant 0 : i32
    %c0_i32_2 = arith.constant 0 : i32
    return %c0_i32, %c0_i32_0, %c0_i32_1 : i32, i32, i32
  }
  func.func @transform_13(%arg0: i32) -> (i32, i32, i32) {
    %c0_i32 = arith.constant 0 : i32
    %c0_i32_0 = arith.constant 0 : i32
    %c0_i32_1 = arith.constant 0 : i32
    %c0_i32_2 = arith.constant 0 : i32
    return %c0_i32, %c0_i32_0, %c0_i32_1 : i32, i32, i32
  }
  func.func @transform_14(%arg0: i32) -> (i32, i32, i32) {
    %c0_i32 = arith.constant 0 : i32
    %c0_i32_0 = arith.constant 0 : i32
    %c0_i32_1 = arith.constant 0 : i32
    %c0_i32_2 = arith.constant 0 : i32
    return %c0_i32, %c0_i32_0, %c0_i32_1 : i32, i32, i32
  }
  func.func @transform_15(%arg0: i32) -> (i32, i32) {
    %c0_i32 = arith.constant 0 : i32
    %c0_i32_0 = arith.constant 0 : i32
    %c0_i32_1 = arith.constant 0 : i32
    return %c0_i32, %c0_i32_0 : i32, i32
  }
}

</mosaic_0001>

<bundles_post_ra>
// kernel: tpu_custom_call.1
= control target key start
LH: loop header
LB: loop body
LE: loop exit
PB: predicated region body
PF: predicated region fallthrough
CT: control target
= control target key end

     0   :  { %vm86_vm0 = vcmask 64512   ;;  %v4361_v5 = vmov 0.0   ;;  %v2480_v9 = vmov 0   ;;  %s4345_s0 = inlined_call_operand.vmem [shape: f32[8,512], index: 0, kind: input, shape index: {}]   ;;  %s4346_s1 = inlined_call_operand.vmem [shape: f32[9,512], index: 1, kind: input, shape index: {}]   ;;  %s4347_s2 = inlined_call_operand.vmem [shape: f32[16,8], index: 2, kind: input, shape index: {}]   ;;  %s4348_s3 = inlined_call_operand.vmem [shape: f32[6,16,1], index: 3, kind: input, shape index: {}]   ;;  %s4349_s4 = inlined_call_operand.vmem [shape: f32[9,16,1], index: 4, kind: input, shape index: {}]   ;;  %s4350_s5 = inlined_call_operand.vmem [shape: f32[8,16], index: 5, kind: input, shape index: {}]   ;;  %s4351_s6 = inlined_call_operand.vmem [shape: f32[2,8,1], index: 6, kind: input, shape index: {}]   ;;  %s4352_s7 = inlined_call_operand.vmem [shape: f32[16,8], index: 7, kind: input, shape index: {}]   ;;  %s4353_s8 = inlined_call_operand.vmem [shape: f32[6,16,1], index: 8, kind: input, shape index: {}]   ;;  %s4354_s9 = inlined_call_operand.vmem [shape: f32[9,16,1], index: 9, kind: input, shape index: {}]   ;;  %s4355_s10 = inlined_call_operand.vmem [shape: f32[8,16], index: 10, kind: input, shape index: {}]   ;;  %s4356_s11 = inlined_call_operand.vmem [shape: f32[2,8,1], index: 11, kind: input, shape index: {}]   ;;  %s4357_s12 = inlined_call_operand.vmem [shape: f32[2,8,2], index: 12, kind: input, shape index: {}]   ;;  %s4358_s13 = inlined_call_operand.vmem [shape: f32[2,1,2], index: 13, kind: input, shape index: {}]   ;;  %s4359_s14 = inlined_call_operand.vmem [shape: f32[2,8,1], index: 14, kind: input, shape index: {}]   ;;  %s4360_s15 = inlined_call_operand.hbm [shape: f32[8,512], index: 15, kind: output, shape index: {}]  }
   0x1   :  { %v52_v0 = vld [vmem:[%s4345_s0 + $0x8] sm:$0xff]  ;;  %v54_v1 = vld [vmem:[%s4345_s0 + $0x18] sm:$0xff]  ;;  %v51_v2 = vld [vmem:[%s4345_s0] sm:$0xff]  ;;  %157 = vmatprep.mubr.f32.mxu0 %v4361_v5  ;;  %234 = vmatprep.mubr.f32.mxu1 %v4361_v5 }
   0x2   :  { %93 = vmatprep.subr.mxu0 %v52_v0  ;;  %170 = vmatprep.subr.mxu1 %v54_v1  ;;  %v53_v3 = vld [vmem:[%s4345_s0 + $0x10] sm:$0xff]  ;;  %v63_v4 = vld [vmem:[%s4347_s2] sm:$0xff]  ;;  %v64_v8 = vld [vmem:[%s4347_s2 + $0x8] sm:$0xff] }
   0x3   :  { %94 = vmatpush1.msra.mxu0 %v51_v2  ;;  %171 = vmatpush1.msra.mxu1 %v53_v3  ;;  %v66_v6 = vld [vmem:[%s4348_s3] sm:$0xff]  ;;  %v2335_v7 = vld [vmem:[%s4348_s3 + $0x10] sm:$0xff]  ;;  %v67_v10 = vld [vmem:[%s4348_s3 + $0x8] sm:$0xff] }
   0x4   :  { %2346 = vmatmul.mubr.msk.f32.vlgmr.msra.gmra.mrb[0].mxu0 %vm86_vm0, %v63_v4  ;;  %2348 = vmatmul.mubr.msk.f32.vlgmr.msra.gmra.mrb[0].mxu1 %vm86_vm0, %v63_v4  ;;  %v2336_v11 = vld [vmem:[%s4348_s3 + $0x18] sm:$0xff] }
   0x5   :  { %163 = vmatprep.mubr.f32.mxu0 %v4361_v5  ;;  %240 = vmatprep.mubr.f32.mxu1 %v4361_v5 }
   0x6   :  { %2437 = vset.pattern.permute.xlu0 %v2480_v9  ;;  %2438 = vset.pattern.permute.xlu1 %v2480_v9 }
   0x7   :  { %249 = vperm.xlu0 %2437, %v66_v6   ;;  %267 = vperm.xlu1 %2438, %v2335_v7  }
   0x8   :  { %2347 = vmatmul.mubr.msk.f32.gmra.mrb[2].mxu0 %vm86_vm0, %v64_v8  ;;  %2349 = vmatmul.mubr.msk.f32.gmra.mrb[2].mxu1 %vm86_vm0, %v64_v8 }
   0x9   :  { %1117 = vmatprep.mubr.f32.mxu0 %v4361_v5  ;;  %1188 = vmatprep.mubr.f32.mxu1 %v4361_v5 }
   0xa   :  { %20 = vsyncpa [#allocation3], 0  ;;  %v2337_v12 = vld [vmem:[%s4348_s3 + $0x20] sm:$0xff]  ;;  %v2338_v13 = vld [vmem:[%s4348_s3 + $0x28] sm:$0xff]  ;;  %s2482_s19 = smov 16   ;;  %s2483_s20 = smov 15  }
   0xb   :  { %254 = vperm.xlu0 %2437, %v67_v10   ;;  %272 = vperm.xlu1 %2438, %v2336_v11   ;;  %v376_v14 = vld [vmem:[%s4349_s4] sm:$0xff]  ;;  %v377_v15 = vld [vmem:[%s4349_s4 + $0x8] sm:$0xff]  ;;  %v2350_v16 = vld [vmem:[%s4349_s4 + $0x10] sm:$0xff]  ;;  %s2484_s21 = smov 1   ;;  %s2485_s22 = smov 127   ;;  %vm1049_vm9 = vcmask 130048  }
   0xc   :  { %v2351_v17 = vld [vmem:[%s4349_s4 + $0x18] sm:$0xff]  ;;  %v2352_v18 = vld [vmem:[%s4349_s4 + $0x20] sm:$0xff]  ;;  %v2353_v19 = vld [vmem:[%s4349_s4 + $0x28] sm:$0xff]  ;;  %s2486_s2 = smov 113   ;;  %s2487_s23 = smov 112   ;;  %vm2241_vm10 = vcmask 15360  }
   0xd   :  { %v2354_v20 = vld [vmem:[%s4349_s4 + $0x30] sm:$0xff]  ;;  %v2355_v21 = vld [vmem:[%s4349_s4 + $0x38] sm:$0xff]  ;;  %v2356_v22 = vld [vmem:[%s4349_s4 + $0x40] sm:$0xff]  ;;  %s2488_s24 = smov 111  }
   0xe   :  { %v2357_v23 = vld [vmem:[%s4349_s4 + $0x48] sm:$0xff]  ;;  %v2358_v24 = vld [vmem:[%s4349_s4 + $0x50] sm:$0xff]  ;;  %v2359_v25 = vld [vmem:[%s4349_s4 + $0x58] sm:$0xff] }
   0xf   :  { %301 = vperm.xlu0 %2437, %v2337_v12   ;;  %306 = vperm.xlu1 %2438, %v2338_v13   ;;  %v2360_v26 = vld [vmem:[%s4349_s4 + $0x60] sm:$0xff]  ;;  %v2361_v27 = vld [vmem:[%s4349_s4 + $0x68] sm:$0xff]  ;;  %v2362_v28 = vld [vmem:[%s4349_s4 + $0x70] sm:$0xff] }
  0x10   :  { %v2363_v29 = vld [vmem:[%s4349_s4 + $0x78] sm:$0xff]  ;;  %v2368_v30 = vld [vmem:[%s4349_s4 + $0x80] sm:$0xff]  ;;  %v2369_v31 = vld [vmem:[%s4349_s4 + $0x88] sm:$0xff]  ;;  %s2481_s4 = smov 17  }
  0x11   :  { %v2339_v32 = vld [vmem:[%s4348_s3 + $0x30] sm:$0xff]  ;;  %v2340_v33 = vld [vmem:[%s4348_s3 + $0x38] sm:$0xff] }
  0x13   :  { %380 = vperm.xlu0 %2437, %v376_v14   ;;  %385 = vperm.xlu1 %2438, %v377_v15  }
  0x17   :  { %450 = vperm.xlu0 %2437, %v2350_v16   ;;  %455 = vperm.xlu1 %2438, %v2351_v17  }
  0x1b   :  { %528 = vperm.xlu0 %2437, %v2352_v18   ;;  %533 = vperm.xlu1 %2438, %v2353_v19  }
  0x1f   :  { %606 = vperm.xlu0 %2437, %v2354_v20   ;;  %611 = vperm.xlu1 %2438, %v2355_v21  }
  0x23   :  { %635 = vperm.xlu0 %2437, %v2356_v22   ;;  %640 = vperm.xlu1 %2438, %v2357_v23  }
  0x27   :  { %713 = vperm.xlu0 %2437, %v2358_v24   ;;  %718 = vperm.xlu1 %2438, %v2359_v25  }
  0x2b   :  { %791 = vperm.xlu0 %2437, %v2360_v26   ;;  %796 = vperm.xlu1 %2438, %v2361_v27  }
  0x2f   :  { %869 = vperm.xlu0 %2437, %v2362_v28   ;;  %874 = vperm.xlu1 %2438, %v2363_v29  }
  0x33   :  { %947 = vperm.xlu0 %2437, %v2368_v30   ;;  %952 = vperm.xlu1 %2438, %v2369_v31  }
  0x37   :  { %973 = vperm.xlu0 %2437, %v2339_v32   ;;  %978 = vperm.xlu1 %2438, %v2340_v33  }
  0x86   :  { %v2676_v34 = vpop.permute.xlu0 %249  ;;  %v2678_v35 = vpop.permute.xlu1 %267 }
  0x8a   :  { %v2680_v36 = vpop.permute.xlu0 %254  ;;  %v2690_v51 = vpop.permute.xlu1 %272 }
  0x8e   :  { %v2692_v52 = vpop.permute.xlu0 %301  ;;  %v2704_v0 = vpop.permute.xlu1 %306 }
  0x92   :  { %v2772_v15 = vpop.permute.xlu0 %380  ;;  %v2785_v23 = vpop.permute.xlu1 %385 }
  0x96   :  { %v2787_v24 = vpop.permute.xlu0 %450  ;;  %v2801_v32 = vpop.permute.xlu1 %455 }
  0x9a   :  { %v2803_v33 = vpop.permute.xlu0 %528 }
  0xd7   :  { %v159_v37 = vpop.f32.mrb[0].mxu0  ;;  %v236_v38 = vpop.f32.mrb[0].mxu1 }
  0xd8   :  { %v257_v39 = vmul.f32 %v2676_v34, %v159_v37  ;;  %v259_v40 = vmul.f32 %v2676_v34, %v236_v38  ;;  %v161_v41 = vpop.f32.mrb[1].mxu0  ;;  %v2684_v42 = vpop.f32.mrb[1].mxu1 }
  0xd9   :  { %v258_v9 = vmul.f32 %v2676_v34, %v161_v41  ;;  %v260_v11 = vmul.f32 %v2676_v34, %v2684_v42  ;;  %v2816_v38 = vpop.permute.xlu1 %533 }
  0xda   :  { %v275_v43 = vadd.f32 %v2678_v35, %v257_v39  ;;  %v277_v44 = vadd.f32 %v2678_v35, %v259_v40  ;;  %v2818_v39 = vpop.permute.xlu0 %606 }
  0xdb   :  { %v165_v45 = vpop.f32.mrb[2].mxu0  ;;  %v242_v46 = vpop.f32.mrb[2].mxu1  ;;  %v276_v10 = vadd.f32 %v2678_v35, %v258_v9  ;;  %v278_v14 = vadd.f32 %v2678_v35, %v260_v11 }
  0xdc   :  { %v291_v47 = vmin.f32 %v275_v43, 0.0  ;;  %v293_v48 = vmin.f32 %v277_v44, 0.0  ;;  %v167_v49 = vpop.f32.mrb[3].mxu0  ;;  %v2688_v50 = vpop.f32.mrb[3].mxu1  ;;  %v283_v53 = vmax.f32 %v275_v43, 0.0  ;;  %v261_v55 = vmul.f32 %v2680_v36, %v165_v45 }
  0xdd   :  { %v263_v56 = vmul.f32 %v2680_v36, %v242_v46  ;;  %v285_v61 = vmax.f32 %v277_v44, 0.0  ;;  %v262_v12 = vmul.f32 %v2680_v36, %v167_v49  ;;  %v292_v13 = vmin.f32 %v276_v10, 0.0  ;;  %v2826_v40 = vpop.permute.xlu1 %611 }
  0xde   :  { %v309_v54 = vmul.f32 %v2692_v52, %v291_v47  ;;  %v311_v58 = vmul.f32 %v2692_v52, %v293_v48  ;;  %v279_v59 = vadd.f32 %v2690_v51, %v261_v55  ;;  %v264_v17 = vmul.f32 %v2680_v36, %v2688_v50  ;;  %4449 = vst [vmem:[#allocation5_spill] sm:$0xff] %v2826_v40  ;;  %v2828_v41 = vpop.permute.xlu0 %635 }
  0xdf   :  { %v281_v60 = vadd.f32 %v2690_v51, %v263_v56  ;;  %v280_v16 = vadd.f32 %v2690_v51, %v262_v12  ;;  %v310_v18 = vmul.f32 %v2692_v52, %v292_v13  ;;  %v294_v19 = vmin.f32 %v278_v14, 0.0  ;;  %v2345_v12 = vld [vmem:[%s4351_s6 + $0x8] sm:$0xff] }
  0xe0   :  { %v2697_v57 = vadd.f32 %v309_v54, %v283_v53  ;;  %v295_v62 = vmin.f32 %v279_v59, 0.0  ;;  %v2706_v1 = vadd.f32 %v311_v58, %v285_v61  ;;  %v287_v2 = vmax.f32 %v279_v59, 0.0  ;;  %v2341_v59 = vld [vmem:[%s4348_s3 + $0x40] sm:$0xff] }
  0xe1   :  { %v297_v63 = vmin.f32 %v281_v60, 0.0  ;;  %v289_v7 = vmax.f32 %v281_v60, 0.0  ;;  %v284_v20 = vmax.f32 %v276_v10, 0.0  ;;  %v296_v21 = vmin.f32 %v280_v16, 0.0  ;;  %v2836_v42 = vpop.permute.xlu1 %640  ;;  %v1220_v10 = vld [vmem:[%s4353_s8] sm:$0xff] }
  0xe2   :  { %325 = vrot.lane.b32.xlu0 %v2697_v57, %s2481_s4  ;;  %v313_v3 = vmul.f32 %v2704_v0, %v295_v62  ;;  %v282_v22 = vadd.f32 %v2690_v51, %v264_v17  ;;  %v312_v26 = vmul.f32 %v2692_v52, %v294_v19  ;;  %v286_v27 = vmax.f32 %v278_v14, 0.0  ;;  %v2838_v43 = vpop.permute.xlu0 %713  ;;  %v2343_v62 = vld [vmem:[%s4348_s3 + $0x50] sm:$0xff]  ;;  %v1221_v17 = vld [vmem:[%s4353_s8 + $0x8] sm:$0xff]  ;;  %v2374_v19 = vld [vmem:[%s4353_s8 + $0x20] sm:$0xff] }
  0xe3   :  { %v315_v6 = vmul.f32 %v2704_v0, %v297_v63  ;;  %v2789_v25 = vadd.f32 %v310_v18, %v284_v20  ;;  %v314_v28 = vmul.f32 %v2704_v0, %v296_v21  ;;  %v288_v31 = vmax.f32 %v280_v16, 0.0  ;;  %4450 = vst [vmem:[#allocation6_spill] sm:$0xff] %v2838_v43  ;;  %v2372_v14 = vld [vmem:[%s4353_s8 + $0x10] sm:$0xff]  ;;  %v2373_v21 = vld [vmem:[%s4353_s8 + $0x18] sm:$0xff] }
  0xe4   :  { %v2709_v4 = vadd.f32 %v313_v3, %v287_v2  ;;  %v298_v29 = vmin.f32 %v282_v22, 0.0  ;;  %v2797_v30 = vadd.f32 %v312_v26, %v286_v27  ;;  %v290_v36 = vmax.f32 %v282_v22, 0.0  ;;  %v83_v3 = vld [vmem:[%s4351_s6] sm:$0xff] }
  0xe5   :  { %v2716_v8 = vadd.f32 %v315_v6, %v289_v7  ;;  %v2805_v34 = vadd.f32 %v314_v28, %v288_v31  ;;  %v2846_v44 = vpop.permute.xlu1 %718  ;;  %v2344_v7 = vld [vmem:[%s4348_s3 + $0x58] sm:$0xff]  ;;  %v1510_v26 = vld [vmem:[%s4354_s9] sm:$0xff]  ;;  %v2375_v28 = vld [vmem:[%s4353_s8 + $0x28] sm:$0xff] }
  0xe6   :  { %333 = vrot.lane.b32.xlu0 %v2706_v1, %s2481_s4  ;;  %327 = vrot.lane.b32.xlu1 %v2709_v4, %s2481_s4  ;;  %v316_v35 = vmul.f32 %v2704_v0, %v298_v29  ;;  %4451 = vst [vmem:[#allocation7_spill] sm:$0xff] %v2846_v44  ;;  %v2848_v45 = vpop.permute.xlu0 %791  ;;  %v2342_v0 = vld [vmem:[%s4348_s3 + $0x48] sm:$0xff]  ;;  %v2387_v31 = vld [vmem:[%s4354_s9 + $0x10] sm:$0xff] }
  0xe7   :  { %4452 = vst [vmem:[#allocation8_spill] sm:$0xff] %v2848_v45 }
  0xe8   :  { %v2812_v37 = vadd.f32 %v316_v35, %v290_v36  ;;  %v1511_v36 = vld [vmem:[%s4354_s9 + $0x8] sm:$0xff] }
  0xe9   :  { %v2856_v46 = vpop.permute.xlu1 %796 }
  0xea   :  { %396 = vrot.lane.b32.xlu0 %v2697_v57, %s2482_s19  ;;  %335 = vrot.lane.b32.xlu1 %v2716_v8, %s2481_s4  ;;  %4453 = vst [vmem:[#allocation9_spill] sm:$0xff] %v2856_v46  ;;  %v2858_v47 = vpop.permute.xlu0 %869 }
  0xeb   :  { %4454 = vst [vmem:[#allocation10_spill] sm:$0xff] %v2858_v47  ;;  %v3088_v47 = vmul.f32 %v2828_v41, %v2797_v30 }
  0xed   :  { %v2866_v48 = vpop.permute.xlu1 %874  ;;  %4478 = vst [vmem:[#allocation34_spill] sm:$0xff] %v3088_v47 }
  0xee   :  { %404 = vrot.lane.b32.xlu0 %v2706_v1, %s2482_s19  ;;  %398 = vrot.lane.b32.xlu1 %v2709_v4, %s2482_s19  ;;  %4455 = vst [vmem:[#allocation11_spill] sm:$0xff] %v2866_v48  ;;  %v2868_v49 = vpop.permute.xlu0 %947  ;;  %v3049_v48 = vld [vmem:[%s4346_s1 + $0x8] sm:$0xff] }
  0xef   :  { %4456 = vst [vmem:[#allocation12_spill] sm:$0xff] %v2868_v49  ;;  %v2398_v49 = vld [vmem:[%s4354_s9 + $0x68] sm:$0xff] }
  0xf1   :  { %v2876_v50 = vpop.permute.xlu1 %952 }
  0xf2   :  { %474 = vrot.lane.b32.xlu0 %v2697_v57, %s2483_s20  ;;  %406 = vrot.lane.b32.xlu1 %v2716_v8, %s2482_s19  ;;  %4457 = vst [vmem:[#allocation13_spill] sm:$0xff] %v2876_v50  ;;  %v2878_v51 = vpop.permute.xlu0 %973 }
  0xf3   :  { %4458 = vst [vmem:[#allocation14_spill] sm:$0xff] %v2878_v51  ;;  %v2399_v51 = vld [vmem:[%s4354_s9 + $0x70] sm:$0xff] }
  0xf5   :  { %v2888_v53 = vpop.permute.xlu1 %978 }
  0xf6   :  { %482 = vrot.lane.b32.xlu0 %v2706_v1, %s2483_s20  ;;  %476 = vrot.lane.b32.xlu1 %v2709_v4, %s2483_s20  ;;  %4459 = vst [vmem:[#allocation15_spill] sm:$0xff] %v2888_v53 }
  0xfa   :  { %552 = vrot.lane.b32.xlu0 %v2697_v57, %s2484_s21  ;;  %484 = vrot.lane.b32.xlu1 %v2716_v8, %s2483_s20 }
  0xfe   :  { %560 = vrot.lane.b32.xlu0 %v2706_v1, %s2484_s21  ;;  %554 = vrot.lane.b32.xlu1 %v2709_v4, %s2484_s21 }
 0x102   :  { %659 = vrot.lane.b32.xlu0 %v2697_v57, %s2485_s22  ;;  %562 = vrot.lane.b32.xlu1 %v2716_v8, %s2484_s21 }
 0x106   :  { %667 = vrot.lane.b32.xlu0 %v2706_v1, %s2485_s22  ;;  %661 = vrot.lane.b32.xlu1 %v2709_v4, %s2485_s22 }
 0x10a   :  { %737 = vrot.lane.b32.xlu0 %v2697_v57, %s2486_s2  ;;  %669 = vrot.lane.b32.xlu1 %v2716_v8, %s2485_s22 }
 0x10e   :  { %745 = vrot.lane.b32.xlu0 %v2706_v1, %s2486_s2  ;;  %739 = vrot.lane.b32.xlu1 %v2709_v4, %s2486_s2 }
 0x112   :  { %815 = vrot.lane.b32.xlu0 %v2697_v57, %s2487_s23  ;;  %747 = vrot.lane.b32.xlu1 %v2716_v8, %s2486_s2 }
 0x116   :  { %823 = vrot.lane.b32.xlu0 %v2706_v1, %s2487_s23  ;;  %817 = vrot.lane.b32.xlu1 %v2709_v4, %s2487_s23 }
 0x11a   :  { %893 = vrot.lane.b32.xlu0 %v2697_v57, %s2488_s24  ;;  %825 = vrot.lane.b32.xlu1 %v2716_v8, %s2487_s23 }
 0x11e   :  { %901 = vrot.lane.b32.xlu0 %v2706_v1, %s2488_s24  ;;  %895 = vrot.lane.b32.xlu1 %v2709_v4, %s2488_s24 }
 0x122   :  { %329 = vrot.lane.b32.xlu0 %v2789_v25, %s2481_s4  ;;  %903 = vrot.lane.b32.xlu1 %v2716_v8, %s2488_s24 }
 0x126   :  { %337 = vrot.lane.b32.xlu0 %v2797_v30, %s2481_s4  ;;  %331 = vrot.lane.b32.xlu1 %v2805_v34, %s2481_s4 }
 0x12a   :  { %400 = vrot.lane.b32.xlu0 %v2789_v25, %s2482_s19  ;;  %339 = vrot.lane.b32.xlu1 %v2812_v37, %s2481_s4 }
 0x12e   :  { %408 = vrot.lane.b32.xlu0 %v2797_v30, %s2482_s19  ;;  %402 = vrot.lane.b32.xlu1 %v2805_v34, %s2482_s19 }
 0x132   :  { %478 = vrot.lane.b32.xlu0 %v2789_v25, %s2483_s20  ;;  %410 = vrot.lane.b32.xlu1 %v2812_v37, %s2482_s19 }
 0x136   :  { %486 = vrot.lane.b32.xlu0 %v2797_v30, %s2483_s20  ;;  %480 = vrot.lane.b32.xlu1 %v2805_v34, %s2483_s20 }
 0x13a   :  { %556 = vrot.lane.b32.xlu0 %v2789_v25, %s2484_s21  ;;  %488 = vrot.lane.b32.xlu1 %v2812_v37, %s2483_s20 }
 0x13e   :  { %564 = vrot.lane.b32.xlu0 %v2797_v30, %s2484_s21  ;;  %558 = vrot.lane.b32.xlu1 %v2805_v34, %s2484_s21 }
 0x142   :  { %663 = vrot.lane.b32.xlu0 %v2789_v25, %s2485_s22  ;;  %566 = vrot.lane.b32.xlu1 %v2812_v37, %s2484_s21 }
 0x146   :  { %671 = vrot.lane.b32.xlu0 %v2797_v30, %s2485_s22  ;;  %665 = vrot.lane.b32.xlu1 %v2805_v34, %s2485_s22 }
 0x14a   :  { %741 = vrot.lane.b32.xlu0 %v2789_v25, %s2486_s2  ;;  %673 = vrot.lane.b32.xlu1 %v2812_v37, %s2485_s22 }
 0x14e   :  { %749 = vrot.lane.b32.xlu0 %v2797_v30, %s2486_s2  ;;  %743 = vrot.lane.b32.xlu1 %v2805_v34, %s2486_s2 }
 0x152   :  { %819 = vrot.lane.b32.xlu0 %v2789_v25, %s2487_s23  ;;  %751 = vrot.lane.b32.xlu1 %v2812_v37, %s2486_s2 }
 0x154   :  { %v2886_v52 = vpop.permute.xlu0 %325 }
 0x156   :  { %827 = vrot.lane.b32.xlu0 %v2797_v30, %s2487_s23  ;;  %821 = vrot.lane.b32.xlu1 %v2805_v34, %s2487_s23 }
 0x158   :  { %v2894_v54 = vpop.permute.xlu0 %333  ;;  %v2896_v55 = vpop.permute.xlu1 %327 }
 0x15a   :  { %897 = vrot.lane.b32.xlu0 %v2789_v25, %s2488_s24  ;;  %829 = vrot.lane.b32.xlu1 %v2812_v37, %s2487_s23 }
 0x15c   :  { %v2902_v56 = vpop.permute.xlu0 %396  ;;  %v2904_v58 = vpop.permute.xlu1 %335 }
 0x15e   :  { %905 = vrot.lane.b32.xlu0 %v2797_v30, %s2488_s24  ;;  %899 = vrot.lane.b32.xlu1 %v2805_v34, %s2488_s24  ;;  %v3105_v30 = vmul.f32 %v2836_v42, %v2805_v34  ;;  %v2400_v34 = vld [vmem:[%s4354_s9 + $0x78] sm:$0xff] }
 0x160   :  { %v2913_v60 = vpop.permute.xlu0 %404  ;;  %v2915_v61 = vpop.permute.xlu1 %398  ;;  %4482 = vst [vmem:[#allocation38_spill] sm:$0xff] %v3105_v30 }
 0x162   :  { %991 = vperm.xlu0 %2437, %v2341_v59   ;;  %907 = vrot.lane.b32.xlu1 %v2812_v37, %s2488_s24 }
 0x164   :  { %v2922_v63 = vpop.permute.xlu0 %474  ;;  %v2927_v2 = vpop.permute.xlu1 %406 }
 0x166   :  { %1025 = vperm.xlu0 %2437, %v2343_v62   ;;  %996 = vperm.xlu1 %2438, %v2342_v0   ;;  %v2389_v62 = vld [vmem:[%s4354_s9 + $0x20] sm:$0xff] }
 0x168   :  { %v2932_v6 = vpop.permute.xlu0 %482  ;;  %v2937_v9 = vpop.permute.xlu1 %476 }
 0x16a   :  { %1197 = vperm.xlu0 %2437, %v83_v3   ;;  %1030 = vperm.xlu1 %2438, %v2344_v7   ;;  %v2388_v3 = vld [vmem:[%s4354_s9 + $0x18] sm:$0xff] }
 0x16c   :  { %v2942_v11 = vpop.permute.xlu0 %552  ;;  %v2947_v13 = vpop.permute.xlu1 %484 }
 0x16e   :  { %1402 = vperm.xlu0 %2437, %v1220_v10   ;;  %1206 = vperm.xlu1 %2438, %v2345_v12   ;;  %v2391_v10 = vld [vmem:[%s4354_s9 + $0x30] sm:$0xff] }
 0x170   :  { %v2952_v16 = vpop.permute.xlu0 %560  ;;  %v2957_v18 = vpop.permute.xlu1 %554 }
 0x172   :  { %1420 = vperm.xlu0 %2437, %v2372_v14   ;;  %1407 = vperm.xlu1 %2438, %v1221_v17   ;;  %v2390_v14 = vld [vmem:[%s4354_s9 + $0x28] sm:$0xff] }
 0x174   :  { %v2962_v20 = vpop.permute.xlu0 %659  ;;  %v2967_v22 = vpop.permute.xlu1 %562 }
 0x176   :  { %1454 = vperm.xlu0 %2437, %v2374_v19   ;;  %1425 = vperm.xlu1 %2438, %v2373_v21   ;;  %v2393_v19 = vld [vmem:[%s4354_s9 + $0x40] sm:$0xff] }
 0x178   :  { %v2972_v27 = vpop.permute.xlu0 %667  ;;  %v2977_v29 = vpop.permute.xlu1 %661 }
 0x179   :  { %4460 = vst [vmem:[#allocation16_spill] sm:$0xff] %v2977_v29 }
 0x17a   :  { %1514 = vperm.xlu0 %2437, %v1510_v26   ;;  %1459 = vperm.xlu1 %2438, %v2375_v28   ;;  %v2392_v26 = vld [vmem:[%s4354_s9 + $0x38] sm:$0xff] }
 0x17c   :  { %v2982_v35 = vpop.permute.xlu0 %737  ;;  %v2987_v59 = vpop.permute.xlu1 %669 }
 0x17d   :  { %4461 = vst [vmem:[#allocation17_spill] sm:$0xff] %v2982_v35  ;;  %4462 = vst [vmem:[#allocation18_spill] sm:$0xff] %v2987_v59  ;;  %v2402_v35 = vld [vmem:[%s4354_s9 + $0x88] sm:$0xff] }
 0x17e   :  { %1567 = vperm.xlu0 %2437, %v2387_v31   ;;  %1519 = vperm.xlu1 %2438, %v1511_v36   ;;  %v2395_v31 = vld [vmem:[%s4354_s9 + $0x50] sm:$0xff] }
 0x180   :  { %v2992_v0 = vpop.permute.xlu0 %745  ;;  %v2997_v7 = vpop.permute.xlu1 %739 }
 0x181   :  { %4463 = vst [vmem:[#allocation19_spill] sm:$0xff] %v2992_v0  ;;  %4464 = vst [vmem:[#allocation20_spill] sm:$0xff] %v2997_v7 }
 0x182   :  { %1628 = vperm.xlu0 %2437, %v2389_v62   ;;  %1572 = vperm.xlu1 %2438, %v2388_v3   ;;  %v341_v62 = vlaneseq  ;;  %v2394_v3 = vld [vmem:[%s4354_s9 + $0x48] sm:$0xff] }
 0x184   :  { %v3002_v12 = vpop.permute.xlu0 %815  ;;  %v3007_v17 = vpop.permute.xlu1 %747  ;;  %v353_v5 = vshrl.u32 %v341_v62, 7 }
 0x185   :  { %4465 = vst [vmem:[#allocation21_spill] sm:$0xff] %v3002_v12  ;;  %4466 = vst [vmem:[#allocation22_spill] sm:$0xff] %v3007_v17 }
 0x186   :  { %1689 = vperm.xlu0 %2437, %v2391_v10   ;;  %1633 = vperm.xlu1 %2438, %v2390_v14   ;;  %v2397_v14 = vld [vmem:[%s4354_s9 + $0x60] sm:$0xff]  ;;  %v3044_v50 = vsub.s32 0, %v353_v5  ;;  %v764_v30 = vsub.s32 6, %v353_v5 }
 0x188   :  { %v3012_v21 = vpop.permute.xlu0 %823  ;;  %v3017_v28 = vpop.permute.xlu1 %817  ;;  %4473 = vst [vmem:[#allocation29_spill] sm:$0xff] %v3044_v50 }
 0x189   :  { %4467 = vst [vmem:[#allocation23_spill] sm:$0xff] %v3012_v21  ;;  %4468 = vst [vmem:[#allocation24_spill] sm:$0xff] %v3017_v28  ;;  %v423_v28 = vsub.s32 1, %v353_v5  ;;  %v579_v21 = vsub.s32 3, %v353_v5 }
 0x18a   :  { %1718 = vperm.xlu0 %2437, %v2393_v19   ;;  %1694 = vperm.xlu1 %2438, %v2392_v26   ;;  %v2396_v26 = vld [vmem:[%s4354_s9 + $0x58] sm:$0xff] }
 0x18b   :  { %v3165_v59 = vrot.slane %v3049_v48, %v579_v21 }
 0x18c   :  { %v3022_v36 = vpop.permute.xlu0 %893  ;;  %v3027_v10 = vpop.permute.xlu1 %825 }
 0x18d   :  { %4469 = vst [vmem:[#allocation25_spill] sm:$0xff] %v3022_v36  ;;  %4470 = vst [vmem:[#allocation26_spill] sm:$0xff] %v3027_v10  ;;  %v3073_v10 = vmul.f32 %v2828_v41, %v2697_v57  ;;  %v501_v36 = vsub.s32 2, %v353_v5  ;;  %v3092_v57 = vmul.f32 %v2836_v42, %v2709_v4  ;;  %v3109_v4 = vmul.f32 %v2836_v42, %v2812_v37 }
 0x18e   :  { %1779 = vperm.xlu0 %2437, %v2395_v31   ;;  %1723 = vperm.xlu1 %2438, %v2394_v3   ;;  %v3042_v31 = vand.u32 127, %v341_v62  ;;  %v3064_v62 = vld [vmem:[%s4346_s1] sm:$0xff]  ;;  %v3128_v37 = vrot.slane %v3049_v48, %v423_v28 }
 0x18f   :  { %4475 = vst [vmem:[#allocation31_spill] sm:$0xff] %v3073_v10  ;;  %4479 = vst [vmem:[#allocation35_spill] sm:$0xff] %v3092_v57  ;;  %v3137_v44 = vrot.slane %v3064_v62, %v423_v28  ;;  %v3171_v29 = vrot.slane %v3064_v62, %v579_v21 }
 0x190   :  { %v3032_v19 = vpop.permute.xlu0 %901  ;;  %v3037_v53 = vpop.permute.xlu1 %895  ;;  %vm343_vm1 = vcmp.lt.s32.totalorder %v3042_v31, 17  ;;  %4483 = vst [vmem:[#allocation39_spill] sm:$0xff] %v3109_v4  ;;  %vm412_vm2 = vcmp.lt.s32.totalorder %v3042_v31, 16  ;;  %4485 = vst [vmem:[#allocation41_spill] sm:$0xff] %v3128_v37  ;;  %v686_v4 = vsub.s32 5, %v353_v5  ;;  %vm490_vm3 = vcmp.lt.s32.totalorder %v3042_v31, 15 }
 0x191   :  { %4471 = vst [vmem:[#allocation27_spill] sm:$0xff] %v3032_v19  ;;  %4472 = vst [vmem:[#allocation28_spill] sm:$0xff] %v3037_v53  ;;  %v3069_v53 = vld [vmem:[%s4346_s1 + $0x18] sm:$0xff]  ;;  %v3077_v19 = vmul.f32 %v2828_v41, %v2789_v25  ;;  %v3096_v25 = vmul.f32 %v2836_v42, %v2716_v8  ;;  %vm568_vm4 = vcmp.lt.s32.totalorder %v3042_v31, 1  ;;  %vm675_vm5 = vcmp.lt.s32.totalorder %v3042_v31, 127 }
 0x192   :  { %1840 = vperm.xlu0 %2437, %v2397_v14   ;;  %1784 = vperm.xlu1 %2438, %v2396_v26   ;;  %v3057_v14 = vld [vmem:[%s4346_s1 + $0x10] sm:$0xff]  ;;  %4486 = vst [vmem:[#allocation42_spill] sm:$0xff] %v3137_v44  ;;  %v3140_v12 = vrot.slane %v3069_v53, %v423_v28  ;;  %v3162_v0 = vrot.slane %v3069_v53, %v501_v36  ;;  %vm753_vm6 = vcmp.lt.s32.totalorder %v3042_v31, 113  ;;  %vm831_vm7 = vcmp.lt.s32.totalorder %v3042_v31, 112 }
 0x193   :  { %4476 = vst [vmem:[#allocation32_spill] sm:$0xff] %v3077_v19  ;;  %4480 = vst [vmem:[#allocation36_spill] sm:$0xff] %v3096_v25  ;;  %v3113_v8 = vrot.slane %v3057_v14, %v3044_v50  ;;  %v3131_v42 = vrot.slane %v3057_v14, %v423_v28  ;;  %v3146_v25 = vrot.slane %v3057_v14, %v501_v36  ;;  %vm909_vm8 = vcmp.lt.s32.totalorder %v3042_v31, 111 }
 0x194   :  { %v330_v3 = vpop.permute.xlu0 %329  ;;  %v3059_v26 = vpop.permute.xlu1 %903  ;;  %v3156_v28 = vrot.slane %v3064_v62, %v501_v36  ;;  %v3177_v19 = vrot.slane %v3064_v62, %v686_v4 }
 0x195   :  { %4474 = vst [vmem:[#allocation30_spill] sm:$0xff] %v3059_v26  ;;  %v2401_v26 = vld [vmem:[%s4354_s9 + $0x80] sm:$0xff]  ;;  %v346_v57 = vsel %vm343_vm1, %v330_v3, %v2894_v54  ;;  %v348_v7 = vsel %vm343_vm1, %v2886_v52, %v330_v3  ;;  %v3168_v3 = vrot.slane %v3057_v14, %v579_v21 }
 0x196   :  { %1901 = vperm.xlu0 %2437, %v2399_v51   ;;  %v3081_v51 = vmul.f32 %v2828_v41, %v2706_v1  ;;  %v3101_v1 = vrot.slane %v3049_v48, %v3044_v50  ;;  %1845 = vperm.xlu1 %2438, %v2398_v49   ;;  %v3117_v41 = vrot.slane %v3064_v62, %v3044_v50 }
 0x197   :  { %v3121_v49 = vrot.slane %v3069_v53, %v3044_v50  ;;  %v2376_v50 = vld [vmem:[%s4353_s8 + $0x30] sm:$0xff]  ;;  %4487 = vst [vmem:[#allocation43_spill] sm:$0xff] %v3177_v19  ;;  %v370_v43 = vmul.f32 %v3113_v8, %v346_v57  ;;  %v3194_v19 = vrot.slane %v3049_v48, %v764_v30 }
 0x198   :  { %4477 = vst [vmem:[#allocation33_spill] sm:$0xff] %v3081_v51  ;;  %4481 = vst [vmem:[#allocation37_spill] sm:$0xff] %v3101_v1  ;;  %v338_v46 = vpop.permute.xlu0 %337  ;;  %v332_v45 = vpop.permute.xlu1 %331  ;;  %v3174_v51 = vrot.slane %v3069_v53, %v579_v21  ;;  %v369_v10 = vmul.f32 %v3101_v1, %v348_v7  ;;  %v3191_v21 = vrot.slane %v3064_v62, %v764_v30 }
 0x199   :  { %4484 = vst [vmem:[#allocation40_spill] sm:$0xff] %v3117_v41  ;;  %4492 = vst [vmem:[#allocation48_spill] sm:$0xff] %v3194_v19  ;;  %v3200_v7 = vrot.slane %v3069_v53, %v764_v30  ;;  %v344_v57 = vsel %vm343_vm1, %v2894_v54, %v338_v46 }
 0x19a   :  { %1962 = vperm.xlu0 %2437, %v2401_v26   ;;  %v3143_v26 = vrot.slane %v3049_v48, %v501_v36  ;;  %1906 = vperm.xlu1 %2438, %v2400_v34   ;;  %v842_v34 = vsub.s32 7, %v353_v5  ;;  %v3180_v36 = vrot.slane %v3049_v48, %v686_v4  ;;  %v3185_v5 = vrot.slane %v3057_v14, %v686_v4 }
 0x19b   :  { %4491 = vst [vmem:[#allocation47_spill] sm:$0xff] %v3191_v21  ;;  %4494 = vst [vmem:[#allocation50_spill] sm:$0xff] %v3200_v7 }
 0x19c   :  { %v401_v17 = vpop.permute.xlu0 %400  ;;  %v340_v47 = vpop.permute.xlu1 %339  ;;  %4488 = vst [vmem:[#allocation44_spill] sm:$0xff] %v3180_v36  ;;  %4489 = vst [vmem:[#allocation45_spill] sm:$0xff] %v3185_v5  ;;  %v3197_v36 = vrot.slane %v3057_v14, %v764_v30  ;;  %v3212_v19 = vrot.slane %v3064_v62, %v842_v34  ;;  %v389_v62 = vmul.f32 %v2772_v15, %v369_v10 }
 0x19d   :  { %v415_v30 = vsel %vm412_vm2, %v401_v17, %v2913_v60  ;;  %v417_v54 = vsel %vm412_vm2, %v2902_v56, %v401_v17 }
 0x19e   :  { %1988 = vperm.xlu0 %2437, %v2376_v50   ;;  %v3188_v50 = vrot.slane %v3069_v53, %v686_v4  ;;  %1967 = vperm.xlu1 %2438, %v2402_v35   ;;  %4493 = vst [vmem:[#allocation49_spill] sm:$0xff] %v3197_v36  ;;  %v350_v35 = vsel %vm343_vm1, %v338_v46, %v2886_v52  ;;  %v2377_v4 = vld [vmem:[%s4353_s8 + $0x38] sm:$0xff]  ;;  %4495 = vst [vmem:[#allocation51_spill] sm:$0xff] %v3212_v19 }
 0x19f   :  { %v3215_v36 = vrot.slane %v3049_v48, %v842_v34  ;;  %v3224_v46 = vrot.slane %v3057_v14, %v842_v34  ;;  %v3227_v52 = vrot.slane %v3069_v53, %v842_v34  ;;  %v390_v48 = vmul.f32 %v2772_v15, %v370_v43 }
 0x1a0   :  { %4490 = vst [vmem:[#allocation46_spill] sm:$0xff] %v3188_v50  ;;  %v409_v40 = vpop.permute.xlu0 %408  ;;  %v403_v7 = vpop.permute.xlu1 %402  ;;  %v368_v17 = vmul.f32 %v3117_v41, %v350_v35  ;;  %v371_v14 = vmul.f32 %v3121_v49, %v344_v57  ;;  %v347_v34 = vsel %vm343_vm1, %v332_v45, %v2904_v58  ;;  %v439_v35 = vmul.f32 %v3131_v42, %v415_v30 }
 0x1a1   :  { %4496 = vst [vmem:[#allocation52_spill] sm:$0xff] %v3215_v36  ;;  %4497 = vst [vmem:[#allocation53_spill] sm:$0xff] %v3224_v46  ;;  %v349_v36 = vsel %vm343_vm1, %v2896_v55, %v332_v45  ;;  %v419_v19 = vsel %vm412_vm2, %v409_v40, %v2902_v56  ;;  %v413_v53 = vsel %vm412_vm2, %v2913_v60, %v409_v40 }
 0x1a2   :  { %4498 = vst [vmem:[#allocation54_spill] sm:$0xff] %v3227_v52  ;;  %v418_v43 = vsel %vm412_vm2, %v2915_v61, %v403_v7  ;;  %1993 = vperm.xlu1 %2438, %v2377_v4   ;;  %v438_v56 = vmul.f32 %v3128_v37, %v417_v54  ;;  %v416_v57 = vsel %vm412_vm2, %v403_v7, %v2927_v2 }
 0x1a3   :  { %v373_v40 = vmul.f32 %v3101_v1, %v349_v36  ;;  %v345_v60 = vsel %vm343_vm1, %v2904_v58, %v340_v47  ;;  %v351_v45 = vsel %vm343_vm1, %v340_v47, %v2896_v55  ;;  %v437_v4 = vmul.f32 %v3137_v44, %v419_v19 }
 0x1a4   :  { %v479_v10 = vpop.permute.xlu0 %478  ;;  %v411_v54 = vpop.permute.xlu1 %410  ;;  %v440_v30 = vmul.f32 %v3140_v12, %v413_v53  ;;  %v442_v52 = vmul.f32 %v3128_v37, %v418_v43  ;;  %v388_v58 = vmul.f32 %v2772_v15, %v368_v17  ;;  %v391_v1 = vmul.f32 %v2772_v15, %v371_v14 }
 0x1a5   :  { %v493_v7 = vsel %vm490_vm3, %v479_v10, %v2932_v6  ;;  %v495_v36 = vsel %vm490_vm3, %v2922_v63, %v479_v10  ;;  %v374_v47 = vmul.f32 %v3113_v8, %v347_v34  ;;  %v443_v55 = vmul.f32 %v3131_v42, %v416_v57 }
 0x1a6   :  { %v459_v53 = vmul.f32 %v2787_v24, %v438_v56  ;;  %v460_v43 = vmul.f32 %v2787_v24, %v439_v35  ;;  %v372_v37 = vmul.f32 %v3117_v41, %v351_v45  ;;  %v420_v46 = vsel %vm412_vm2, %v411_v54, %v2915_v61 }
 0x1a7   :  { %v375_v10 = vmul.f32 %v3121_v49, %v345_v60  ;;  %v516_v17 = vmul.f32 %v3143_v26, %v495_v36  ;;  %v517_v15 = vmul.f32 %v3146_v25, %v493_v7  ;;  %v393_v56 = vmul.f32 %v2785_v23, %v373_v40 }
 0x1a8   :  { %v487_v19 = vpop.permute.xlu0 %486  ;;  %v481_v34 = vpop.permute.xlu1 %480  ;;  %v458_v35 = vmul.f32 %v2787_v24, %v437_v4  ;;  %v461_v57 = vmul.f32 %v2787_v24, %v440_v30  ;;  %v463_v45 = vmul.f32 %v2801_v32, %v442_v52  ;;  %v464_v61 = vmul.f32 %v2801_v32, %v443_v55 }
 0x1a9   :  { %v497_v14 = vsel %vm490_vm3, %v487_v19, %v2922_v63  ;;  %v414_v60 = vsel %vm412_vm2, %v2927_v2, %v411_v54  ;;  %v441_v7 = vmul.f32 %v3137_v44, %v420_v46  ;;  %v491_v63 = vsel %vm490_vm3, %v2932_v6, %v487_v19 }
 0x1aa   :  { %v394_v4 = vmul.f32 %v2785_v23, %v374_v47  ;;  %v467_v24 = vadd.f32 %v459_v53, %v389_v62  ;;  %v468_v30 = vadd.f32 %v460_v43, %v390_v48  ;;  %v515_v52 = vmul.f32 %v3156_v28, %v497_v14 }
 0x1ab   :  { %v392_v36 = vmul.f32 %v2785_v23, %v372_v37  ;;  %v395_v55 = vmul.f32 %v2785_v23, %v375_v10  ;;  %v537_v41 = vmul.f32 %v2803_v33, %v516_v17  ;;  %v538_v2 = vmul.f32 %v2803_v33, %v517_v15 }
 0x1ac   :  { %v557_v40 = vpop.permute.xlu0 %556  ;;  %v489_v46 = vpop.permute.xlu1 %488  ;;  %v466_v54 = vadd.f32 %v458_v35, %v388_v58  ;;  %v469_v44 = vadd.f32 %v461_v57, %v391_v1  ;;  %v444_v6 = vmul.f32 %v3140_v12, %v414_v60  ;;  %v518_v19 = vmul.f32 %v3162_v0, %v491_v63 }
 0x1ad   :  { %v471_v47 = vadd.f32 %v463_v45, %v393_v56  ;;  %v3307_v62 = vadd.f32 %v464_v61, %v394_v4  ;;  %v462_v48 = vmul.f32 %v2801_v32, %v441_v7  ;;  %v573_v23 = vsel %vm568_vm4, %v2942_v11, %v557_v40 }
 0x1ae   :  { %v536_v53 = vmul.f32 %v2803_v33, %v515_v52  ;;  %v494_v1 = vsel %vm490_vm3, %v481_v34, %v2947_v13  ;;  %v496_v58 = vsel %vm490_vm3, %v2937_v9, %v481_v34  ;;  %v545_v10 = vadd.f32 %v537_v41, %v467_v24 }
 0x1af   :  { %v546_v17 = vadd.f32 %v538_v2, %v468_v30  ;;  %v571_v15 = vsel %vm568_vm4, %v557_v40, %v2952_v16  ;;  %v465_v35 = vmul.f32 %v2801_v32, %v444_v6  ;;  %v539_v57 = vmul.f32 %v2803_v33, %v518_v19 }
 0x1b0   :  { %v565_v37 = vpop.permute.xlu0 %564  ;;  %v559_v56 = vpop.permute.xlu1 %558  ;;  %v594_v45 = vmul.f32 %v3165_v59, %v573_v23  ;;  %v520_v41 = vmul.f32 %v3143_v26, %v496_v58  ;;  %v521_v61 = vmul.f32 %v3146_v25, %v494_v1  ;;  %v498_v60 = vsel %vm490_vm3, %v489_v46, %v2937_v9  ;;  %v4499_v1 = vld [vmem:[#allocation44_spill] sm:$0xff] }
 0x1b1   :  { %v575_v43 = vsel %vm568_vm4, %v565_v37, %v2942_v11  ;;  %v569_v34 = vsel %vm568_vm4, %v2952_v16, %v565_v37  ;;  %v470_v11 = vadd.f32 %v462_v48, %v392_v36  ;;  %v544_v63 = vadd.f32 %v536_v53, %v466_v54 }
 0x1b2   :  { %v593_v14 = vmul.f32 %v3171_v29, %v575_v43  ;;  %v595_v32 = vmul.f32 %v3168_v3, %v571_v15  ;;  %v492_v33 = vsel %vm490_vm3, %v2947_v13, %v489_v46  ;;  %v574_v16 = vsel %vm568_vm4, %v2957_v18, %v559_v56  ;;  %v4500_v15 = vld [vmem:[#allocation43_spill] sm:$0xff] }
 0x1b3   :  { %v596_v40 = vmul.f32 %v3174_v51, %v569_v34  ;;  %v572_v9 = vsel %vm568_vm4, %v559_v56, %v2967_v22  ;;  %v615_v52 = vmul.f32 %v2818_v39, %v594_v45  ;;  %v519_v13 = vmul.f32 %v3156_v28, %v498_v60 }
 0x1b4   :  { %v664_v7 = vpop.permute.xlu0 %663  ;;  %v614_v4 = vmul.f32 %v2818_v39, %v593_v14  ;;  %v567_v30 = vpop.permute.xlu1 %566  ;;  %v541_v46 = vmul.f32 %v2816_v38, %v520_v41  ;;  %v522_v54 = vmul.f32 %v3162_v0, %v492_v33  ;;  %v598_v6 = vmul.f32 %v3165_v59, %v574_v16 }
 0x1b5   :  { %v678_v24 = vsel %vm675_vm5, %v664_v7, %v2972_v27  ;;  %v680_v36 = vsel %vm675_vm5, %v2962_v20, %v664_v7  ;;  %v570_v2 = vsel %vm568_vm4, %v2967_v22, %v567_v30  ;;  %v576_v19 = vsel %vm568_vm4, %v567_v30, %v2957_v18  ;;  %v4504_v30 = vld [vmem:[#allocation32_spill] sm:$0xff] }
 0x1b6   :  { %v473_v23 = vadd.f32 %v465_v35, %v395_v55  ;;  %v616_v37 = vmul.f32 %v2818_v39, %v595_v32  ;;  %v599_v53 = vmul.f32 %v3168_v3, %v572_v9  ;;  %v701_v22 = vmul.f32 %v4499_v1, %v678_v24  ;;  %v4501_v32 = vld [vmem:[#allocation5_spill] sm:$0xff]  ;;  %v4503_v9 = vld [vmem:[#allocation31_spill] sm:$0xff] }
 0x1b7   :  { %v617_v58 = vmul.f32 %v2818_v39, %v596_v40  ;;  %v622_v43 = vadd.f32 %v614_v4, %v544_v63  ;;  %v700_v14 = vmul.f32 %v4500_v15, %v680_v36  ;;  %v600_v56 = vmul.f32 %v3174_v51, %v570_v2  ;;  %v4502_v40 = vld [vmem:[#allocation6_spill] sm:$0xff] }
 0x1b8   :  { %v672_v48 = vpop.permute.xlu0 %671  ;;  %v666_v45 = vpop.permute.xlu1 %665  ;;  %v542_v18 = vmul.f32 %v2816_v38, %v521_v61  ;;  %v623_v34 = vadd.f32 %v615_v52, %v545_v10  ;;  %v540_v41 = vmul.f32 %v2816_v38, %v519_v13  ;;  %v597_v55 = vmul.f32 %v3171_v29, %v576_v19 }
 0x1b9   :  { %v547_v35 = vadd.f32 %v539_v57, %v469_v44  ;;  %v549_v60 = vadd.f32 %v541_v46, %v471_v47  ;;  %v543_v7 = vmul.f32 %v2816_v38, %v522_v54  ;;  %v619_v33 = vmul.f32 %v4501_v32, %v598_v6 }
 0x1ba   :  { %v624_v63 = vadd.f32 %v616_v37, %v546_v17  ;;  %v620_v16 = vmul.f32 %v4501_v32, %v599_v53  ;;  %v722_v4 = vmul.f32 %v4502_v40, %v701_v22  ;;  %v676_v10 = vsel %vm675_vm5, %v2972_v27, %v672_v48  ;;  %v4505_v37 = vld [vmem:[#allocation33_spill] sm:$0xff]  ;;  %v4506_v22 = vld [vmem:[#allocation16_spill] sm:$0xff] }
 0x1bb   :  { %v625_v61 = vadd.f32 %v617_v58, %v547_v35  ;;  %v651_v44 = vadd.f32 %v4503_v9, %v622_v43  ;;  %v721_v47 = vmul.f32 %v4502_v40, %v700_v14  ;;  %v621_v38 = vmul.f32 %v4501_v32, %v600_v56  ;;  %v4507_v43 = vld [vmem:[#allocation34_spill] sm:$0xff]  ;;  %v4512_v9 = vld [vmem:[#allocation48_spill] sm:$0xff] }
 0x1bc   :  { %v742_v39 = vpop.permute.xlu0 %741  ;;  %v674_v57 = vpop.permute.xlu1 %673  ;;  %v550_v17 = vadd.f32 %v542_v18, %v3307_v62  ;;  %v548_v24 = vadd.f32 %v540_v41, %v470_v11  ;;  %v652_v52 = vadd.f32 %v4504_v30, %v623_v34  ;;  %v618_v13 = vmul.f32 %v4501_v32, %v597_v55  ;;  %v4508_v14 = vld [vmem:[#allocation18_spill] sm:$0xff]  ;;  %v4509_v34 = vld [vmem:[#allocation19_spill] sm:$0xff]  ;;  %v4510_v55 = vld [vmem:[#allocation17_spill] sm:$0xff] }
 0x1bd   :  { %v551_v36 = vadd.f32 %v543_v7, %v473_v23  ;;  %v627_v2 = vadd.f32 %v619_v33, %v549_v60  ;;  %v682_v27 = vsel %vm675_vm5, %v672_v48, %v2962_v20  ;;  %v702_v46 = vmul.f32 %v3185_v5, %v676_v10  ;;  %v4511_v7 = vld [vmem:[#allocation38_spill] sm:$0xff] }
 0x1be   :  { %v628_v6 = vadd.f32 %v620_v16, %v550_v17  ;;  %v730_v19 = vadd.f32 %v722_v4, %v652_v52  ;;  %v653_v53 = vadd.f32 %v4505_v37, %v624_v63  ;;  %v681_v62 = vsel %vm675_vm5, %v4506_v22, %v666_v45  ;;  %v4514_v17 = vld [vmem:[#allocation20_spill] sm:$0xff]  ;;  %v4515_v52 = vld [vmem:[#allocation35_spill] sm:$0xff] }
 0x1bf   :  { %v729_v11 = vadd.f32 %v721_v47, %v651_v44  ;;  %v629_v58 = vadd.f32 %v621_v38, %v551_v36  ;;  %v654_v23 = vadd.f32 %v4507_v43, %v625_v61  ;;  %v679_v56 = vsel %vm675_vm5, %v666_v45, %v4508_v14  ;;  %v4513_v47 = vld [vmem:[#allocation22_spill] sm:$0xff]  ;;  %v4516_v36 = vld [vmem:[#allocation36_spill] sm:$0xff]  ;;  %v4519_v43 = vld [vmem:[#allocation21_spill] sm:$0xff] }
 0x1c0   :  { %v750_v54 = vpop.permute.xlu0 %749  ;;  %v744_v20 = vpop.permute.xlu1 %743  ;;  %v626_v48 = vadd.f32 %v618_v13, %v548_v24  ;;  %v703_v18 = vmul.f32 %v3188_v50, %v682_v27  ;;  %v756_v41 = vsel %vm753_vm6, %v742_v39, %v4509_v34  ;;  %v758_v35 = vsel %vm753_vm6, %v4510_v55, %v742_v39 }
 0x1c1   :  { %v723_v60 = vmul.f32 %v4502_v40, %v702_v46  ;;  %v656_v32 = vadd.f32 %v4511_v7, %v627_v2  ;;  %v704_v33 = vmul.f32 %v4500_v15, %v681_v62  ;;  %v677_v45 = vsel %vm675_vm5, %v4508_v14, %v674_v57  ;;  %v4522_v7 = vld [vmem:[#allocation23_spill] sm:$0xff] }
 0x1c2   :  { %v705_v16 = vmul.f32 %v4499_v1, %v679_v56  ;;  %v683_v4 = vsel %vm675_vm5, %v674_v57, %v4506_v22  ;;  %v754_v39 = vsel %vm753_vm6, %v4509_v34, %v750_v54  ;;  %v760_v10 = vsel %vm753_vm6, %v750_v54, %v4510_v55  ;;  %v4517_v54 = vld [vmem:[#allocation49_spill] sm:$0xff]  ;;  %v4518_v22 = vld [vmem:[#allocation50_spill] sm:$0xff]  ;;  %v4520_v34 = vld [vmem:[#allocation7_spill] sm:$0xff] }
 0x1c3   :  { %v778_v61 = vmul.f32 %v3191_v21, %v758_v35  ;;  %v779_v44 = vmul.f32 %v4512_v9, %v756_v41  ;;  %v757_v38 = vsel %vm753_vm6, %v744_v20, %v4513_v47  ;;  %v759_v57 = vsel %vm753_vm6, %v4514_v17, %v744_v20  ;;  %v4521_v41 = vld [vmem:[#allocation8_spill] sm:$0xff] }
 0x1c4   :  { %v820_v63 = vpop.permute.xlu0 %819  ;;  %v752_v24 = vpop.permute.xlu1 %751  ;;  %v724_v30 = vmul.f32 %v4502_v40, %v703_v18  ;;  %v655_v13 = vadd.f32 %v4515_v52, %v626_v48  ;;  %v657_v2 = vadd.f32 %v4516_v36, %v628_v6  ;;  %v706_v27 = vmul.f32 %v3185_v5, %v677_v45  ;;  %v4525_v36 = vld [vmem:[#allocation9_spill] sm:$0xff] }
 0x1c5   :  { %v707_v46 = vmul.f32 %v3188_v50, %v683_v4  ;;  %v780_v37 = vmul.f32 %v4517_v54, %v754_v39  ;;  %v781_v62 = vmul.f32 %v4518_v22, %v760_v10  ;;  %v836_v14 = vsel %vm831_vm7, %v4519_v43, %v820_v63  ;;  %v4523_v10 = vld [vmem:[#allocation39_spill] sm:$0xff] }
 0x1c6   :  { %v731_v20 = vadd.f32 %v723_v60, %v653_v53  ;;  %v725_v40 = vmul.f32 %v4520_v34, %v704_v33  ;;  %v782_v48 = vmul.f32 %v3191_v21, %v759_v57  ;;  %v783_v6 = vmul.f32 %v4512_v9, %v757_v38  ;;  %v4524_v33 = vld [vmem:[#allocation51_spill] sm:$0xff] }
 0x1c7   :  { %v726_v18 = vmul.f32 %v4520_v34, %v705_v16  ;;  %v799_v55 = vmul.f32 %v4521_v41, %v778_v61  ;;  %v800_v35 = vmul.f32 %v4521_v41, %v779_v44  ;;  %v834_v45 = vsel %vm831_vm7, %v820_v63, %v4522_v7 }
 0x1c8   :  { %v828_v56 = vpop.permute.xlu0 %827  ;;  %v822_v4 = vpop.permute.xlu1 %821  ;;  %v732_v39 = vadd.f32 %v724_v30, %v654_v23  ;;  %v658_v53 = vadd.f32 %v4523_v10, %v629_v58  ;;  %v727_v60 = vmul.f32 %v4520_v34, %v706_v27  ;;  %v856_v57 = vmul.f32 %v4524_v33, %v836_v14  ;;  %v4526_v30 = vld [vmem:[#allocation52_spill] sm:$0xff] }
 0x1c9   :  { %v728_v38 = vmul.f32 %v4520_v34, %v707_v46  ;;  %v801_v16 = vmul.f32 %v4521_v41, %v780_v37  ;;  %v802_v61 = vmul.f32 %v4521_v41, %v781_v62  ;;  %v755_v44 = vsel %vm753_vm6, %v4513_v47, %v752_v24  ;;  %v4527_v62 = vld [vmem:[#allocation10_spill] sm:$0xff]  ;;  %v2364_v41 = vld [vmem:[%s4346_s1 + $0x20] ss:$0 sm:$0xff] }
 0x1ca   :  { %v733_v63 = vadd.f32 %v725_v40, %v655_v13  ;;  %v803_v23 = vmul.f32 %v4525_v36, %v782_v48  ;;  %v804_v58 = vmul.f32 %v4525_v36, %v783_v6  ;;  %v857_v27 = vmul.f32 %v4526_v30, %v834_v45 }
 0x1cb   :  { %v734_v10 = vadd.f32 %v726_v18, %v656_v32  ;;  %v807_v14 = vadd.f32 %v799_v55, %v729_v11  ;;  %v808_v21 = vadd.f32 %v800_v35, %v730_v19  ;;  %v761_v46 = vsel %vm753_vm6, %v752_v24, %v4514_v17  ;;  %v4528_v55 = vld [vmem:[#allocation25_spill] sm:$0xff] }
 0x1cc   :  { %v898_v52 = vpop.permute.xlu0 %897  ;;  %v830_v37 = vpop.permute.xlu1 %829  ;;  %v877_v34 = vmul.f32 %v4527_v62, %v856_v57  ;;  %v784_v47 = vmul.f32 %v4517_v54, %v755_v44  ;;  %v832_v13 = vsel %vm831_vm7, %v4522_v7, %v828_v56  ;;  %v838_v40 = vsel %vm831_vm7, %v828_v56, %v4519_v43  ;;  %v4529_v56 = vld [vmem:[#allocation53_spill] sm:$0xff]  ;;  %v4530_v7 = vld [vmem:[#allocation54_spill] sm:$0xff]  ;;  %v2367_v57 = vld [vmem:[%s4346_s1 + $0x38] ss:$0 sm:$0xff] }
 0x1cd   :  { %v3477_v32 = vadd.f32 %v727_v60, %v657_v2  ;;  %v3479_v19 = vadd.f32 %v728_v38, %v658_v53  ;;  %v809_v11 = vadd.f32 %v801_v16, %v731_v20  ;;  %v810_v48 = vadd.f32 %v802_v61, %v732_v39  ;;  %v2366_v2 = vld [vmem:[%s4346_s1 + $0x30] ss:$0 sm:$0xff]  ;;  %v2365_v39 = vld [vmem:[%s4346_s1 + $0x28] ss:$0 sm:$0xff] }
 0x1ce   :  { %v811_v24 = vadd.f32 %v803_v23, %v733_v63  ;;  %v812_v6 = vadd.f32 %v804_v58, %v734_v10  ;;  %v878_v18 = vmul.f32 %v4527_v62, %v857_v27  ;;  %v914_v35 = vsel %vm909_vm8, %v4528_v55, %v898_v52  ;;  %v4531_v53 = vld [vmem:[#allocation27_spill] sm:$0xff]  ;;  %v4532_v23 = vld [vmem:[#allocation26_spill] sm:$0xff]  ;;  %v4533_v58 = vld [vmem:[#allocation24_spill] sm:$0xff] }
 0x1cf   :  { %v785_v43 = vmul.f32 %v4518_v22, %v761_v46  ;;  %v858_v20 = vmul.f32 %v4529_v56, %v832_v13  ;;  %v859_v45 = vmul.f32 %v4530_v7, %v838_v40  ;;  %v912_v60 = vsel %vm909_vm8, %v898_v52, %v4531_v53 }
 0x1d0   :  { %v906_v17 = vpop.permute.xlu0 %905  ;;  %v900_v38 = vpop.permute.xlu1 %899  ;;  %v885_v16 = vadd.f32 %v877_v34, %v807_v14  ;;  %v805_v61 = vmul.f32 %v4525_v36, %v784_v47  ;;  %v835_v52 = vsel %vm831_vm7, %v822_v4, %v4532_v23  ;;  %v837_v27 = vsel %vm831_vm7, %v4533_v58, %v822_v4 }
 0x1d1   :  { %v910_v44 = vsel %vm909_vm8, %v4531_v53, %v906_v17  ;;  %v916_v63 = vsel %vm909_vm8, %v906_v17, %v4528_v55  ;;  %v934_v10 = vmul.f32 %v2364_v41, %v914_v35  ;;  %v935_v46 = vmul.f32 %v2365_v39, %v912_v60  ;;  %v4534_v55 = vld [vmem:[#allocation30_spill] sm:$0xff]  ;;  %v4535_v35 = vld [vmem:[#allocation28_spill] sm:$0xff] }
 0x1d2   :  { %v936_v14 = vmul.f32 %v2366_v2, %v910_v44  ;;  %v833_v34 = vsel %vm831_vm7, %v4532_v23, %v830_v37  ;;  %v839_v47 = vsel %vm831_vm7, %v830_v37, %v4533_v58  ;;  %v937_v13 = vmul.f32 %v2367_v57, %v916_v63 }
 0x1d3   :  { %v879_v40 = vmul.f32 %v4527_v62, %v858_v20  ;;  %v880_v17 = vmul.f32 %v4527_v62, %v859_v45  ;;  %v913_v4 = vsel %vm909_vm8, %v900_v38, %v4534_v55  ;;  %v915_v53 = vsel %vm909_vm8, %v4535_v35, %v900_v38  ;;  %v4536_v20 = vld [vmem:[#allocation12_spill] sm:$0xff] }
 0x1d4   :  { %v908_v60 = vpop.permute.xlu1 %907  ;;  %v860_v44 = vmul.f32 %v4524_v33, %v837_v27  ;;  %v861_v23 = vmul.f32 %v4526_v30, %v835_v52  ;;  %v955_v45 = vmul.f32 %v4536_v20, %v934_v10  ;;  %v862_v63 = vmul.f32 %v4529_v56, %v833_v34  ;;  %v4537_v10 = vld [vmem:[#allocation11_spill] sm:$0xff] }
 0x1d5   :  { %v911_v37 = vsel %vm909_vm8, %v4534_v55, %v908_v60  ;;  %v917_v62 = vsel %vm909_vm8, %v908_v60, %v4535_v35  ;;  %v863_v58 = vmul.f32 %v4530_v7, %v839_v47  ;;  %v957_v38 = vmul.f32 %v4536_v20, %v936_v14 }
 0x1d6   :  { %v956_v27 = vmul.f32 %v4536_v20, %v935_v46  ;;  %v958_v52 = vmul.f32 %v4536_v20, %v937_v13  ;;  %v938_v33 = vmul.f32 %v2364_v41, %v915_v53  ;;  %v939_v30 = vmul.f32 %v2365_v39, %v913_v4  ;;  %v4538_v39 = vld [vmem:[#allocation13_spill] sm:$0xff] }
 0x1d7   :  { %v806_v55 = vmul.f32 %v4525_v36, %v785_v43  ;;  %v887_v22 = vadd.f32 %v879_v40, %v809_v11  ;;  %v940_v54 = vmul.f32 %v2366_v2, %v911_v37  ;;  %v941_v50 = vmul.f32 %v2367_v57, %v917_v62  ;;  %v4539_v40 = vld [vmem:[#allocation14_spill] sm:$0xff] }
 0x1d8   :  { %v886_v35 = vadd.f32 %v878_v18, %v808_v21  ;;  %v888_v60 = vadd.f32 %v880_v17, %v810_v48  ;;  %v881_v9 = vmul.f32 %v4537_v10, %v860_v44  ;;  %v882_v34 = vmul.f32 %v4537_v10, %v861_v23 }
 0x1d9   :  { %v963_v47 = vadd.f32 %v955_v45, %v885_v16  ;;  %v883_v14 = vmul.f32 %v4537_v10, %v862_v63  ;;  %v884_v46 = vmul.f32 %v4537_v10, %v863_v58  ;;  %v965_v7 = vadd.f32 %v957_v38, %v887_v22 }
 0x1da   :  { %v964_v13 = vadd.f32 %v956_v27, %v886_v35  ;;  %v966_v41 = vadd.f32 %v958_v52, %v888_v60  ;;  %v959_v4 = vmul.f32 %v4538_v39, %v938_v33  ;;  %v960_v36 = vmul.f32 %v4538_v39, %v939_v30 }
 0x1db   :  { %v813_v11 = vadd.f32 %v805_v61, %v3477_v32  ;;  %v814_v21 = vadd.f32 %v806_v55, %v3479_v19  ;;  %v961_v48 = vmul.f32 %v4538_v39, %v940_v54  ;;  %v962_v18 = vmul.f32 %v4538_v39, %v941_v50 }
 0x1dc   :  { %v889_v2 = vadd.f32 %v881_v9, %v811_v24  ;;  %v890_v43 = vadd.f32 %v882_v34, %v812_v6  ;;  %v981_v22 = vmul.f32 %v4539_v40, %v963_v47  ;;  %v983_v17 = vmul.f32 %v4539_v40, %v965_v7  ;;  %v4540_v24 = vld [vmem:[#allocation15_spill] sm:$0xff] }
 0x1dd   :  { %v891_v57 = vadd.f32 %v883_v14, %v813_v11  ;;  %v892_v16 = vadd.f32 %v884_v46, %v814_v21  ;;  %v984_v30 = vmul.f32 %v4539_v40, %v966_v41  ;;  %v982_v32 = vmul.f32 %v4539_v40, %v964_v13 }
 0x1de   :  { %v967_v53 = vadd.f32 %v959_v4, %v889_v2  ;;  %v968_v33 = vadd.f32 %v960_v36, %v890_v43 }
 0x1df   :  { %v969_v19 = vadd.f32 %v961_v48, %v891_v57  ;;  %v970_v61 = vadd.f32 %v962_v18, %v892_v16 }
 0x1e0   :  { %v985_v6 = vmul.f32 %v4540_v24, %v967_v53  ;;  %v986_v37 = vmul.f32 %v4540_v24, %v968_v33 }
 0x1e1   :  { %v992_v44 = vpop.permute.xlu0 %991  ;;  %v987_v7 = vmul.f32 %v4540_v24, %v969_v19  ;;  %v988_v45 = vmul.f32 %v4540_v24, %v970_v61 }
 0x1e2   :  { %v999_v54 = vadd.f32 %v992_v44, %v981_v22  ;;  %v1001_v23 = vadd.f32 %v992_v44, %v983_v17  ;;  %v1000_v50 = vadd.f32 %v992_v44, %v982_v32  ;;  %v1002_v9 = vadd.f32 %v992_v44, %v984_v30 }
 0x1e4   :  { %v1015_v62 = vmin.f32 %v999_v54, 0.0  ;;  %v1017_v20 = vmin.f32 %v1001_v23, 0.0  ;;  %v1016_v38 = vmin.f32 %v1000_v50, 0.0  ;;  %v1018_v27 = vmin.f32 %v1002_v9, 0.0 }
 0x1e5   :  { %v1026_v63 = vpop.permute.xlu0 %1025  ;;  %v997_v58 = vpop.permute.xlu1 %996  ;;  %v1007_v10 = vmax.f32 %v999_v54, 0.0  ;;  %v1009_v34 = vmax.f32 %v1001_v23, 0.0  ;;  %v1008_v47 = vmax.f32 %v1000_v50, 0.0  ;;  %v1010_v14 = vmax.f32 %v1002_v9, 0.0 }
 0x1e6   :  { %v1003_v52 = vadd.f32 %v997_v58, %v985_v6  ;;  %v1004_v55 = vadd.f32 %v997_v58, %v986_v37  ;;  %v1005_v35 = vadd.f32 %v997_v58, %v987_v7  ;;  %v1006_v60 = vadd.f32 %v997_v58, %v988_v45  ;;  %v65_v6 = vld [vmem:[%s4350_s5] sm:$0xff] }
 0x1e7   :  { %v1033_v46 = vmul.f32 %v1026_v63, %v1015_v62  ;;  %v1035_v13 = vmul.f32 %v1026_v63, %v1017_v20  ;;  %v1034_v11 = vmul.f32 %v1026_v63, %v1016_v38  ;;  %v1036_v48 = vmul.f32 %v1026_v63, %v1018_v27 }
 0x1e8   :  { %v1019_v41 = vmin.f32 %v1003_v52, 0.0  ;;  %v1021_v39 = vmin.f32 %v1005_v35, 0.0  ;;  %v1020_v36 = vmin.f32 %v1004_v55, 0.0  ;;  %v1022_v21 = vmin.f32 %v1006_v60, 0.0 }
 0x1e9   :  { %v1031_v4 = vpop.permute.xlu1 %1030  ;;  %v1011_v18 = vmax.f32 %v1003_v52, 0.0  ;;  %v1013_v2 = vmax.f32 %v1005_v35, 0.0  ;;  %v1012_v16 = vmax.f32 %v1004_v55, 0.0  ;;  %v1014_v22 = vmax.f32 %v1006_v60, 0.0  ;;  %v1198_v62 = vpop.permute.xlu0 %1197 }
 0x1ea   :  { %v1037_v43 = vmul.f32 %v1031_v4, %v1019_v41  ;;  %v1039_v57 = vmul.f32 %v1031_v4, %v1021_v39  ;;  %v1038_v40 = vmul.f32 %v1031_v4, %v1020_v36  ;;  %v1040_v17 = vmul.f32 %v1031_v4, %v1022_v21  ;;  %v2449_v41 = vld [vmem:[%s4345_s0] sm:$0xff]  ;;  %v2450_v4 = vld [vmem:[%s4345_s0 + $0x10] sm:$0xff]  ;;  %v1218_v21 = vld [vmem:[%s4352_s7 + $0x8] sm:$0xff] }
 0x1eb   :  { %v1043_v53 = vadd.f32 %v1035_v13, %v1009_v34  ;;  %v1041_v30 = vadd.f32 %v1033_v46, %v1007_v10  ;;  %v1042_v32 = vadd.f32 %v1034_v11, %v1008_v47  ;;  %v1044_v61 = vadd.f32 %v1036_v48, %v1010_v14  ;;  %v2447_v47 = vld [vmem:[%s4345_s0 + $0x8] sm:$0xff]  ;;  %v2448_v46 = vld [vmem:[%s4345_s0 + $0x18] sm:$0xff]  ;;  %v1217_v11 = vld [vmem:[%s4352_s7] sm:$0xff] }
 0x1ec   :  { %v1047_v33 = vadd.f32 %v1039_v57, %v1013_v2  ;;  %v1045_v44 = vadd.f32 %v1037_v43, %v1011_v18  ;;  %v1046_v19 = vadd.f32 %v1038_v40, %v1012_v16  ;;  %v1048_v54 = vadd.f32 %v1040_v17, %v1014_v22 }
 0x1ed   :  { %v4541_v37 = vmov 0.0   ;;  %v1207_v27 = vpop.permute.xlu1 %1206  ;;  %v3608_v48 = vpop.permute.xlu0 %1402 }
 0x1ee   :  { %v2416_v23 = vpack.c.bf16 %v1047_v33, %v1043_v53  ;;  %v2412_v50 = vpack.c.bf16 %v1045_v44, %v1041_v30  ;;  %v2410_v9 = vpack.c.bf16 %v1046_v19, %v1042_v32  ;;  %v2414_v24 = vpack.c.bf16 %v1048_v54, %v1044_v61 }
 0x1f0   :  { %2411 = vmatprep.subr.bf16.mxu0 %v2410_v9  ;;  %2415 = vmatprep.subr.bf16.mxu1 %v2414_v24 }
 0x1f1   :  { %2417 = vmatpush1.bf16.msra.mxu1 %v2416_v23  ;;  %2413 = vmatpush1.bf16.msra.mxu0 %v2412_v50  ;;  %v3610_v18 = vpop.permute.xlu0 %1420  ;;  %v3612_v2 = vpop.permute.xlu1 %1407 }
 0x1f4   :  { %2370 = vmatmul.mubr.msk.f32.vlgmr.msra.gmra.mrb[4].mxu0 %vm1049_vm9, %v65_v6  ;;  %2371 = vmatmul.mubr.msk.f32.vlgmr.msra.gmra.mrb[4].mxu1 %vm1049_vm9, %v65_v6 }
 0x1f5   :  { %1310 = vmatprep.mubr.f32.mxu0 %v4541_v37  ;;  %1387 = vmatprep.mubr.f32.mxu1 %v4541_v37  ;;  %v3618_v23 = vpop.permute.xlu0 %1454  ;;  %v1426_v50 = vpop.permute.xlu1 %1425 }
 0x2c7   :  { %v1119_v20 = vpop.f32.mrb[4].mxu0  ;;  %v1190_v7 = vpop.f32.mrb[4].mxu1 }
 0x2c8   :  { %v1200_v45 = vmul.f32 %v1198_v62, %v1119_v20  ;;  %v1202_v63 = vmul.f32 %v1198_v62, %v1190_v7  ;;  %v1121_v58 = vpop.f32.mrb[5].mxu0  ;;  %v1192_v38 = vpop.f32.mrb[5].mxu1 }
 0x2c9   :  { %v1201_v52 = vmul.f32 %v1198_v62, %v1121_v58  ;;  %v1203_v55 = vmul.f32 %v1198_v62, %v1192_v38 }
 0x2ca   :  { %v1209_v35 = vadd.f32 %v1207_v27, %v1200_v45  ;;  %v1211_v60 = vadd.f32 %v1207_v27, %v1202_v63 }
 0x2cb   :  { %v1210_v10 = vadd.f32 %v1207_v27, %v1201_v52  ;;  %v1212_v34 = vadd.f32 %v1207_v27, %v1203_v55  ;;  %v3628_v27 = vpop.permute.xlu1 %1459 }
 0x2cc   :  { %v3583_v39 = vadd.f32 %v2449_v41, %v1209_v35  ;;  %v3588_v36 = vadd.f32 %v2450_v4, %v1211_v60 }
 0x2cd   :  { %v3573_v14 = vadd.f32 %v2447_v47, %v1210_v10  ;;  %v3578_v13 = vadd.f32 %v2448_v46, %v1212_v34 }
 0x2ce   :  { %4544 = vst [vmem:[#allocation6_spill] sm:$0xff] %v3583_v39  ;;  %4545 = vst [vmem:[#allocation31_spill] sm:$0xff] %v3588_v36 }
 0x2cf   :  { %4542 = vst [vmem:[#allocation44_spill] sm:$0xff] %v3573_v14  ;;  %4543 = vst [vmem:[#allocation5_spill] sm:$0xff] %v3578_v13  ;;  %1246 = vmatprep.subr.mxu0 %v3573_v14  ;;  %1323 = vmatprep.subr.mxu1 %v3578_v13 }
 0x2d0   :  { %1247 = vmatpush1.msra.mxu0 %v3583_v39  ;;  %1324 = vmatpush1.msra.mxu1 %v3588_v36 }
 0x2d1   :  { %2383 = vmatmul.mubr.msk.f32.vlgmr.msra.gmra.mrb[6].mxu0 %vm86_vm0, %v1217_v11  ;;  %2385 = vmatmul.mubr.msk.f32.vlgmr.msra.gmra.mrb[6].mxu1 %vm86_vm0, %v1217_v11 }
 0x2d2   :  { %1316 = vmatprep.mubr.f32.mxu0 %v4541_v37  ;;  %1393 = vmatprep.mubr.f32.mxu1 %v4541_v37 }
 0x2d5   :  { %2384 = vmatmul.mubr.msk.f32.gmra.mrb[8].mxu0 %vm86_vm0, %v1218_v21  ;;  %2386 = vmatmul.mubr.msk.f32.gmra.mrb[8].mxu1 %vm86_vm0, %v1218_v21 }
 0x2d6   :  { %2131 = vmatprep.mubr.f32.mxu0 %v4541_v37  ;;  %2202 = vmatprep.mubr.f32.mxu1 %v4541_v37 }
 0x3a4   :  { %v1312_v43 = vpop.f32.mrb[6].mxu0  ;;  %v1389_v57 = vpop.f32.mrb[6].mxu1 }
 0x3a5   :  { %v1410_v16 = vmul.f32 %v3608_v48, %v1312_v43  ;;  %v1412_v40 = vmul.f32 %v3608_v48, %v1389_v57  ;;  %v1314_v22 = vpop.f32.mrb[7].mxu0  ;;  %v1391_v17 = vpop.f32.mrb[7].mxu1 }
 0x3a6   :  { %v1411_v46 = vmul.f32 %v3608_v48, %v1314_v22  ;;  %v1413_v4 = vmul.f32 %v3608_v48, %v1391_v17  ;;  %v3695_v57 = vpop.permute.xlu0 %1514 }
 0x3a7   :  { %v1428_v53 = vadd.f32 %v3610_v18, %v1410_v16  ;;  %v1430_v33 = vadd.f32 %v3610_v18, %v1412_v40 }
 0x3a8   :  { %v1318_v30 = vpop.f32.mrb[8].mxu0  ;;  %v1395_v44 = vpop.f32.mrb[8].mxu1  ;;  %v1429_v41 = vadd.f32 %v3610_v18, %v1411_v46  ;;  %v1431_v43 = vadd.f32 %v3610_v18, %v1413_v4 }
 0x3a9   :  { %v1444_v32 = vmin.f32 %v1428_v53, 0.0  ;;  %v1446_v19 = vmin.f32 %v1430_v33, 0.0  ;;  %v1320_v61 = vpop.f32.mrb[9].mxu0  ;;  %v1397_v54 = vpop.f32.mrb[9].mxu1  ;;  %v1436_v9 = vmax.f32 %v1428_v53, 0.0  ;;  %v1414_v6 = vmul.f32 %v3612_v2, %v1318_v30 }
 0x3aa   :  { %v1416_v37 = vmul.f32 %v3612_v2, %v1395_v44  ;;  %v1438_v63 = vmax.f32 %v1430_v33, 0.0  ;;  %v1415_v11 = vmul.f32 %v3612_v2, %v1320_v61  ;;  %v1445_v21 = vmin.f32 %v1429_v41, 0.0  ;;  %v3705_v33 = vpop.permute.xlu0 %1567  ;;  %v3707_v30 = vpop.permute.xlu1 %1519 }
 0x3ab   :  { %v1462_v24 = vmul.f32 %v3618_v23, %v1444_v32  ;;  %v1464_v20 = vmul.f32 %v3618_v23, %v1446_v19  ;;  %v1432_v7 = vadd.f32 %v1426_v50, %v1414_v6  ;;  %v1417_v40 = vmul.f32 %v3612_v2, %v1397_v54 }
 0x3ac   :  { %v1434_v45 = vadd.f32 %v1426_v50, %v1416_v37  ;;  %v1433_v16 = vadd.f32 %v1426_v50, %v1415_v11  ;;  %v1463_v48 = vmul.f32 %v3618_v23, %v1445_v21  ;;  %v1447_v22 = vmin.f32 %v1431_v43, 0.0 }
 0x3ad   :  { %v3623_v62 = vadd.f32 %v1462_v24, %v1436_v9  ;;  %v1448_v58 = vmin.f32 %v1432_v7, 0.0  ;;  %v3630_v52 = vadd.f32 %v1464_v20, %v1438_v63  ;;  %v1440_v55 = vmax.f32 %v1432_v7, 0.0 }
 0x3ae   :  { %v1450_v38 = vmin.f32 %v1434_v45, 0.0  ;;  %v1442_v34 = vmax.f32 %v1434_v45, 0.0  ;;  %v1437_v17 = vmax.f32 %v1429_v41, 0.0  ;;  %v1449_v53 = vmin.f32 %v1433_v16, 0.0  ;;  %v3721_v9 = vpop.permute.xlu0 %1628  ;;  %v3723_v24 = vpop.permute.xlu1 %1572 }
 0x3af   :  { %1478 = vrot.lane.b32.xlu0 %v3623_v62, %s2481_s4  ;;  %v1466_v35 = vmul.f32 %v3628_v27, %v1448_v58  ;;  %v1435_v18 = vadd.f32 %v1426_v50, %v1417_v40  ;;  %v1465_v44 = vmul.f32 %v3618_v23, %v1447_v22  ;;  %v1439_v32 = vmax.f32 %v1431_v43, 0.0 }
 0x3b0   :  { %v1468_v10 = vmul.f32 %v3628_v27, %v1450_v38  ;;  %v3709_v2 = vadd.f32 %v1463_v48, %v1437_v17  ;;  %v1467_v19 = vmul.f32 %v3628_v27, %v1449_v53  ;;  %v1441_v50 = vmax.f32 %v1433_v16, 0.0  ;;  %v2378_v17 = vld [vmem:[%s4353_s8 + $0x40] sm:$0xff] }
 0x3b1   :  { %v3633_v60 = vadd.f32 %v1466_v35, %v1440_v55  ;;  %v1451_v61 = vmin.f32 %v1435_v18, 0.0  ;;  %v3717_v54 = vadd.f32 %v1465_v44, %v1439_v32  ;;  %v1443_v37 = vmax.f32 %v1435_v18, 0.0  ;;  %v2380_v44 = vld [vmem:[%s4353_s8 + $0x50] sm:$0xff] }
 0x3b2   :  { %v3640_v47 = vadd.f32 %v1468_v10, %v1442_v34  ;;  %v3725_v23 = vadd.f32 %v1467_v19, %v1441_v50  ;;  %v3736_v7 = vpop.permute.xlu0 %1689  ;;  %v3738_v45 = vpop.permute.xlu1 %1633  ;;  %v2379_v19 = vld [vmem:[%s4353_s8 + $0x48] sm:$0xff]  ;;  %v1237_v50 = vld [vmem:[%s4356_s11] sm:$0xff] }
 0x3b3   :  { %1486 = vrot.lane.b32.xlu0 %v3630_v52, %s2481_s4  ;;  %1480 = vrot.lane.b32.xlu1 %v3633_v60, %s2481_s4  ;;  %v1469_v6 = vmul.f32 %v3628_v27, %v1451_v61 }
 0x3b5   :  { %v3732_v20 = vadd.f32 %v1469_v6, %v1443_v37  ;;  %v2381_v37 = vld [vmem:[%s4353_s8 + $0x58] sm:$0xff] }
 0x3b6   :  { %v3746_v63 = vpop.permute.xlu0 %1718  ;;  %v3748_v58 = vpop.permute.xlu1 %1694 }
 0x3b7   :  { %1530 = vrot.lane.b32.xlu0 %v3623_v62, %s2482_s19  ;;  %1488 = vrot.lane.b32.xlu1 %v3640_v47, %s2481_s4  ;;  %v3924_v5 = vmul.f32 %v3746_v63, %v3709_v2 }
 0x3b9   :  { %4572 = vst [vmem:[#allocation12_spill] sm:$0xff] %v3924_v5 }
 0x3ba   :  { %v3756_v38 = vpop.permute.xlu0 %1779  ;;  %v3758_v27 = vpop.permute.xlu1 %1723 }
 0x3bb   :  { %1538 = vrot.lane.b32.xlu0 %v3630_v52, %s2482_s19  ;;  %1532 = vrot.lane.b32.xlu1 %v3633_v60, %s2482_s19  ;;  %4546 = vst [vmem:[#allocation32_spill] sm:$0xff] %v3756_v38 }
 0x3be   :  { %v3766_v55 = vpop.permute.xlu0 %1840  ;;  %v3768_v35 = vpop.permute.xlu1 %1784 }
 0x3bf   :  { %1591 = vrot.lane.b32.xlu0 %v3623_v62, %s2483_s20  ;;  %1540 = vrot.lane.b32.xlu1 %v3640_v47, %s2482_s19  ;;  %4547 = vst [vmem:[#allocation33_spill] sm:$0xff] %v3766_v55  ;;  %4548 = vst [vmem:[#allocation16_spill] sm:$0xff] %v3768_v35 }
 0x3c2   :  { %v3776_v10 = vpop.permute.xlu0 %1901  ;;  %v3778_v34 = vpop.permute.xlu1 %1845 }
 0x3c3   :  { %1599 = vrot.lane.b32.xlu0 %v3630_v52, %s2483_s20  ;;  %1593 = vrot.lane.b32.xlu1 %v3633_v60, %s2483_s20  ;;  %4549 = vst [vmem:[#allocation34_spill] sm:$0xff] %v3776_v10  ;;  %4550 = vst [vmem:[#allocation18_spill] sm:$0xff] %v3778_v34 }
 0x3c6   :  { %v3786_v46 = vpop.permute.xlu0 %1962  ;;  %v3788_v41 = vpop.permute.xlu1 %1906 }
 0x3c7   :  { %1652 = vrot.lane.b32.xlu0 %v3623_v62, %s2484_s21  ;;  %1601 = vrot.lane.b32.xlu1 %v3640_v47, %s2483_s20  ;;  %4551 = vst [vmem:[#allocation19_spill] sm:$0xff] %v3786_v46  ;;  %4552 = vst [vmem:[#allocation17_spill] sm:$0xff] %v3788_v41 }
 0x3ca   :  { %v3796_v4 = vpop.permute.xlu0 %1988  ;;  %v3798_v11 = vpop.permute.xlu1 %1967 }
 0x3cb   :  { %1660 = vrot.lane.b32.xlu0 %v3630_v52, %s2484_s21  ;;  %1654 = vrot.lane.b32.xlu1 %v3633_v60, %s2484_s21  ;;  %4553 = vst [vmem:[#allocation38_spill] sm:$0xff] %v3796_v4  ;;  %4554 = vst [vmem:[#allocation22_spill] sm:$0xff] %v3798_v11 }
 0x3ce   :  { %v3808_v43 = vpop.permute.xlu1 %1993 }
 0x3cf   :  { %1742 = vrot.lane.b32.xlu0 %v3623_v62, %s2485_s22  ;;  %1662 = vrot.lane.b32.xlu1 %v3640_v47, %s2484_s21  ;;  %4555 = vst [vmem:[#allocation20_spill] sm:$0xff] %v3808_v43 }
 0x3d3   :  { %1750 = vrot.lane.b32.xlu0 %v3630_v52, %s2485_s22  ;;  %1744 = vrot.lane.b32.xlu1 %v3633_v60, %s2485_s22 }
 0x3d7   :  { %1803 = vrot.lane.b32.xlu0 %v3623_v62, %s2486_s2  ;;  %1752 = vrot.lane.b32.xlu1 %v3640_v47, %s2485_s22 }
 0x3db   :  { %1811 = vrot.lane.b32.xlu0 %v3630_v52, %s2486_s2  ;;  %1805 = vrot.lane.b32.xlu1 %v3633_v60, %s2486_s2 }
 0x3df   :  { %1864 = vrot.lane.b32.xlu0 %v3623_v62, %s2487_s23  ;;  %1813 = vrot.lane.b32.xlu1 %v3640_v47, %s2486_s2 }
 0x3e3   :  { %1872 = vrot.lane.b32.xlu0 %v3630_v52, %s2487_s23  ;;  %1866 = vrot.lane.b32.xlu1 %v3633_v60, %s2487_s23 }
 0x3e7   :  { %1925 = vrot.lane.b32.xlu0 %v3623_v62, %s2488_s24  ;;  %1874 = vrot.lane.b32.xlu1 %v3640_v47, %s2487_s23 }
 0x3eb   :  { %1933 = vrot.lane.b32.xlu0 %v3630_v52, %s2488_s24  ;;  %1927 = vrot.lane.b32.xlu1 %v3633_v60, %s2488_s24 }
 0x3ef   :  { %1482 = vrot.lane.b32.xlu0 %v3709_v2, %s2481_s4  ;;  %1935 = vrot.lane.b32.xlu1 %v3640_v47, %s2488_s24 }
 0x3f3   :  { %1490 = vrot.lane.b32.xlu0 %v3717_v54, %s2481_s4  ;;  %1484 = vrot.lane.b32.xlu1 %v3725_v23, %s2481_s4 }
 0x3f7   :  { %1534 = vrot.lane.b32.xlu0 %v3709_v2, %s2482_s19  ;;  %1492 = vrot.lane.b32.xlu1 %v3732_v20, %s2481_s4 }
 0x3fb   :  { %1542 = vrot.lane.b32.xlu0 %v3717_v54, %s2482_s19  ;;  %1536 = vrot.lane.b32.xlu1 %v3725_v23, %s2482_s19 }
 0x3ff   :  { %1595 = vrot.lane.b32.xlu0 %v3709_v2, %s2483_s20  ;;  %1544 = vrot.lane.b32.xlu1 %v3732_v20, %s2482_s19 }
 0x403   :  { %1603 = vrot.lane.b32.xlu0 %v3717_v54, %s2483_s20  ;;  %1597 = vrot.lane.b32.xlu1 %v3725_v23, %s2483_s20 }
 0x407   :  { %1656 = vrot.lane.b32.xlu0 %v3709_v2, %s2484_s21  ;;  %1605 = vrot.lane.b32.xlu1 %v3732_v20, %s2483_s20 }
 0x40b   :  { %1664 = vrot.lane.b32.xlu0 %v3717_v54, %s2484_s21  ;;  %1658 = vrot.lane.b32.xlu1 %v3725_v23, %s2484_s21 }
 0x40f   :  { %1746 = vrot.lane.b32.xlu0 %v3709_v2, %s2485_s22  ;;  %1666 = vrot.lane.b32.xlu1 %v3732_v20, %s2484_s21 }
 0x413   :  { %1754 = vrot.lane.b32.xlu0 %v3717_v54, %s2485_s22  ;;  %1748 = vrot.lane.b32.xlu1 %v3725_v23, %s2485_s22 }
 0x417   :  { %1807 = vrot.lane.b32.xlu0 %v3709_v2, %s2486_s2  ;;  %1756 = vrot.lane.b32.xlu1 %v3732_v20, %s2485_s22 }
 0x41b   :  { %1815 = vrot.lane.b32.xlu0 %v3717_v54, %s2486_s2  ;;  %1809 = vrot.lane.b32.xlu1 %v3725_v23, %s2486_s2 }
 0x41f   :  { %1868 = vrot.lane.b32.xlu0 %v3709_v2, %s2487_s23  ;;  %1817 = vrot.lane.b32.xlu1 %v3732_v20, %s2486_s2 }
 0x421   :  { %v3806_v21 = vpop.permute.xlu0 %1478 }
 0x423   :  { %1876 = vrot.lane.b32.xlu0 %v3717_v54, %s2487_s23  ;;  %1870 = vrot.lane.b32.xlu1 %v3725_v23, %s2487_s23 }
 0x425   :  { %v1487_v16 = vpop.permute.xlu0 %1486  ;;  %v3814_v40 = vpop.permute.xlu1 %1480 }
 0x427   :  { %1929 = vrot.lane.b32.xlu0 %v3709_v2, %s2488_s24  ;;  %1878 = vrot.lane.b32.xlu1 %v3732_v20, %s2487_s23 }
 0x429   :  { %v3820_v48 = vpop.permute.xlu0 %1530  ;;  %v3822_v22 = vpop.permute.xlu1 %1488 }
 0x42b   :  { %1937 = vrot.lane.b32.xlu0 %v3717_v54, %s2488_s24  ;;  %1931 = vrot.lane.b32.xlu1 %v3725_v23, %s2488_s24 }
 0x42d   :  { %v3831_v53 = vpop.permute.xlu0 %1538  ;;  %v3833_v18 = vpop.permute.xlu1 %1532 }
 0x42f   :  { %2006 = vperm.xlu0 %2437, %v2378_v17   ;;  %1939 = vrot.lane.b32.xlu1 %v3732_v20, %s2488_s24 }
 0x431   :  { %v3840_v32 = vpop.permute.xlu0 %1591  ;;  %v3845_v61 = vpop.permute.xlu1 %1540 }
 0x433   :  { %2040 = vperm.xlu0 %2437, %v2380_v44   ;;  %2011 = vperm.xlu1 %2438, %v2379_v19   ;;  %v2382_v44 = vld [vmem:[%s4356_s11 + $0x8] sm:$0xff] }
 0x435   :  { %v3850_v6 = vpop.permute.xlu0 %1599  ;;  %v3855_v17 = vpop.permute.xlu1 %1593 }
 0x437   :  { %2211 = vperm.xlu0 %2437, %v1237_v50   ;;  %2045 = vperm.xlu1 %2438, %v2381_v37  }
 0x439   :  { %v3857_v13 = vpop.permute.xlu0 %1652  ;;  %v3862_v36 = vpop.permute.xlu1 %1601 }
 0x43b   :  { %2220 = vperm.xlu1 %2438, %v2382_v44  }
 0x43d   :  { %v3864_v19 = vpop.permute.xlu0 %1660  ;;  %v3866_v14 = vpop.permute.xlu1 %1654 }
 0x441   :  { %v3868_v39 = vpop.permute.xlu0 %1742  ;;  %v3870_v43 = vpop.permute.xlu1 %1662 }
 0x445   :  { %v3872_v4 = vpop.permute.xlu0 %1750  ;;  %v3874_v50 = vpop.permute.xlu1 %1744 }
 0x446   :  { %4556 = vst [vmem:[#allocation35_spill] sm:$0xff] %v3874_v50 }
 0x449   :  { %v3876_v37 = vpop.permute.xlu0 %1803  ;;  %v3878_v11 = vpop.permute.xlu1 %1752 }
 0x44a   :  { %4557 = vst [vmem:[#allocation36_spill] sm:$0xff] %v3876_v37  ;;  %4558 = vst [vmem:[#allocation21_spill] sm:$0xff] %v3878_v11 }
 0x44d   :  { %v3880_v46 = vpop.permute.xlu0 %1811  ;;  %v3882_v41 = vpop.permute.xlu1 %1805 }
 0x44e   :  { %4559 = vst [vmem:[#allocation7_spill] sm:$0xff] %v3880_v46  ;;  %4560 = vst [vmem:[#allocation8_spill] sm:$0xff] %v3882_v41 }
 0x451   :  { %v3884_v44 = vpop.permute.xlu0 %1864  ;;  %v3886_v56 = vpop.permute.xlu1 %1813 }
 0x452   :  { %4561 = vst [vmem:[#allocation23_spill] sm:$0xff] %v3884_v44  ;;  %4562 = vst [vmem:[#allocation39_spill] sm:$0xff] %v3886_v56 }
 0x455   :  { %v3888_v10 = vpop.permute.xlu0 %1872  ;;  %v3890_v34 = vpop.permute.xlu1 %1866 }
 0x456   :  { %4563 = vst [vmem:[#allocation9_spill] sm:$0xff] %v3888_v10  ;;  %4564 = vst [vmem:[#allocation10_spill] sm:$0xff] %v3890_v34 }
 0x459   :  { %v3892_v35 = vpop.permute.xlu0 %1925  ;;  %v3894_v55 = vpop.permute.xlu1 %1874 }
 0x45a   :  { %4565 = vst [vmem:[#allocation25_spill] sm:$0xff] %v3892_v35  ;;  %4566 = vst [vmem:[#allocation27_spill] sm:$0xff] %v3894_v55 }
 0x45d   :  { %v3896_v50 = vpop.permute.xlu0 %1933  ;;  %v3898_v37 = vpop.permute.xlu1 %1927 }
 0x45e   :  { %4567 = vst [vmem:[#allocation26_spill] sm:$0xff] %v3896_v50  ;;  %4568 = vst [vmem:[#allocation24_spill] sm:$0xff] %v3898_v37  ;;  %v3913_v37 = vmul.f32 %v3746_v63, %v3623_v62  ;;  %v3928_v62 = vmul.f32 %v3746_v63, %v3630_v52  ;;  %v3945_v52 = vmul.f32 %v3758_v27, %v3640_v47 }
 0x45f   :  { %v3958_v47 = vmul.f32 %v3758_v27, %v3725_v23 }
 0x460   :  { %4570 = vst [vmem:[#allocation28_spill] sm:$0xff] %v3913_v37 }
 0x461   :  { %v1483_v15 = vpop.permute.xlu0 %1482  ;;  %v3900_v46 = vpop.permute.xlu1 %1935  ;;  %4574 = vst [vmem:[#allocation13_spill] sm:$0xff] %v3958_v47 }
 0x462   :  { %4569 = vst [vmem:[#allocation30_spill] sm:$0xff] %v3900_v46  ;;  %v1496_v44 = vsel %vm343_vm1, %v1483_v15, %v1487_v16  ;;  %v1498_v34 = vsel %vm343_vm1, %v3806_v21, %v1483_v15  ;;  %v4571_v46 = vld [vmem:[#allocation37_spill] sm:$0xff] }
 0x463   :  { %v1504_v35 = vmul.f32 %v1496_v44, %v3113_v8  ;;  %v1503_v55 = vmul.f32 %v1498_v34, %v4571_v46  ;;  %v3932_v34 = vmul.f32 %v3746_v63, %v3717_v54 }
 0x465   :  { %v1491_v41 = vpop.permute.xlu0 %1490  ;;  %v1485_v56 = vpop.permute.xlu1 %1484  ;;  %v1524_v37 = vmul.f32 %v3695_v57, %v1504_v35 }
 0x466   :  { %v1494_v11 = vsel %vm343_vm1, %v1487_v16, %v1491_v41  ;;  %v1497_v15 = vsel %vm343_vm1, %v1485_v56, %v3822_v22  ;;  %v3936_v16 = vmul.f32 %v3758_v27, %v3633_v60  ;;  %v1499_v23 = vsel %vm343_vm1, %v3814_v40, %v1485_v56 }
 0x467   :  { %v1505_v54 = vmul.f32 %v1494_v11, %v3121_v49  ;;  %v1508_v63 = vmul.f32 %v1497_v15, %v3113_v8  ;;  %v3962_v11 = vmul.f32 %v3758_v27, %v3732_v20  ;;  %v4576_v8 = vld [vmem:[#allocation40_spill] sm:$0xff] }
 0x468   :  { %4573 = vst [vmem:[#allocation11_spill] sm:$0xff] %v3936_v16 }
 0x469   :  { %v1535_v10 = vpop.permute.xlu0 %1534  ;;  %v1493_v38 = vpop.permute.xlu1 %1492  ;;  %4575 = vst [vmem:[#allocation14_spill] sm:$0xff] %v3962_v11 }
 0x46a   :  { %v1548_v50 = vsel %vm412_vm2, %v1535_v10, %v3831_v53  ;;  %v1550_v60 = vsel %vm412_vm2, %v3820_v48, %v1535_v10  ;;  %v1495_v10 = vsel %vm343_vm1, %v3822_v22, %v1493_v38  ;;  %v1525_v22 = vmul.f32 %v3695_v57, %v1505_v54  ;;  %v4578_v54 = vld [vmem:[#allocation42_spill] sm:$0xff] }
 0x46b   :  { %v1556_v44 = vmul.f32 %v1548_v50, %v3131_v42  ;;  %v1500_v50 = vsel %vm343_vm1, %v1491_v41, %v3806_v21  ;;  %v1523_v41 = vmul.f32 %v3695_v57, %v1503_v55  ;;  %v1501_v56 = vsel %vm343_vm1, %v1493_v38, %v3814_v40 }
 0x46c   :  { %v1502_v15 = vmul.f32 %v1500_v50, %v4576_v8  ;;  %v1507_v38 = vmul.f32 %v1499_v23, %v4571_v46 }
 0x46d   :  { %v1577_v2 = vmul.f32 %v3705_v33, %v1556_v44  ;;  %v1543_v5 = vpop.permute.xlu0 %1542  ;;  %v1537_v44 = vpop.permute.xlu1 %1536 }
 0x46e   :  { %v1546_v35 = vsel %vm412_vm2, %v3831_v53, %v1543_v5  ;;  %v1549_v55 = vsel %vm412_vm2, %v1537_v44, %v3845_v61  ;;  %v1552_v20 = vsel %vm412_vm2, %v1543_v5, %v3820_v48  ;;  %v1522_v46 = vmul.f32 %v3695_v57, %v1502_v15 }
 0x46f   :  { %v1585_v21 = vadd.f32 %v1577_v2, %v1524_v37  ;;  %v1557_v53 = vmul.f32 %v1546_v35, %v3140_v12  ;;  %v4577_v37 = vld [vmem:[#allocation41_spill] sm:$0xff]  ;;  %v1560_v27 = vmul.f32 %v1549_v55, %v3131_v42  ;;  %v1528_v35 = vmul.f32 %v3707_v30, %v1508_v63 }
 0x470   :  { %v1555_v2 = vmul.f32 %v1550_v60, %v4577_v37  ;;  %v1509_v60 = vmul.f32 %v1495_v10, %v3121_v49  ;;  %v1554_v55 = vmul.f32 %v1552_v20, %v4578_v54 }
 0x471   :  { %v1596_v50 = vpop.permute.xlu0 %1595  ;;  %v1578_v11 = vmul.f32 %v3705_v33, %v1557_v53  ;;  %v1581_v5 = vmul.f32 %v3723_v24, %v1560_v27  ;;  %v1545_v48 = vpop.permute.xlu1 %1544  ;;  %v1551_v53 = vsel %vm412_vm2, %v3833_v18, %v1537_v44  ;;  %v1506_v27 = vmul.f32 %v1501_v56, %v4576_v8 }
 0x472   :  { %v1609_v16 = vsel %vm490_vm3, %v1596_v50, %v3850_v6  ;;  %v1547_v47 = vsel %vm412_vm2, %v3845_v61, %v1545_v48  ;;  %v1576_v49 = vmul.f32 %v3705_v33, %v1555_v2  ;;  %v1559_v23 = vmul.f32 %v1551_v53, %v4577_v37 }
 0x473   :  { %v1617_v42 = vmul.f32 %v1609_v16, %v3146_v25  ;;  %v1586_v63 = vadd.f32 %v1578_v11, %v1525_v22  ;;  %v1589_v40 = vadd.f32 %v1581_v5, %v1528_v35  ;;  %v1611_v11 = vsel %vm490_vm3, %v3840_v32, %v1596_v50 }
 0x474   :  { %v1561_v44 = vmul.f32 %v1547_v47, %v3140_v12  ;;  %v1529_v8 = vmul.f32 %v3707_v30, %v1509_v60  ;;  %v1575_v35 = vmul.f32 %v3705_v33, %v1554_v55  ;;  %v1616_v57 = vmul.f32 %v1611_v11, %v3143_v26 }
 0x475   :  { %v1638_v10 = vmul.f32 %v3721_v9, %v1617_v42  ;;  %v1604_v16 = vpop.permute.xlu0 %1603  ;;  %v1598_v22 = vpop.permute.xlu1 %1597  ;;  %v1584_v37 = vadd.f32 %v1576_v49, %v1523_v41  ;;  %v1526_v56 = vmul.f32 %v3707_v30, %v1506_v27  ;;  %v1580_v5 = vmul.f32 %v3723_v24, %v1559_v23 }
 0x476   :  { %v1607_v61 = vsel %vm490_vm3, %v3850_v6, %v1604_v16  ;;  %v1582_v50 = vmul.f32 %v3723_v24, %v1561_v44  ;;  %v1610_v12 = vsel %vm490_vm3, %v1598_v22, %v3862_v36  ;;  %v1527_v6 = vmul.f32 %v3707_v30, %v1507_v38 }
 0x477   :  { %v1646_v2 = vadd.f32 %v1638_v10, %v1585_v21  ;;  %v1618_v20 = vmul.f32 %v1607_v61, %v3162_v0  ;;  %v1621_v21 = vmul.f32 %v1610_v12, %v3146_v25  ;;  %v1553_v42 = vsel %vm412_vm2, %v1545_v48, %v3833_v18 }
 0x478   :  { %v1590_v60 = vadd.f32 %v1582_v50, %v1529_v8  ;;  %v1583_v25 = vadd.f32 %v1575_v35, %v1522_v46  ;;  %v1613_v30 = vsel %vm490_vm3, %v1604_v16, %v3840_v32  ;;  %v1637_v10 = vmul.f32 %v3721_v9, %v1616_v57 }
 0x479   :  { %v1639_v47 = vmul.f32 %v3721_v9, %v1618_v20  ;;  %v1657_v15 = vpop.permute.xlu0 %1656  ;;  %v1642_v53 = vmul.f32 %v3738_v45, %v1621_v21  ;;  %v1606_v38 = vpop.permute.xlu1 %1605  ;;  %v1558_v11 = vmul.f32 %v1553_v42, %v4578_v54  ;;  %v1612_v44 = vsel %vm490_vm3, %v3855_v17, %v1598_v22 }
 0x47a   :  { %v1670_v33 = vsel %vm568_vm4, %v1657_v15, %v3864_v19  ;;  %v1608_v49 = vsel %vm490_vm3, %v3862_v36, %v1606_v38  ;;  %v1672_v18 = vsel %vm568_vm4, %v3857_v13, %v1657_v15  ;;  %v1588_v46 = vadd.f32 %v1580_v5, %v1527_v6 }
 0x47b   :  { %v1647_v55 = vadd.f32 %v1639_v47, %v1586_v63  ;;  %v1678_v41 = vmul.f32 %v1670_v33, %v3168_v3  ;;  %v1650_v27 = vadd.f32 %v1642_v53, %v1589_v40  ;;  %v1622_v48 = vmul.f32 %v1608_v49, %v3162_v0 }
 0x47c   :  { %v1615_v40 = vmul.f32 %v1613_v30, %v3156_v28  ;;  %v1677_v23 = vmul.f32 %v1672_v18, %v3165_v59  ;;  %v1579_v12 = vmul.f32 %v3723_v24, %v1558_v11  ;;  %v1620_v6 = vmul.f32 %v1612_v44, %v3143_v26  ;;  %v4579_v18 = vld [vmem:[#allocation45_spill] sm:$0xff]  ;;  %v4580_v11 = vld [vmem:[#allocation32_spill] sm:$0xff] }
 0x47d   :  { %v1665_v63 = vpop.permute.xlu0 %1664  ;;  %v1699_v32 = vmul.f32 %v3736_v7, %v1678_v41  ;;  %v1643_v0 = vmul.f32 %v3738_v45, %v1622_v48  ;;  %v1659_v61 = vpop.permute.xlu1 %1658  ;;  %v1645_v47 = vadd.f32 %v1637_v10, %v1584_v37 }
 0x47e   :  { %v1668_v16 = vsel %vm568_vm4, %v3864_v19, %v1665_v63  ;;  %v1674_v36 = vsel %vm568_vm4, %v1665_v63, %v3857_v13  ;;  %v1671_v19 = vsel %vm568_vm4, %v1659_v61, %v3870_v43  ;;  %v1614_v13 = vsel %vm490_vm3, %v1606_v38, %v3855_v17 }
 0x47f   :  { %v1679_v54 = vmul.f32 %v1668_v16, %v3174_v51  ;;  %v1707_v20 = vadd.f32 %v1699_v32, %v1646_v2  ;;  %v1651_v8 = vadd.f32 %v1643_v0, %v1590_v60  ;;  %v1676_v22 = vmul.f32 %v1674_v36, %v3171_v29  ;;  %v4582_v36 = vld [vmem:[#allocation7_spill] sm:$0xff] }
 0x480   :  { %v1673_v2 = vsel %vm568_vm4, %v3866_v14, %v1659_v61  ;;  %v1682_v57 = vmul.f32 %v1671_v19, %v3168_v3  ;;  %v1636_v21 = vmul.f32 %v3721_v9, %v1615_v40  ;;  %v1698_v33 = vmul.f32 %v3736_v7, %v1677_v23  ;;  %v4584_v23 = vld [vmem:[#allocation12_spill] sm:$0xff] }
 0x481   :  { %v1700_v35 = vmul.f32 %v3736_v7, %v1679_v54  ;;  %v1747_v50 = vpop.permute.xlu0 %1746  ;;  %v1667_v60 = vpop.permute.xlu1 %1666  ;;  %v1619_v24 = vmul.f32 %v1614_v13, %v3156_v28  ;;  %v1697_v3 = vmul.f32 %v3736_v7, %v1676_v22  ;;  %v1681_v9 = vmul.f32 %v1673_v2, %v3165_v59  ;;  %v4585_v13 = vld [vmem:[#allocation48_spill] sm:$0xff] }
 0x482   :  { %v1760_v15 = vsel %vm675_vm5, %v1747_v50, %v3872_v4  ;;  %v1703_v26 = vmul.f32 %v3748_v58, %v1682_v57  ;;  %v1669_v5 = vsel %vm568_vm4, %v3870_v43, %v1667_v60  ;;  %v1675_v37 = vsel %vm568_vm4, %v1667_v60, %v3866_v14 }
 0x483   :  { %v1708_v17 = vadd.f32 %v1700_v35, %v1647_v55  ;;  %v1683_v42 = vmul.f32 %v1669_v5, %v3174_v51  ;;  %v1587_v53 = vadd.f32 %v1579_v12, %v1526_v56  ;;  %v1641_v28 = vmul.f32 %v3738_v45, %v1620_v6  ;;  %v4586_v12 = vld [vmem:[#allocation28_spill] sm:$0xff] }
 0x484   :  { %v1711_v38 = vadd.f32 %v1703_v26, %v1650_v27  ;;  %v1767_v30 = vmul.f32 %v1760_v15, %v4499_v1  ;;  %v1644_v41 = vadd.f32 %v1636_v21, %v1583_v25  ;;  %v1680_v43 = vmul.f32 %v1675_v37, %v3171_v29  ;;  %v4588_v21 = vld [vmem:[#allocation33_spill] sm:$0xff]  ;;  %v4591_v37 = vld [vmem:[#allocation36_spill] sm:$0xff] }
 0x485   :  { %v1755_v55 = vpop.permute.xlu0 %1754  ;;  %v1704_v7 = vmul.f32 %v3748_v58, %v1683_v42  ;;  %v1736_v59 = vadd.f32 %v3928_v62, %v1707_v20  ;;  %v1749_v49 = vpop.permute.xlu1 %1748  ;;  %v1706_v10 = vadd.f32 %v1698_v33, %v1645_v47  ;;  %v1640_v14 = vmul.f32 %v3738_v45, %v1619_v24  ;;  %v4581_v45 = vld [vmem:[#allocation21_spill] sm:$0xff]  ;;  %v4587_v47 = vld [vmem:[#allocation46_spill] sm:$0xff]  ;;  %v4589_v24 = vld [vmem:[#allocation35_spill] sm:$0xff] }
 0x486   :  { %v1762_v51 = vsel %vm675_vm5, %v3868_v39, %v1747_v50  ;;  %v1758_v56 = vsel %vm675_vm5, %v3872_v4, %v1755_v55  ;;  %v1705_v27 = vadd.f32 %v1697_v3, %v1644_v41  ;;  %v1702_v25 = vmul.f32 %v3748_v58, %v1681_v9  ;;  %v4583_v4 = vld [vmem:[#allocation43_spill] sm:$0xff]  ;;  %v4590_v3 = vld [vmem:[#allocation16_spill] sm:$0xff] }
 0x487   :  { %v4102_v29 = vadd.f32 %v1704_v7, %v1651_v8  ;;  %v1768_v48 = vmul.f32 %v1758_v56, %v4579_v18  ;;  %v1649_v63 = vadd.f32 %v1641_v28, %v1588_v46  ;;  %v1788_v32 = vmul.f32 %v4580_v11, %v1767_v30  ;;  %v4592_v30 = vld [vmem:[#allocation49_spill] sm:$0xff] }
 0x488   :  { %v1761_v16 = vsel %vm675_vm5, %v1749_v49, %v4581_v45  ;;  %v1766_v44 = vmul.f32 %v1762_v51, %v4583_v4  ;;  %v1701_v0 = vmul.f32 %v3748_v58, %v1680_v43  ;;  %v1764_v54 = vsel %vm675_vm5, %v1755_v55, %v3868_v39  ;;  %v4593_v43 = vld [vmem:[#allocation39_spill] sm:$0xff] }
 0x489   :  { %v1808_v62 = vpop.permute.xlu0 %1807  ;;  %v1789_v61 = vmul.f32 %v4580_v11, %v1768_v48  ;;  %v1757_v46 = vpop.permute.xlu1 %1756  ;;  %v1735_v20 = vadd.f32 %v4584_v23, %v1706_v10  ;;  %v1771_v19 = vmul.f32 %v1761_v16, %v4499_v1  ;;  %v1740_v22 = vadd.f32 %v3945_v52, %v1711_v38  ;;  %v4594_v10 = vld [vmem:[#allocation13_spill] sm:$0xff] }
 0x48a   :  { %v1821_v40 = vsel %vm753_vm6, %v1808_v62, %v4582_v36  ;;  %v1648_v35 = vadd.f32 %v1640_v14, %v1587_v53  ;;  %v1710_v50 = vadd.f32 %v1702_v25, %v1649_v63  ;;  %v1734_v6 = vadd.f32 %v4586_v12, %v1705_v27  ;;  %v4596_v63 = vld [vmem:[#allocation11_spill] sm:$0xff] }
 0x48b   :  { %v1828_v8 = vmul.f32 %v1821_v40, %v4585_v13  ;;  %v1797_v58 = vadd.f32 %v1789_v61, %v1736_v59  ;;  %v1796_v57 = vadd.f32 %v1788_v32, %v1735_v20  ;;  %v1769_v39 = vmul.f32 %v1764_v54, %v4587_v47  ;;  %v4598_v40 = vld [vmem:[#allocation50_spill] sm:$0xff]  ;;  %v4600_v20 = vld [vmem:[#allocation8_spill] sm:$0xff] }
 0x48c   :  { %v1759_v60 = vsel %vm675_vm5, %v4581_v45, %v1757_v46  ;;  %v1787_v1 = vmul.f32 %v4580_v11, %v1766_v44  ;;  %v1709_v33 = vadd.f32 %v1701_v0, %v1648_v35  ;;  %v1763_v52 = vsel %vm675_vm5, %v4589_v24, %v1749_v49  ;;  %v4597_v45 = vld [vmem:[#allocation9_spill] sm:$0xff]  ;;  %v4599_v0 = vld [vmem:[#allocation18_spill] sm:$0xff] }
 0x48d   :  { %v1816_v2 = vpop.permute.xlu0 %1815  ;;  %v1849_v15 = vmul.f32 %v4588_v21, %v1828_v8  ;;  %v1772_v26 = vmul.f32 %v1759_v60, %v4579_v18  ;;  %v1810_v5 = vpop.permute.xlu1 %1809  ;;  %v1792_v9 = vmul.f32 %v4590_v3, %v1771_v19  ;;  %v1823_v42 = vsel %vm753_vm6, %v4591_v37, %v1808_v62 }
 0x48e   :  { %v1819_v53 = vsel %vm753_vm6, %v4582_v36, %v1816_v2  ;;  %v1737_v28 = vadd.f32 %v3932_v34, %v1708_v17  ;;  %v1822_v7 = vsel %vm753_vm6, %v1810_v5, %v4593_v43  ;;  %v1790_v49 = vmul.f32 %v4580_v11, %v1769_v39  ;;  %v4595_v34 = vld [vmem:[#allocation47_spill] sm:$0xff]  ;;  %v4603_v39 = vld [vmem:[#allocation34_spill] sm:$0xff] }
 0x48f   :  { %v1857_v55 = vadd.f32 %v1849_v15, %v1796_v57  ;;  %v1793_v38 = vmul.f32 %v4590_v3, %v1772_v26  ;;  %v1829_v41 = vmul.f32 %v1819_v53, %v4592_v30  ;;  %v1739_v14 = vadd.f32 %v4594_v10, %v1710_v50  ;;  %v4606_v53 = vld [vmem:[#allocation27_spill] sm:$0xff] }
 0x490   :  { %v1770_v51 = vmul.f32 %v1763_v52, %v4583_v4  ;;  %v1825_v56 = vsel %vm753_vm6, %v1816_v2, %v4591_v37  ;;  %v1827_v17 = vmul.f32 %v1823_v42, %v4595_v34  ;;  %v1832_v18 = vmul.f32 %v1822_v7, %v4585_v13  ;;  %v4601_v13 = vld [vmem:[#allocation52_spill] sm:$0xff]  ;;  %v4602_v2 = vld [vmem:[#allocation23_spill] sm:$0xff]  ;;  %v4604_v52 = vld [vmem:[#allocation53_spill] sm:$0xff] }
 0x491   :  { %v1869_v59 = vpop.permute.xlu0 %1868  ;;  %v1801_v27 = vadd.f32 %v1793_v38, %v1740_v22  ;;  %v1850_v25 = vmul.f32 %v4588_v21, %v1829_v41  ;;  %v1818_v48 = vpop.permute.xlu1 %1817  ;;  %v1795_v62 = vadd.f32 %v1787_v1, %v1734_v6  ;;  %v4156_v32 = vadd.f32 %v4596_v63, %v1709_v33  ;;  %v4607_v38 = vld [vmem:[#allocation51_spill] sm:$0xff] }
 0x492   :  { %v1800_v11 = vadd.f32 %v1792_v9, %v1739_v14  ;;  %v1882_v16 = vsel %vm831_vm7, %v1869_v59, %v4597_v45  ;;  %v1765_v36 = vsel %vm675_vm5, %v1757_v46, %v4589_v24  ;;  %v1830_v4 = vmul.f32 %v1825_v56, %v4598_v40  ;;  %v4609_v56 = vld [vmem:[#allocation54_spill] sm:$0xff] }
 0x493   :  { %v1858_v44 = vadd.f32 %v1850_v25, %v1797_v58  ;;  %v1853_v54 = vmul.f32 %v4599_v0, %v1832_v18  ;;  %v1798_v23 = vadd.f32 %v1790_v49, %v1737_v28  ;;  %v1824_v19 = vsel %vm753_vm6, %v4600_v20, %v1810_v5  ;;  %v4608_v49 = vld [vmem:[#allocation26_spill] sm:$0xff]  ;;  %v4610_v25 = vld [vmem:[#allocation17_spill] sm:$0xff] }
 0x494   :  { %v1889_v8 = vmul.f32 %v1882_v16, %v4601_v13  ;;  %v1820_v22 = vsel %vm753_vm6, %v4593_v43, %v1818_v48  ;;  %v4174_v35 = vmul.f32 %v4590_v3, %v1770_v51  ;;  %v1848_v46 = vmul.f32 %v4588_v21, %v1827_v17 }
 0x495   :  { %v1877_v61 = vpop.permute.xlu0 %1876  ;;  %v1861_v50 = vadd.f32 %v1853_v54, %v1800_v11  ;;  %v1833_v12 = vmul.f32 %v1820_v22, %v4592_v30  ;;  %v1871_v6 = vpop.permute.xlu1 %1870  ;;  %v1773_v58 = vmul.f32 %v1765_v36, %v4587_v47  ;;  %v1884_v57 = vsel %vm831_vm7, %v4602_v2, %v1869_v59  ;;  %v4605_v47 = vld [vmem:[#allocation14_spill] sm:$0xff] }
 0x496   :  { %v1910_v15 = vmul.f32 %v4603_v39, %v1889_v8  ;;  %v1880_v60 = vsel %vm831_vm7, %v4597_v45, %v1877_v61  ;;  %v1851_v1 = vmul.f32 %v4588_v21, %v1830_v4  ;;  %v1831_v33 = vmul.f32 %v1824_v19, %v4595_v34  ;;  %v4612_v36 = vld [vmem:[#allocation10_spill] sm:$0xff] }
 0x497   :  { %v1854_v24 = vmul.f32 %v4599_v0, %v1833_v12  ;;  %v1890_v26 = vmul.f32 %v1880_v60, %v4604_v52  ;;  %v4192_v9 = vadd.f32 %v4605_v47, %v4102_v29  ;;  %v1886_v42 = vsel %vm831_vm7, %v1877_v61, %v4602_v2  ;;  %v2454_v2 = vld [vmem:[%s4346_s1 + $0x38] ss:$0 sm:$0xff] }
 0x498   :  { %v1918_v37 = vadd.f32 %v1910_v15, %v1857_v55  ;;  %v1883_v21 = vsel %vm831_vm7, %v1871_v6, %v4606_v53  ;;  %v1856_v28 = vadd.f32 %v1848_v46, %v1795_v62  ;;  %v1888_v30 = vmul.f32 %v1884_v57, %v4607_v38  ;;  %v4614_v15 = vld [vmem:[#allocation30_spill] sm:$0xff] }
 0x499   :  { %v1930_v5 = vpop.permute.xlu0 %1929  ;;  %v1862_v41 = vadd.f32 %v1854_v24, %v1801_v27  ;;  %v1911_v43 = vmul.f32 %v4603_v39, %v1890_v26  ;;  %v1879_v7 = vpop.permute.xlu1 %1878  ;;  %v1794_v59 = vmul.f32 %v4590_v3, %v1773_v58  ;;  %v1826_v29 = vsel %vm753_vm6, %v1818_v48, %v4600_v20  ;;  %v4611_v3 = vld [vmem:[#allocation25_spill] sm:$0xff]  ;;  %v2451_v48 = vld [vmem:[%s4346_s1 + $0x28] ss:$0 sm:$0xff] }
 0x49a   :  { %v1893_v55 = vmul.f32 %v1883_v21, %v4601_v13  ;;  %v1943_v10 = vsel %vm909_vm8, %v1930_v5, %v4608_v49  ;;  %v1859_v14 = vadd.f32 %v1851_v1, %v1798_v23  ;;  %v1852_v51 = vmul.f32 %v4599_v0, %v1831_v33  ;;  %v4613_v23 = vld [vmem:[#allocation19_spill] sm:$0xff] }
 0x49b   :  { %v1891_v34 = vmul.f32 %v1886_v42, %v4609_v56  ;;  %v1919_v17 = vadd.f32 %v1911_v43, %v1858_v44  ;;  %v1945_v62 = vsel %vm909_vm8, %v4611_v3, %v1930_v5  ;;  %v1950_v63 = vmul.f32 %v2451_v48, %v1943_v10 }
 0x49c   :  { %v1914_v18 = vmul.f32 %v4610_v25, %v1893_v55  ;;  %v1881_v11 = vsel %vm831_vm7, %v4606_v53, %v1879_v7  ;;  %v1909_v45 = vmul.f32 %v4603_v39, %v1888_v30  ;;  %v1834_v16 = vmul.f32 %v1826_v29, %v4598_v40  ;;  %v2452_v40 = vld [vmem:[%s4346_s1 + $0x20] ss:$0 sm:$0xff] }
 0x49d   :  { %v1938_v27 = vpop.permute.xlu0 %1937  ;;  %v1885_v4 = vsel %vm831_vm7, %v4612_v36, %v1871_v6  ;;  %v1894_v44 = vmul.f32 %v1881_v11, %v4604_v52  ;;  %v1932_v54 = vpop.permute.xlu1 %1931  ;;  %v1971_v20 = vmul.f32 %v4613_v23, %v1950_v63  ;;  %v1949_v8 = vmul.f32 %v2452_v40, %v1945_v62  ;;  %v4615_v52 = vld [vmem:[#allocation24_spill] sm:$0xff] }
 0x49e   :  { %v1922_v61 = vadd.f32 %v1914_v18, %v1861_v50  ;;  %v1941_v19 = vsel %vm909_vm8, %v4608_v49, %v1938_v27  ;;  %v1947_v13 = vsel %vm909_vm8, %v1938_v27, %v4611_v3  ;;  %v1887_v22 = vsel %vm831_vm7, %v1879_v7, %v4612_v36  ;;  %v2453_v50 = vld [vmem:[%s4346_s1 + $0x30] ss:$0 sm:$0xff]  ;;  %v4616_v7 = vld [vmem:[#allocation22_spill] sm:$0xff] }
 0x49f   :  { %v1915_v46 = vmul.f32 %v4610_v25, %v1894_v44  ;;  %v1951_v12 = vmul.f32 %v2453_v50, %v1941_v19  ;;  %v1912_v6 = vmul.f32 %v4603_v39, %v1891_v34  ;;  %v1979_v58 = vadd.f32 %v1971_v20, %v1918_v37 }
 0x4a0   :  { %v1952_v57 = vmul.f32 %v2454_v2, %v1947_v13  ;;  %v1944_v60 = vsel %vm909_vm8, %v1932_v54, %v4614_v15  ;;  %v1892_v1 = vmul.f32 %v1885_v4, %v4607_v38  ;;  %v1946_v26 = vsel %vm909_vm8, %v4615_v52, %v1932_v54 }
 0x4a1   :  { %v1923_v33 = vadd.f32 %v1915_v46, %v1862_v41  ;;  %v1972_v24 = vmul.f32 %v4613_v23, %v1951_v12  ;;  %v1940_v39 = vpop.permute.xlu1 %1939  ;;  %v1895_v5 = vmul.f32 %v1887_v22, %v4609_v56  ;;  %v1954_v47 = vmul.f32 %v2451_v48, %v1944_v60 }
 0x4a2   :  { %v1942_v37 = vsel %vm909_vm8, %v4614_v15, %v1940_v39  ;;  %v1948_v42 = vsel %vm909_vm8, %v1940_v39, %v4615_v52  ;;  %v1970_v53 = vmul.f32 %v4613_v23, %v1949_v8  ;;  %v1973_v21 = vmul.f32 %v4613_v23, %v1952_v57  ;;  %v4618_v23 = vld [vmem:[#allocation20_spill] sm:$0xff] }
 0x4a3   :  { %v1980_v38 = vadd.f32 %v1972_v24, %v1919_v17  ;;  %v1955_v30 = vmul.f32 %v2453_v50, %v1942_v37  ;;  %v1855_v41 = vmul.f32 %v4599_v0, %v1834_v16  ;;  %v1953_v43 = vmul.f32 %v2452_v40, %v1946_v26 }
 0x4a4   :  { %v1975_v29 = vmul.f32 %v4616_v7, %v1954_v47  ;;  %v1956_v55 = vmul.f32 %v2454_v2, %v1948_v42  ;;  %v1799_v49 = vadd.f32 %v4174_v35, %v4156_v32  ;;  %v1917_v10 = vadd.f32 %v1909_v45, %v1856_v28 }
 0x4a5   :  { %v1920_v56 = vadd.f32 %v1912_v6, %v1859_v14  ;;  %v1976_v31 = vmul.f32 %v4616_v7, %v1955_v30  ;;  %v1802_v34 = vadd.f32 %v1794_v59, %v4192_v9  ;;  %v1913_v27 = vmul.f32 %v4610_v25, %v1892_v1  ;;  %v4617_v14 = vld [vmem:[#allocation38_spill] sm:$0xff] }
 0x4a6   :  { %v1916_v17 = vmul.f32 %v4610_v25, %v1895_v5  ;;  %v1983_v18 = vadd.f32 %v1975_v29, %v1922_v61  ;;  %v1978_v3 = vadd.f32 %v1970_v53, %v1917_v10  ;;  %v1860_v48 = vadd.f32 %v1852_v51, %v1799_v49 }
 0x4a7   :  { %v1981_v0 = vadd.f32 %v1973_v21, %v1920_v56  ;;  %v1984_v62 = vadd.f32 %v1976_v31, %v1923_v33  ;;  %v1863_v63 = vadd.f32 %v1855_v41, %v1802_v34  ;;  %v1974_v11 = vmul.f32 %v4616_v7, %v1953_v43 }
 0x4a8   :  { %v1977_v32 = vmul.f32 %v4616_v7, %v1956_v55  ;;  %v1921_v35 = vadd.f32 %v1913_v27, %v1860_v48  ;;  %v1996_v45 = vmul.f32 %v4617_v14, %v1978_v3  ;;  %v1998_v9 = vmul.f32 %v4617_v14, %v1980_v38 }
 0x4a9   :  { %v1924_v28 = vadd.f32 %v1916_v17, %v1863_v63  ;;  %v1999_v59 = vmul.f32 %v4617_v14, %v1981_v0  ;;  %v1997_v25 = vmul.f32 %v4617_v14, %v1979_v58  ;;  %v2002_v19 = vmul.f32 %v4618_v23, %v1984_v62 }
 0x4aa   :  { %v1982_v16 = vadd.f32 %v1974_v11, %v1921_v35  ;;  %v2001_v40 = vmul.f32 %v4618_v23, %v1983_v18  ;;  %v1219_v11 = vld [vmem:[%s4355_s10] sm:$0xff] }
 0x4ab   :  { %v1985_v36 = vadd.f32 %v1977_v32, %v1924_v28 }
 0x4ac   :  { %v2000_v20 = vmul.f32 %v4618_v23, %v1982_v16 }
 0x4ad   :  { %v2003_v13 = vmul.f32 %v4618_v23, %v1985_v36 }
 0x4ae   :  { %v2007_v4 = vpop.permute.xlu0 %2006 }
 0x4af   :  { %v2014_v44 = vadd.f32 %v2007_v4, %v1996_v45  ;;  %v2015_v51 = vadd.f32 %v2007_v4, %v1997_v25  ;;  %v2016_v54 = vadd.f32 %v2007_v4, %v1998_v9  ;;  %v2017_v61 = vadd.f32 %v2007_v4, %v1999_v59 }
 0x4b1   :  { %v2030_v8 = vmin.f32 %v2014_v44, 0.0  ;;  %v2032_v22 = vmin.f32 %v2016_v54, 0.0  ;;  %v2033_v46 = vmin.f32 %v2017_v61, 0.0  ;;  %v2031_v50 = vmin.f32 %v2015_v51, 0.0 }
 0x4b2   :  { %v2041_v12 = vpop.permute.xlu0 %2040  ;;  %v2012_v6 = vpop.permute.xlu1 %2011  ;;  %v2022_v60 = vmax.f32 %v2014_v44, 0.0  ;;  %v2023_v1 = vmax.f32 %v2015_v51, 0.0  ;;  %v2024_v33 = vmax.f32 %v2016_v54, 0.0  ;;  %v2025_v24 = vmax.f32 %v2017_v61, 0.0 }
 0x4b3   :  { %v2018_v58 = vadd.f32 %v2012_v6, %v2000_v20  ;;  %v2019_v2 = vadd.f32 %v2012_v6, %v2001_v40  ;;  %v2020_v57 = vadd.f32 %v2012_v6, %v2002_v19  ;;  %v2021_v15 = vadd.f32 %v2012_v6, %v2003_v13  ;;  %v2227_v20 = vld [vmem:[%s4357_s12] sm:$0xff] }
 0x4b4   :  { %v2048_v52 = vmul.f32 %v2041_v12, %v2030_v8  ;;  %v2049_v26 = vmul.f32 %v2041_v12, %v2031_v50  ;;  %v2050_v39 = vmul.f32 %v2041_v12, %v2032_v22  ;;  %v2051_v5 = vmul.f32 %v2041_v12, %v2033_v46 }
 0x4b5   :  { %v2034_v47 = vmin.f32 %v2018_v58, 0.0  ;;  %v2036_v37 = vmin.f32 %v2020_v57, 0.0  ;;  %v2037_v42 = vmin.f32 %v2021_v15, 0.0  ;;  %v2035_v21 = vmin.f32 %v2019_v2, 0.0 }
 0x4b6   :  { %v2046_v53 = vpop.permute.xlu1 %2045  ;;  %v2026_v38 = vmax.f32 %v2018_v58, 0.0  ;;  %v2027_v30 = vmax.f32 %v2019_v2, 0.0  ;;  %v2028_v41 = vmax.f32 %v2020_v57, 0.0  ;;  %v2029_v43 = vmax.f32 %v2021_v15, 0.0  ;;  %v2212_v32 = vpop.permute.xlu0 %2211 }
 0x4b7   :  { %v2052_v7 = vmul.f32 %v2046_v53, %v2034_v47  ;;  %v2053_v29 = vmul.f32 %v2046_v53, %v2035_v21  ;;  %v2054_v55 = vmul.f32 %v2046_v53, %v2036_v37  ;;  %v2055_v49 = vmul.f32 %v2046_v53, %v2037_v42  ;;  %v2406_v47 = vld [vmem:[%s4358_s13 + $0x1] sm:$0x1] }
 0x4b8   :  { %v2056_v10 = vadd.f32 %v2048_v52, %v2022_v60  ;;  %v2058_v56 = vadd.f32 %v2050_v39, %v2024_v33  ;;  %v2057_v31 = vadd.f32 %v2049_v26, %v2023_v1  ;;  %v2059_v34 = vadd.f32 %v2051_v5, %v2025_v24  ;;  %v2230_v26 = vld [vmem:[%s4358_s13] sm:$0x1] }
 0x4b9   :  { %v2060_v27 = vadd.f32 %v2052_v7, %v2026_v38  ;;  %v2062_v17 = vadd.f32 %v2054_v55, %v2028_v41  ;;  %v2061_v18 = vadd.f32 %v2053_v29, %v2027_v30  ;;  %v2063_v3 = vadd.f32 %v2055_v49, %v2029_v43  ;;  %v2405_v41 = vld [vmem:[%s4357_s12 + $0x8] sm:$0xff]  ;;  %v4619_v43 = vld [vmem:[#allocation29_spill] sm:$0xff]  ;;  %s2489_s12 = smov [#allocation2]  }
 0x4ba   :  { %v2221_v25 = vpop.permute.xlu1 %2220 }
 0x4bb   :  { %v2418_v0 = vpack.c.bf16 %v2061_v18, %v2057_v31  ;;  %v2422_v62 = vpack.c.bf16 %v2063_v3, %v2059_v34  ;;  %v2420_v48 = vpack.c.bf16 %v2060_v27, %v2056_v10  ;;  %v2424_v63 = vpack.c.bf16 %v2062_v17, %v2058_v56  ;;  %v2233_v31 = vld [vmem:[%s4359_s14] sm:$0xff]  ;;  %v2407_v34 = vld [vmem:[%s4359_s14 + $0x8] sm:$0xff]  ;;  %s2327_s14 = sshll.u32 %s2489_s12, 4  ;;  %s2328_s14 = int_to_ptr.vmem [resolvable:$true] %s2327_s14 }
 0x4bc   :  { %s2455_s2 = scalar_lea.vmem %s2328_s14, 512  ;;  %p2460_p1 = scmp.lt.s32.totalorder %s2328_s14, %s2328_s14 }
 0x4bd   :  { %2419 = vmatprep.subr.bf16.mxu0 %v2418_v0  ;;  %2423 = vmatprep.subr.bf16.mxu1 %v2422_v62  ;;  %p2456_p0 = scmp.ne.s32.totalorder %s2328_s14, %s2455_s2  ;;  %p2461_p2 = scmp.lt.s32.totalorder %s2455_s2, %s2455_s2 }
 0x4be   :  { %2421 = vmatpush1.bf16.msra.mxu0 %v2420_v48  ;;  %2425 = vmatpush1.bf16.msra.mxu1 %v2424_v63 }
 0x4bf   :  { %p2462_p3 = por %p2461_p2, %p2460_p1 }
 0x4c1   :  { %2403 = vmatmul.mubr.msk.f32.vlgmr.msra.gmra.mrb[10].mxu0 %vm1049_vm9, %v1219_v11  ;;  %2404 = vmatmul.mubr.msk.f32.vlgmr.msra.gmra.mrb[10].mxu1 %vm1049_vm9, %v1219_v11  ;;  %p2463_p4 = pnand %p2462_p3, %p2456_p0 }
 0x594   :  { %v2133_v35 = vpop.f32.mrb[10].mxu0  ;;  %v2204_v28 = vpop.f32.mrb[10].mxu1 }
 0x595   :  { %v2214_v14 = vmul.f32 %v2212_v32, %v2133_v35  ;;  %v2216_v45 = vmul.f32 %v2212_v32, %v2204_v28  ;;  %v2135_v9 = vpop.f32.mrb[11].mxu0  ;;  %v2206_v59 = vpop.f32.mrb[11].mxu1 }
 0x596   :  { %v2215_v16 = vmul.f32 %v2212_v32, %v2135_v9  ;;  %v2217_v36 = vmul.f32 %v2212_v32, %v2206_v59 }
 0x597   :  { %v4289_v4 = vadd.f32 %v2221_v25, %v2214_v14  ;;  %v4291_v44 = vadd.f32 %v2221_v25, %v2216_v45 }
 0x598   :  { %v4293_v51 = vadd.f32 %v2221_v25, %v2215_v16  ;;  %v4295_v54 = vadd.f32 %v2221_v25, %v2217_v36  ;;  %v4620_v16 = vld [vmem:[#allocation6_spill] sm:$0xff] }
 0x59a   :  { %v2275_v61 = vadd.f32 %v4295_v54, %v4291_v44  ;;  %v2236_v23 = vadd.f32 %v4293_v51, %v4289_v4 }
 0x59c   :  { %2276 = vadd.xlane.f32.xlu1 %v2275_v61  ;;  %2237 = vadd.xlane.f32.xlu0 %v2236_v23  ;;  %v4621_v61 = vld [vmem:[#allocation44_spill] sm:$0xff] }
 0x629   :  { %v2277_v19 = vpop.xlane.xlu1 %2276  ;;  %v2238_v13 = vpop.xlane.xlu0 %2237 }
 0x62a   :  { %v2278_v40 = vmul.f32 0.00390625, %v2277_v19  ;;  %v2239_v8 = vmul.f32 0.00390625, %v2238_v13 }
 0x62c   :  { %v2279_v22 = vmul.f32 %v2278_v40, %v2227_v20  ;;  %v2240_v46 = vmul.f32 %v2239_v8, %v2227_v20  ;;  %v4622_v40 = vld [vmem:[#allocation31_spill] sm:$0xff] }
 0x62e   :  { %v2280_v50 = vsel %vm2241_vm10, %v2279_v22, 0.0  ;;  %v2242_v12 = vsel %vm2241_vm10, %v2240_v46, 0.0  ;;  %v4623_v22 = vld [vmem:[#allocation5_spill] sm:$0xff] }
 0x62f   :  { %v2281_v6 = vrot.slane %v2280_v50, 4  ;;  %v2243_v58 = vrot.slane %v2242_v12, 4 }
 0x631   :  { %v2282_v2 = vadd.f32 %v2281_v6, %v2280_v50  ;;  %v2244_v57 = vadd.f32 %v2243_v58, %v2242_v12 }
 0x633   :  { %v2283_v15 = vrot.slane %v2282_v2, 2  ;;  %v2245_v60 = vrot.slane %v2244_v57, 2 }
 0x635   :  { %v2284_v1 = vadd.f32 %v2283_v15, %v2282_v2  ;;  %v2246_v33 = vadd.f32 %v2245_v60, %v2244_v57 }
 0x637   :  { %v2285_v24 = vrot.slane %v2284_v1, 1  ;;  %v2247_v52 = vrot.slane %v2246_v33, 1 }
 0x639   :  { %v2286_v39 = vadd.f32 %v2285_v24, %v2284_v1  ;;  %v2248_v5 = vadd.f32 %v2247_v52, %v2246_v33 }
 0x63b   :  { %v2249_v37 = vmul.f32 %v2248_v5, %v2230_v26  ;;  %v2287_v42 = vmul.f32 %v2286_v39, %v2230_v26 }
 0x63d   :  { %v2250_v53 = vadd.f32 %v2406_v47, %v2249_v37  ;;  %v2288_v21 = vadd.f32 %v2406_v47, %v2287_v42 }
 0x63f   :  { %v2251_v38 = vmax.f32 %v2250_v53, 0.0  ;;  %v2289_v30 = vmax.f32 %v2288_v21, 0.0 }
 0x641   :  { %v2255_v7 = vrot.slane %v2251_v38, %v4619_v43  ;;  %v2293_v29 = vrot.slane %v2289_v30, %v4619_v43 }
 0x643   :  { %v2256_v55 = vmul.f32 %v2405_v41, %v2255_v7  ;;  %v2294_v10 = vmul.f32 %v2405_v41, %v2293_v29 }
 0x645   :  { %v2257_v49 = vsel %vm2241_vm10, %v2256_v55, 0.0  ;;  %v2295_v56 = vsel %vm2241_vm10, %v2294_v10, 0.0 }
 0x646   :  { %2258 = vadd.xlane.f32.xlu0 %v2257_v49 }
 0x64a   :  { %2296 = vadd.xlane.f32.xlu0 %v2295_v56 }
 0x6d3   :  { %v2259_v27 = vpop.xlane.xlu0 %2258 }
 0x6d4   :  { %v2260_v17 = vmul.f32 %v2259_v27, %v2233_v31 }
 0x6d6   :  { %v2261_v18 = vadd.f32 %v2407_v34, %v2260_v17 }
 0x6d7   :  { %v2297_v3 = vpop.xlane.xlu0 %2296 }
 0x6d8   :  { %v2408_v0 = vmul.f32 -1.442695, %v2261_v18  ;;  %v2298_v62 = vmul.f32 %v2297_v3, %v2233_v31 }
 0x6da   :  { %2439 = vpow2.f32 %v2408_v0  ;;  %v2299_v48 = vadd.f32 %v2407_v34, %v2298_v62 }
 0x6dc   :  { %v2409_v63 = vmul.f32 -1.442695, %v2299_v48 }
 0x6de   :  { %2441 = vpow2.f32 %v2409_v63 }
 0x6e4   :  { %v2440_v11 = vpop.eup %2439 }
 0x6e5   :  { %v2265_v32 = vadd.f32 1.0, %v2440_v11 }
 0x6e7   :  { %2443 = vrcp.f32 %v2265_v32 }
 0x6e8   :  { %v2442_v35 = vpop.eup %2441 }
 0x6e9   :  { %v2303_v28 = vadd.f32 1.0, %v2442_v35 }
 0x6eb   :  { %2445 = vrcp.f32 %v2303_v28 }
 0x6f1   :  { %v2444_v14 = vpop.eup %2443 }
 0x6f2   :  { %2270 = vperm.xlu1 %2438, %v2444_v14  }
 0x6f5   :  { %v2446_v45 = vpop.eup %2445 }
 0x6f6   :  { %2308 = vperm.xlu0 %2437, %v2446_v45  }
 0x771   :  { %v2271_v9 = vpop.permute.xlu1 %2270 }
 0x772   :  { %v2273_v59 = vmul.f32 %v2271_v9, %v4289_v4  ;;  %v2274_v25 = vmul.f32 %v2271_v9, %v4293_v51 }
 0x774   :  { %v2313_v36 = vadd.f32 %v2273_v59, %v4620_v16  ;;  %v2314_v23 = vadd.f32 %v2274_v25, %v4621_v61 }
 0x775   :  { %v2309_v20 = vpop.permute.xlu0 %2308 }
 0x776   :  { %2317 = vst [vmem:[#allocation2] sm:$0xff] %v2313_v36  ;;  %2318 = vst [vmem:[#allocation2 + $0x8] sm:$0xff] %v2314_v23  ;;  %v2311_v19 = vmul.f32 %v2309_v20, %v4291_v44  ;;  %v2312_v13 = vmul.f32 %v2309_v20, %v4295_v54 }
 0x778   :  { %v2315_v8 = vadd.f32 %v2311_v19, %v4622_v40  ;;  %v2316_v46 = vadd.f32 %v2312_v13, %v4623_v22 }
 0x77a   :  { %2319 = vst [vmem:[#allocation2 + $0x10] sm:$0xff] %v2315_v8  ;;  %2320 = vst [vmem:[#allocation2 + $0x18] sm:$0xff] %v2316_v46 }
 0x77b   :  { %2466 = shalt.err (!%p2463_p4)
}
 0x77c   :  { %s2467_s30 = scalar_lea.hbm %s4360_s15, 512 }
 0x77d   :  { %p2468_p5 = scmp.ne.s32.totalorder %s4360_s15, %s2467_s30  ;;  %p2471_p6 = scmp.lt.u32.totalorder %s2467_s30, %s4360_s15 }
 0x77f   :  { %p2473_p7 = pnand %p2471_p6, %p2468_p5 }
 0x781   :  { %2476 = shalt.err (!%p2473_p7)
}
 0x782   :  { %2330 = dma.vmem_to_hbm [thread:$0]  %s2328_s14, 512, %s4360_s15, [#allocation3]  }
 0x783   :  { %2477 = dma.done.wait [#allocation3], 512  }
 0x784   :  { %2478 = vsyncadd [#allocation3], 4294966784 }
 0x785   :  { %2334 = vsyncpa [#allocation3], 1 }

</bundles_post_ra>
